<compile_context>
chip_gen: v6e
topology: v6e:2x2x1
jax: 0.10.0
libtpu: 0.0.40
codegen_flags: <defaults>
</compile_context>

<pallas_src>
import functools

import jax
import jax.numpy as jnp
from jax.experimental import pallas as pl
from jax.experimental.pallas import tpu as pltpu


def _round_up(x, m):
    return ((x + m - 1) // m) * m


def _mha(q, k, v, wo, bo, scratch, *, num_heads, sk_valid):
    """Multi-head scaled-dot-product attention + output projection.

    q: (TB, Sq, D) f32 (softmax scale already folded into the Q projection),
    k, v: (TB, Sk, D) f32; wo: (D, D) bf16; bo: (1, D) f32.
    scratch: VMEM ref (TB*Sq, D) bf16 used to assemble the head concat so the
    output projection is a single K=D matmul.  Returns (TB, Sq, D) f32.
    """
    TB, Sq, D = q.shape
    Sk = k.shape[1]
    hd = D // num_heads

    for h in range(num_heads):
        sl = slice(h * hd, (h + 1) * hd)        # PyTorch heads: contiguous chunks of D
        qh = q[:, :, sl].astype(jnp.bfloat16)
        kh = k[:, :, sl].astype(jnp.bfloat16)
        vh = v[:, :, sl].astype(jnp.bfloat16)
        s = jnp.einsum('bqd,bkd->bqk', qh, kh,
                       preferred_element_type=jnp.float32)        # (TB, Sq, Sk) f32
        if Sk != sk_valid:                                         # mask zero-padded keys
            col = jax.lax.broadcasted_iota(jnp.int32, s.shape, 2)
            s = jnp.where(col < sk_valid, s, -1e30)
        s = s - jnp.max(s, axis=-1, keepdims=True)                 # stable softmax (f32)
        p = jnp.exp(s)
        p = p * pl.reciprocal(jnp.sum(p, axis=-1, keepdims=True), approx=True)
        oh = jnp.einsum('bqk,bkd->bqd', p.astype(jnp.bfloat16), vh,
                        preferred_element_type=jnp.float32)        # (TB, Sq, hd) f32
        # Place this head's output at its static lane offset in the concat scratch.
        scratch[:, sl] = oh.reshape(TB * Sq, hd).astype(jnp.bfloat16)

    attn = jnp.dot(scratch[...], wo, preferred_element_type=jnp.float32) + bo
    return attn.reshape(TB, Sq, D)


def decoder_layer_kernel(tgt_ref, mem_ref,
                         sa_qkv_w_ref, sa_qkv_b_ref, sa_ow_ref, sa_ob_ref,
                         ca_q_w_ref, ca_q_b_ref, ca_kv_w_ref, ca_kv_b_ref,
                         ca_ow_ref, ca_ob_ref,
                         w1_ref, b1_ref, w2_ref, b2_ref,
                         out_ref, attn_scr,
                         *, num_heads, s_valid, sm_valid):
    TB, S, D = tgt_ref.shape
    Sm = mem_ref.shape[1]

    x = tgt_ref[...]            # (TB, S, D)  f32
    mem = mem_ref[...]          # (TB, Sm, D) f32

    # ---- 1) self-attention (fused QKV projection, bf16 MXU / f32 acc) + residual
    xf = x.reshape(TB * S, D)
    qkv = jnp.dot(xf.astype(jnp.bfloat16), sa_qkv_w_ref[...],
                  preferred_element_type=jnp.float32) + sa_qkv_b_ref[...]
    q = qkv[:, :D].reshape(TB, S, D)
    k = qkv[:, D:2 * D].reshape(TB, S, D)
    v = qkv[:, 2 * D:].reshape(TB, S, D)
    x = x + _mha(q, k, v, sa_ow_ref[...], sa_ob_ref[...], attn_scr,
                 num_heads=num_heads, sk_valid=s_valid)

    # ---- 2) cross-attention (fused KV projection of memory) + residual --------
    xf = x.reshape(TB * S, D)
    mf = mem.reshape(TB * Sm, D)
    q = (jnp.dot(xf.astype(jnp.bfloat16), ca_q_w_ref[...],
                 preferred_element_type=jnp.float32) + ca_q_b_ref[...]).reshape(TB, S, D)
    kv = jnp.dot(mf.astype(jnp.bfloat16), ca_kv_w_ref[...],
                 preferred_element_type=jnp.float32) + ca_kv_b_ref[...]
    k = kv[:, :D].reshape(TB, Sm, D)
    v = kv[:, D:].reshape(TB, Sm, D)
    x = x + _mha(q, k, v, ca_ow_ref[...], ca_ob_ref[...], attn_scr,
                 num_heads=num_heads, sk_valid=sm_valid)

    # ---- 3) feed-forward + residual -------------------------------------------
    # dropout(p=0.0) and LeakyReLU(negative_slope=float(True)=1.0) are exact
    # identities, so linear2(dropout(activation(linear1(x)))) == linear2(linear1(x)).
    xf = x.reshape(TB * S, D)
    h = jnp.dot(xf.astype(jnp.bfloat16), w1_ref[...],
                preferred_element_type=jnp.float32) + b1_ref[...]
    y = jnp.dot(h.astype(jnp.bfloat16), w2_ref[...],
                preferred_element_type=jnp.float32) + b2_ref[...]
    x = x + y.reshape(TB, S, D)

    out_ref[...] = x.astype(out_ref.dtype)


def prepare_params(params, *, num_heads):
    """One-time (off the hot path) conversion of f32 (in, out)-layout parameters
    into kernel-ready form: softmax scale folded into the Q projections, the
    cross-attn in-proj split into Q / fused-KV, d_ff zero-padded to a multiple
    of 128 lanes (exact), matmul weights cast to bf16 (biases stay f32)."""
    D = params["sa_out_w"].shape[0]
    d_ff = params["w1"].shape[1]
    hd = D // num_heads
    scale = 1.0 / (hd ** 0.5)

    sa_qkv_w = params["sa_in_w"].at[:, :D].multiply(scale)
    sa_qkv_b = params["sa_in_b"].at[:, :D].multiply(scale)
    ca_q_w = params["ca_in_w"][:, :D] * scale
    ca_q_b = params["ca_in_b"][:, :D] * scale
    ca_kv_w = params["ca_in_w"][:, D:]
    ca_kv_b = params["ca_in_b"][:, D:]

    d_ff_p = _round_up(d_ff, 128)
    w1p = jnp.zeros((D, d_ff_p), jnp.float32).at[:, :d_ff].set(params["w1"])
    b1p = jnp.zeros((1, d_ff_p), jnp.float32).at[:, :d_ff].set(params["b1"])
    w2p = jnp.zeros((d_ff_p, D), jnp.float32).at[:d_ff, :].set(params["w2"])

    bf16 = lambda a: a.astype(jnp.bfloat16)
    return dict(
        sa_qkv_w=bf16(sa_qkv_w), sa_qkv_b=sa_qkv_b,
        sa_out_w=bf16(params["sa_out_w"]), sa_out_b=params["sa_out_b"],
        ca_q_w=bf16(ca_q_w), ca_q_b=ca_q_b,
        ca_kv_w=bf16(ca_kv_w), ca_kv_b=ca_kv_b,
        ca_out_w=bf16(params["ca_out_w"]), ca_out_b=params["ca_out_b"],
        w1=bf16(w1p), b1=b1p, w2=bf16(w2p), b2=params["b2"],
    )


def transformer_decoder_layer(target, memory, kparams, *, num_heads,
                              batch_tile=1, single_buffered_weights=True):
    """target: (S, B, D); memory: (Sm, B, D); kparams from prepare_params().
    Returns (S, B, D) float32."""
    S, B, D = target.shape
    Sm = memory.shape[0]
    d_ff_p = kparams["w1"].shape[1]
    assert D % num_heads == 0

    TB = max(1, min(batch_tile, B))
    B_pad = _round_up(B, TB)
    S_pad = _round_up(S, 8)      # sublane-align seq: in-kernel reshapes are layout no-ops
    Sm_pad = _round_up(Sm, 8)

    # (S, B, D) -> (B, S, D): lane-major (seq, d_model) slabs inside the kernel.
    # TODO(synk): keep the surrounding model batch-major (or relayout in-kernel)
    # to also remove these two extra HBM transpose passes.
    tgt_b = jnp.transpose(target, (1, 0, 2))
    mem_b = jnp.transpose(memory, (1, 0, 2))
    if (B_pad, S_pad) != (B, S):
        tgt_b = jnp.pad(tgt_b, ((0, B_pad - B), (0, S_pad - S), (0, 0)))
    if (B_pad, Sm_pad) != (B, Sm):
        mem_b = jnp.pad(mem_b, ((0, B_pad - B), (0, Sm_pad - Sm), (0, 0)))

    operands = (
        tgt_b, mem_b,
        kparams["sa_qkv_w"], kparams["sa_qkv_b"], kparams["sa_out_w"], kparams["sa_out_b"],
        kparams["ca_q_w"], kparams["ca_q_b"], kparams["ca_kv_w"], kparams["ca_kv_b"],
        kparams["ca_out_w"], kparams["ca_out_b"],
        kparams["w1"], kparams["b1"], kparams["w2"], kparams["b2"],
    )

    # Per-generation-safe VMEM budget: resident weights + pipelined activation
    # blocks + margin, clamped to [32 MiB, 56 MiB] (fits v7x's 64 MiB; plenty of
    # headroom on 128 MiB v5e/v6e parts).
    weight_bytes = sum(int(a.size) * a.dtype.itemsize for a in operands[2:])
    act_bytes = 4 * TB * (2 * S_pad + Sm_pad) * D
    vmem_limit = int(min(56 * 2**20, max(32 * 2**20, 2 * weight_bytes + 6 * act_bytes)))

    kernel = functools.partial(decoder_layer_kernel, num_heads=num_heads,
                               s_valid=S, sm_valid=Sm)

    def act_spec(seq):
        return pl.BlockSpec((TB, seq, D), lambda b: (b, 0, 0))

    def run(single_buf):
        def w_spec(shape):
            zeros = (0,) * len(shape)
            if single_buf:
                # Grid-invariant weights: fetched once and kept resident; a single
                # buffer halves their VMEM footprint vs default double-buffering.
                return pl.BlockSpec(shape, lambda b, _z=zeros: _z,
                                    pipeline_mode=pl.Buffered(1))
            return pl.BlockSpec(shape, lambda b, _z=zeros: _z)

        out_b = pl.pallas_call(
            kernel,
            out_shape=jax.ShapeDtypeStruct((B_pad, S_pad, D), jnp.float32),
            grid_spec=pltpu.PrefetchScalarGridSpec(
                num_scalar_prefetch=0,
                grid=(B_pad // TB,),
                in_specs=[
                    act_spec(S_pad),                       # target block
                    act_spec(Sm_pad),                      # memory block
                    w_spec((D, 3 * D)), w_spec((1, 3 * D)),      # self-attn fused QKV
                    w_spec((D, D)), w_spec((1, D)),              # self-attn out-proj
                    w_spec((D, D)), w_spec((1, D)),              # cross-attn Q
                    w_spec((D, 2 * D)), w_spec((1, 2 * D)),      # cross-attn fused KV
                    w_spec((D, D)), w_spec((1, D)),              # cross-attn out-proj
                    w_spec((D, d_ff_p)), w_spec((1, d_ff_p)),    # linear1 (padded)
                    w_spec((d_ff_p, D)), w_spec((1, D)),         # linear2 (padded)
                ],
                out_specs=act_spec(S_pad),
                scratch_shapes=[pltpu.VMEM((TB * S_pad, D), jnp.bfloat16)],
            ),
            compiler_params=pltpu.CompilerParams(
                dimension_semantics=("parallel",),   # v7x: both TCs split the batch tiles
                vmem_limit_bytes=vmem_limit,
            ),
        )(*operands)
        return jax.block_until_ready(out_b)

    if single_buffered_weights:
        try:
            out_b = run(True)
        except Exception:
            # pipeline_mode=pl.Buffered(1) not supported by this jax build:
            # fall back to default (double-buffered) weight blocks.
            out_b = run(False)
    else:
        out_b = run(False)

    return jnp.transpose(out_b[:B, :S], (1, 0, 2))   # back to (S, B, D)


def init_params(key, d_model, d_ff):
    ks = jax.random.split(key, 12)
    w = lambda k, shape, s=0.1: jax.random.normal(k, shape, jnp.float32) * s
    return dict(
        sa_in_w=w(ks[0], (d_model, 3 * d_model)),
        sa_in_b=w(ks[1], (1, 3 * d_model)),
        sa_out_w=w(ks[2], (d_model, d_model)),
        sa_out_b=w(ks[3], (1, d_model)),
        ca_in_w=w(ks[4], (d_model, 3 * d_model)),
        ca_in_b=w(ks[5], (1, 3 * d_model)),
        ca_out_w=w(ks[6], (d_model, d_model)),
        ca_out_b=w(ks[7], (1, d_model)),
        w1=w(ks[8], (d_model, d_ff)),
        b1=w(ks[9], (1, d_ff)),
        w2=w(ks[10], (d_ff, d_model)),
        b2=w(ks[11], (1, d_model)),
    )


# ---------------------------- pure-JAX reference ----------------------------

def _ref_mha(x_q, x_kv, in_w, in_b, out_w, out_b, *, num_heads):
    D = x_q.shape[-1]
    hd = D // num_heads
    scale = 1.0 / (hd ** 0.5)
    q = x_q @ in_w[:, :D] + in_b[:, :D]
    k = x_kv @ in_w[:, D:2 * D] + in_b[:, D:2 * D]
    v = x_kv @ in_w[:, 2 * D:] + in_b[:, 2 * D:]
    outs = []
    for h in range(num_heads):
        sl = slice(h * hd, (h + 1) * hd)
        s = (q[:, sl] * scale) @ k[:, sl].T
        s = s - s.max(axis=-1, keepdims=True)
        p = jnp.exp(s)
        p = p / p.sum(axis=-1, keepdims=True)
        outs.append(p @ v[:, sl])
    attn = jnp.concatenate(outs, axis=-1)
    return attn @ out_w + out_b


def reference(target, memory, p, *, num_heads):
    """Pure-JAX f32 forward of the same module (per batch element)."""
    S, B, D = target.shape
    outs = []
    for b in range(B):
        x = target[:, b, :]
        mem = memory[:, b, :]
        x = x + _ref_mha(x, x, p["sa_in_w"], p["sa_in_b"],
                         p["sa_out_w"], p["sa_out_b"], num_heads=num_heads)
        x = x + _ref_mha(x, mem, p["ca_in_w"], p["ca_in_b"],
                         p["ca_out_w"], p["ca_out_b"], num_heads=num_heads)
        h = x @ p["w1"] + p["b1"]
        # LeakyReLU(negative_slope=1.0) and dropout(p=0.0) are identities.
        x = x + (h @ p["w2"] + p["b2"])
        outs.append(x)
    return jnp.stack(outs, axis=1)


if __name__ == "__main__":
    S, B, D = 8, 2, 32          # seq len, batch, d_model
    Sm = 8                      # memory seq len
    num_heads = 4
    d_ff = 16

    key = jax.random.PRNGKey(0)
    k_t, k_m, k_p = jax.random.split(key, 3)
    target = jax.random.normal(k_t, (S, B, D), jnp.float32)
    memory = jax.random.normal(k_m, (Sm, B, D), jnp.float32)
    params = init_params(k_p, D, d_ff)

    # One-time weight preparation (hoisted out of the forward hot path).
    kparams = prepare_params(params, num_heads=num_heads)

    out = transformer_decoder_layer(target, memory, kparams,
                                    num_heads=num_heads, batch_tile=1)
    out = jax.block_until_ready(out)

    ref = jax.block_until_ready(reference(target, memory, params, num_heads=num_heads))
    assert out.shape == (S, B, D)
    # bf16 matmul operands -> loosened tolerance vs the f32 reference.
    assert jnp.allclose(out, ref, atol=5e-2, rtol=5e-2), "mismatch vs pure-JAX reference"

    print("KERNEL_OK")
</pallas_src>

<mosaic_0001>
module attributes {stable_mosaic.version = 11 : i64} {
  func.func @decoder_layer_kernel(%arg0: i32, %arg1: memref<1x8x32xf32, #tpu.memory_space<vmem>>, %arg2: memref<1x8x32xf32, #tpu.memory_space<vmem>>, %arg3: memref<32x96xbf16, #tpu.memory_space<vmem>>, %arg4: memref<1x96xf32, #tpu.memory_space<vmem>>, %arg5: memref<32x32xbf16, #tpu.memory_space<vmem>>, %arg6: memref<1x32xf32, #tpu.memory_space<vmem>>, %arg7: memref<32x32xbf16, #tpu.memory_space<vmem>>, %arg8: memref<1x32xf32, #tpu.memory_space<vmem>>, %arg9: memref<32x64xbf16, #tpu.memory_space<vmem>>, %arg10: memref<1x64xf32, #tpu.memory_space<vmem>>, %arg11: memref<32x32xbf16, #tpu.memory_space<vmem>>, %arg12: memref<1x32xf32, #tpu.memory_space<vmem>>, %arg13: memref<32x128xbf16, #tpu.memory_space<vmem>>, %arg14: memref<1x128xf32, #tpu.memory_space<vmem>>, %arg15: memref<128x32xbf16, #tpu.memory_space<vmem>>, %arg16: memref<1x32xf32, #tpu.memory_space<vmem>>, %arg17: memref<1x8x32xf32, #tpu.memory_space<vmem>>, %arg18: memref<8x32xbf16, #tpu.memory_space<vmem>>) attributes {dimension_semantics = [#tpu.dimension_semantics<parallel>], iteration_bounds = array<i64: 2>, scalar_prefetch = 0 : i64, scratch_operands = 1 : i64, tpu.core_type = #tpu.core_type<tc>, window_params = [{transform_indices = @transform_0, window_bounds = array<i64: 1, 8, 32>}, {transform_indices = @transform_1, window_bounds = array<i64: 1, 8, 32>}, {pipeline_mode = #tpu.pipeline_mode<synchronous>, transform_indices = @transform_2, window_bounds = array<i64: 32, 96>}, {pipeline_mode = #tpu.pipeline_mode<synchronous>, transform_indices = @transform_3, window_bounds = array<i64: 1, 96>}, {pipeline_mode = #tpu.pipeline_mode<synchronous>, transform_indices = @transform_4, window_bounds = array<i64: 32, 32>}, {pipeline_mode = #tpu.pipeline_mode<synchronous>, transform_indices = @transform_5, window_bounds = array<i64: 1, 32>}, {pipeline_mode = #tpu.pipeline_mode<synchronous>, transform_indices = @transform_6, window_bounds = array<i64: 32, 32>}, {pipeline_mode = #tpu.pipeline_mode<synchronous>, transform_indices = @transform_7, window_bounds = array<i64: 1, 32>}, {pipeline_mode = #tpu.pipeline_mode<synchronous>, transform_indices = @transform_8, window_bounds = array<i64: 32, 64>}, {pipeline_mode = #tpu.pipeline_mode<synchronous>, transform_indices = @transform_9, window_bounds = array<i64: 1, 64>}, {pipeline_mode = #tpu.pipeline_mode<synchronous>, transform_indices = @transform_10, window_bounds = array<i64: 32, 32>}, {pipeline_mode = #tpu.pipeline_mode<synchronous>, transform_indices = @transform_11, window_bounds = array<i64: 1, 32>}, {pipeline_mode = #tpu.pipeline_mode<synchronous>, transform_indices = @transform_12, window_bounds = array<i64: 32, 128>}, {pipeline_mode = #tpu.pipeline_mode<synchronous>, transform_indices = @transform_13, window_bounds = array<i64: 1, 128>}, {pipeline_mode = #tpu.pipeline_mode<synchronous>, transform_indices = @transform_14, window_bounds = array<i64: 128, 32>}, {pipeline_mode = #tpu.pipeline_mode<synchronous>, transform_indices = @transform_15, window_bounds = array<i64: 1, 32>}, {transform_indices = @transform_16, window_bounds = array<i64: 1, 8, 32>}]} {
    %c0 = arith.constant 0 : index
    %c0_0 = arith.constant 0 : index
    %c0_1 = arith.constant 0 : index
    %0 = vector.load %arg1[%c0, %c0_0, %c0_1] : memref<1x8x32xf32, #tpu.memory_space<vmem>>, vector<1x8x32xf32>
    %c0_2 = arith.constant 0 : index
    %c0_3 = arith.constant 0 : index
    %c0_4 = arith.constant 0 : index
    %1 = vector.load %arg2[%c0_2, %c0_3, %c0_4] : memref<1x8x32xf32, #tpu.memory_space<vmem>>, vector<1x8x32xf32>
    %2 = vector.shape_cast %0 : vector<1x8x32xf32> to vector<8x32xf32>
    %3 = arith.truncf %2 : vector<8x32xf32> to vector<8x32xbf16>
    %c0_5 = arith.constant 0 : index
    %c0_6 = arith.constant 0 : index
    %4 = vector.load %arg3[%c0_5, %c0_6] : memref<32x96xbf16, #tpu.memory_space<vmem>>, vector<32x96xbf16>
    %cst = arith.constant dense<0.000000e+00> : vector<8x96xf32>
    %5 = tpu.matmul %3, %4, %cst {dimension_numbers = #tpu.dot_dimension_numbers<[1], [0], [0], [1], [0, 0, 1, 1], [], []>} : vector<8x32xbf16>, vector<32x96xbf16>, vector<8x96xf32> -> vector<8x96xf32>
    %c0_7 = arith.constant 0 : index
    %c0_8 = arith.constant 0 : index
    %6 = vector.load %arg4[%c0_7, %c0_8] : memref<1x96xf32, #tpu.memory_space<vmem>>, vector<1x96xf32>
    %7 = vector.broadcast %6 : vector<1x96xf32> to vector<8x96xf32>
    %8 = arith.addf %5, %7 : vector<8x96xf32>
    %9 = vector.extract_strided_slice %8 {offsets = [0, 0], sizes = [8, 32], strides = [1, 1]} : vector<8x96xf32> to vector<8x32xf32>
    %10 = vector.shape_cast %9 : vector<8x32xf32> to vector<1x8x32xf32>
    %11 = vector.extract_strided_slice %8 {offsets = [0, 32], sizes = [8, 32], strides = [1, 1]} : vector<8x96xf32> to vector<8x32xf32>
    %12 = vector.shape_cast %11 : vector<8x32xf32> to vector<1x8x32xf32>
    %13 = vector.extract_strided_slice %8 {offsets = [0, 64], sizes = [8, 32], strides = [1, 1]} : vector<8x96xf32> to vector<8x32xf32>
    %14 = vector.shape_cast %13 : vector<8x32xf32> to vector<1x8x32xf32>
    %c0_9 = arith.constant 0 : index
    %c0_10 = arith.constant 0 : index
    %15 = vector.load %arg5[%c0_9, %c0_10] : memref<32x32xbf16, #tpu.memory_space<vmem>>, vector<32x32xbf16>
    %c0_11 = arith.constant 0 : index
    %c0_12 = arith.constant 0 : index
    %16 = vector.load %arg6[%c0_11, %c0_12] : memref<1x32xf32, #tpu.memory_space<vmem>>, vector<1x32xf32>
    %17 = vector.extract_strided_slice %10 {offsets = [0, 0, 0], sizes = [1, 8, 8], strides = [1, 1, 1]} : vector<1x8x32xf32> to vector<1x8x8xf32>
    %18 = arith.truncf %17 : vector<1x8x8xf32> to vector<1x8x8xbf16>
    %19 = vector.extract_strided_slice %12 {offsets = [0, 0, 0], sizes = [1, 8, 8], strides = [1, 1, 1]} : vector<1x8x32xf32> to vector<1x8x8xf32>
    %20 = arith.truncf %19 : vector<1x8x8xf32> to vector<1x8x8xbf16>
    %21 = vector.extract_strided_slice %14 {offsets = [0, 0, 0], sizes = [1, 8, 8], strides = [1, 1, 1]} : vector<1x8x32xf32> to vector<1x8x8xf32>
    %22 = arith.truncf %21 : vector<1x8x8xf32> to vector<1x8x8xbf16>
    "tpu.trace_start"() <{level = 10 : i32, message = "bqd,bkd->bqk"}> : () -> ()
    %cst_13 = arith.constant dense<0.000000e+00> : vector<1x8x8xf32>
    %23 = tpu.matmul %18, %20, %cst_13 {dimension_numbers = #tpu.dot_dimension_numbers<[2], [2], [1], [1], [0, 0, 0, 1, 1, 1], [0], [0]>} : vector<1x8x8xbf16>, vector<1x8x8xbf16>, vector<1x8x8xf32> -> vector<1x8x8xf32>
    "tpu.trace_stop"() : () -> ()
    %cst_14 = arith.constant dense<0xFF800000> : vector<1x8xf32>
    %24 = vector.multi_reduction <maximumf>, %23, %cst_14 [2] : vector<1x8x8xf32> to vector<1x8xf32>
    %25 = vector.shape_cast %24 : vector<1x8xf32> to vector<1x8x1xf32>
    %26 = vector.broadcast %25 : vector<1x8x1xf32> to vector<1x8x8xf32>
    %27 = arith.subf %23, %26 : vector<1x8x8xf32>
    %28 = math.exp %27 : vector<1x8x8xf32>
    %cst_15 = arith.constant dense<0.000000e+00> : vector<1x8xf32>
    %29 = vector.multi_reduction <add>, %28, %cst_15 [2] : vector<1x8x8xf32> to vector<1x8xf32>
    %30 = vector.shape_cast %29 : vector<1x8xf32> to vector<1x8x1xf32>
    %31 = tpu.reciprocal %30 {approx = true} : vector<1x8x1xf32> -> vector<1x8x1xf32>
    %32 = vector.broadcast %31 : vector<1x8x1xf32> to vector<1x8x8xf32>
    %33 = arith.mulf %28, %32 : vector<1x8x8xf32>
    %34 = arith.truncf %33 : vector<1x8x8xf32> to vector<1x8x8xbf16>
    "tpu.trace_start"() <{level = 10 : i32, message = "bqk,bkd->bqd"}> : () -> ()
    %cst_16 = arith.constant dense<0.000000e+00> : vector<1x8x8xf32>
    %35 = tpu.matmul %34, %22, %cst_16 {dimension_numbers = #tpu.dot_dimension_numbers<[2], [1], [1], [2], [0, 0, 0, 1, 1, 2], [0], [0]>} : vector<1x8x8xbf16>, vector<1x8x8xbf16>, vector<1x8x8xf32> -> vector<1x8x8xf32>
    "tpu.trace_stop"() : () -> ()
    %36 = vector.shape_cast %35 : vector<1x8x8xf32> to vector<8x8xf32>
    %37 = arith.truncf %36 : vector<8x8xf32> to vector<8x8xbf16>
    %c0_17 = arith.constant 0 : index
    %c0_18 = arith.constant 0 : index
    %38 = vector.load %arg18[%c0_17, %c0_18] : memref<8x32xbf16, #tpu.memory_space<vmem>>, vector<8x8xbf16>
    tpu.vector_store %arg18[%c0_17, %c0_18], %37 {strides = array<i32>} : memref<8x32xbf16, #tpu.memory_space<vmem>>, vector<8x8xbf16>,
    %39 = vector.extract_strided_slice %10 {offsets = [0, 0, 8], sizes = [1, 8, 8], strides = [1, 1, 1]} : vector<1x8x32xf32> to vector<1x8x8xf32>
    %40 = arith.truncf %39 : vector<1x8x8xf32> to vector<1x8x8xbf16>
    %41 = vector.extract_strided_slice %12 {offsets = [0, 0, 8], sizes = [1, 8, 8], strides = [1, 1, 1]} : vector<1x8x32xf32> to vector<1x8x8xf32>
    %42 = arith.truncf %41 : vector<1x8x8xf32> to vector<1x8x8xbf16>
    %43 = vector.extract_strided_slice %14 {offsets = [0, 0, 8], sizes = [1, 8, 8], strides = [1, 1, 1]} : vector<1x8x32xf32> to vector<1x8x8xf32>
    %44 = arith.truncf %43 : vector<1x8x8xf32> to vector<1x8x8xbf16>
    "tpu.trace_start"() <{level = 10 : i32, message = "bqd,bkd->bqk"}> : () -> ()
    %cst_19 = arith.constant dense<0.000000e+00> : vector<1x8x8xf32>
    %45 = tpu.matmul %40, %42, %cst_19 {dimension_numbers = #tpu.dot_dimension_numbers<[2], [2], [1], [1], [0, 0, 0, 1, 1, 1], [0], [0]>} : vector<1x8x8xbf16>, vector<1x8x8xbf16>, vector<1x8x8xf32> -> vector<1x8x8xf32>
    "tpu.trace_stop"() : () -> ()
    %cst_20 = arith.constant dense<0xFF800000> : vector<1x8xf32>
    %46 = vector.multi_reduction <maximumf>, %45, %cst_20 [2] : vector<1x8x8xf32> to vector<1x8xf32>
    %47 = vector.shape_cast %46 : vector<1x8xf32> to vector<1x8x1xf32>
    %48 = vector.broadcast %47 : vector<1x8x1xf32> to vector<1x8x8xf32>
    %49 = arith.subf %45, %48 : vector<1x8x8xf32>
    %50 = math.exp %49 : vector<1x8x8xf32>
    %cst_21 = arith.constant dense<0.000000e+00> : vector<1x8xf32>
    %51 = vector.multi_reduction <add>, %50, %cst_21 [2] : vector<1x8x8xf32> to vector<1x8xf32>
    %52 = vector.shape_cast %51 : vector<1x8xf32> to vector<1x8x1xf32>
    %53 = tpu.reciprocal %52 {approx = true} : vector<1x8x1xf32> -> vector<1x8x1xf32>
    %54 = vector.broadcast %53 : vector<1x8x1xf32> to vector<1x8x8xf32>
    %55 = arith.mulf %50, %54 : vector<1x8x8xf32>
    %56 = arith.truncf %55 : vector<1x8x8xf32> to vector<1x8x8xbf16>
    "tpu.trace_start"() <{level = 10 : i32, message = "bqk,bkd->bqd"}> : () -> ()
    %cst_22 = arith.constant dense<0.000000e+00> : vector<1x8x8xf32>
    %57 = tpu.matmul %56, %44, %cst_22 {dimension_numbers = #tpu.dot_dimension_numbers<[2], [1], [1], [2], [0, 0, 0, 1, 1, 2], [0], [0]>} : vector<1x8x8xbf16>, vector<1x8x8xbf16>, vector<1x8x8xf32> -> vector<1x8x8xf32>
    "tpu.trace_stop"() : () -> ()
    %58 = vector.shape_cast %57 : vector<1x8x8xf32> to vector<8x8xf32>
    %59 = arith.truncf %58 : vector<8x8xf32> to vector<8x8xbf16>
    %c0_23 = arith.constant 0 : index
    %c8 = arith.constant 8 : index
    %60 = vector.load %arg18[%c0_23, %c8] : memref<8x32xbf16, #tpu.memory_space<vmem>>, vector<8x8xbf16>
    tpu.vector_store %arg18[%c0_23, %c8], %59 {strides = array<i32>} : memref<8x32xbf16, #tpu.memory_space<vmem>>, vector<8x8xbf16>,
    %61 = vector.extract_strided_slice %10 {offsets = [0, 0, 16], sizes = [1, 8, 8], strides = [1, 1, 1]} : vector<1x8x32xf32> to vector<1x8x8xf32>
    %62 = arith.truncf %61 : vector<1x8x8xf32> to vector<1x8x8xbf16>
    %63 = vector.extract_strided_slice %12 {offsets = [0, 0, 16], sizes = [1, 8, 8], strides = [1, 1, 1]} : vector<1x8x32xf32> to vector<1x8x8xf32>
    %64 = arith.truncf %63 : vector<1x8x8xf32> to vector<1x8x8xbf16>
    %65 = vector.extract_strided_slice %14 {offsets = [0, 0, 16], sizes = [1, 8, 8], strides = [1, 1, 1]} : vector<1x8x32xf32> to vector<1x8x8xf32>
    %66 = arith.truncf %65 : vector<1x8x8xf32> to vector<1x8x8xbf16>
    "tpu.trace_start"() <{level = 10 : i32, message = "bqd,bkd->bqk"}> : () -> ()
    %cst_24 = arith.constant dense<0.000000e+00> : vector<1x8x8xf32>
    %67 = tpu.matmul %62, %64, %cst_24 {dimension_numbers = #tpu.dot_dimension_numbers<[2], [2], [1], [1], [0, 0, 0, 1, 1, 1], [0], [0]>} : vector<1x8x8xbf16>, vector<1x8x8xbf16>, vector<1x8x8xf32> -> vector<1x8x8xf32>
    "tpu.trace_stop"() : () -> ()
    %cst_25 = arith.constant dense<0xFF800000> : vector<1x8xf32>
    %68 = vector.multi_reduction <maximumf>, %67, %cst_25 [2] : vector<1x8x8xf32> to vector<1x8xf32>
    %69 = vector.shape_cast %68 : vector<1x8xf32> to vector<1x8x1xf32>
    %70 = vector.broadcast %69 : vector<1x8x1xf32> to vector<1x8x8xf32>
    %71 = arith.subf %67, %70 : vector<1x8x8xf32>
    %72 = math.exp %71 : vector<1x8x8xf32>
    %cst_26 = arith.constant dense<0.000000e+00> : vector<1x8xf32>
    %73 = vector.multi_reduction <add>, %72, %cst_26 [2] : vector<1x8x8xf32> to vector<1x8xf32>
    %74 = vector.shape_cast %73 : vector<1x8xf32> to vector<1x8x1xf32>
    %75 = tpu.reciprocal %74 {approx = true} : vector<1x8x1xf32> -> vector<1x8x1xf32>
    %76 = vector.broadcast %75 : vector<1x8x1xf32> to vector<1x8x8xf32>
    %77 = arith.mulf %72, %76 : vector<1x8x8xf32>
    %78 = arith.truncf %77 : vector<1x8x8xf32> to vector<1x8x8xbf16>
    "tpu.trace_start"() <{level = 10 : i32, message = "bqk,bkd->bqd"}> : () -> ()
    %cst_27 = arith.constant dense<0.000000e+00> : vector<1x8x8xf32>
    %79 = tpu.matmul %78, %66, %cst_27 {dimension_numbers = #tpu.dot_dimension_numbers<[2], [1], [1], [2], [0, 0, 0, 1, 1, 2], [0], [0]>} : vector<1x8x8xbf16>, vector<1x8x8xbf16>, vector<1x8x8xf32> -> vector<1x8x8xf32>
    "tpu.trace_stop"() : () -> ()
    %80 = vector.shape_cast %79 : vector<1x8x8xf32> to vector<8x8xf32>
    %81 = arith.truncf %80 : vector<8x8xf32> to vector<8x8xbf16>
    %c0_28 = arith.constant 0 : index
    %c16 = arith.constant 16 : index
    %82 = vector.load %arg18[%c0_28, %c16] : memref<8x32xbf16, #tpu.memory_space<vmem>>, vector<8x8xbf16>
    tpu.vector_store %arg18[%c0_28, %c16], %81 {strides = array<i32>} : memref<8x32xbf16, #tpu.memory_space<vmem>>, vector<8x8xbf16>,
    %83 = vector.extract_strided_slice %10 {offsets = [0, 0, 24], sizes = [1, 8, 8], strides = [1, 1, 1]} : vector<1x8x32xf32> to vector<1x8x8xf32>
    %84 = arith.truncf %83 : vector<1x8x8xf32> to vector<1x8x8xbf16>
    %85 = vector.extract_strided_slice %12 {offsets = [0, 0, 24], sizes = [1, 8, 8], strides = [1, 1, 1]} : vector<1x8x32xf32> to vector<1x8x8xf32>
    %86 = arith.truncf %85 : vector<1x8x8xf32> to vector<1x8x8xbf16>
    %87 = vector.extract_strided_slice %14 {offsets = [0, 0, 24], sizes = [1, 8, 8], strides = [1, 1, 1]} : vector<1x8x32xf32> to vector<1x8x8xf32>
    %88 = arith.truncf %87 : vector<1x8x8xf32> to vector<1x8x8xbf16>
    "tpu.trace_start"() <{level = 10 : i32, message = "bqd,bkd->bqk"}> : () -> ()
    %cst_29 = arith.constant dense<0.000000e+00> : vector<1x8x8xf32>
    %89 = tpu.matmul %84, %86, %cst_29 {dimension_numbers = #tpu.dot_dimension_numbers<[2], [2], [1], [1], [0, 0, 0, 1, 1, 1], [0], [0]>} : vector<1x8x8xbf16>, vector<1x8x8xbf16>, vector<1x8x8xf32> -> vector<1x8x8xf32>
    "tpu.trace_stop"() : () -> ()
    %cst_30 = arith.constant dense<0xFF800000> : vector<1x8xf32>
    %90 = vector.multi_reduction <maximumf>, %89, %cst_30 [2] : vector<1x8x8xf32> to vector<1x8xf32>
    %91 = vector.shape_cast %90 : vector<1x8xf32> to vector<1x8x1xf32>
    %92 = vector.broadcast %91 : vector<1x8x1xf32> to vector<1x8x8xf32>
    %93 = arith.subf %89, %92 : vector<1x8x8xf32>
    %94 = math.exp %93 : vector<1x8x8xf32>
    %cst_31 = arith.constant dense<0.000000e+00> : vector<1x8xf32>
    %95 = vector.multi_reduction <add>, %94, %cst_31 [2] : vector<1x8x8xf32> to vector<1x8xf32>
    %96 = vector.shape_cast %95 : vector<1x8xf32> to vector<1x8x1xf32>
    %97 = tpu.reciprocal %96 {approx = true} : vector<1x8x1xf32> -> vector<1x8x1xf32>
    %98 = vector.broadcast %97 : vector<1x8x1xf32> to vector<1x8x8xf32>
    %99 = arith.mulf %94, %98 : vector<1x8x8xf32>
    %100 = arith.truncf %99 : vector<1x8x8xf32> to vector<1x8x8xbf16>
    "tpu.trace_start"() <{level = 10 : i32, message = "bqk,bkd->bqd"}> : () -> ()
    %cst_32 = arith.constant dense<0.000000e+00> : vector<1x8x8xf32>
    %101 = tpu.matmul %100, %88, %cst_32 {dimension_numbers = #tpu.dot_dimension_numbers<[2], [1], [1], [2], [0, 0, 0, 1, 1, 2], [0], [0]>} : vector<1x8x8xbf16>, vector<1x8x8xbf16>, vector<1x8x8xf32> -> vector<1x8x8xf32>
    "tpu.trace_stop"() : () -> ()
    %102 = vector.shape_cast %101 : vector<1x8x8xf32> to vector<8x8xf32>
    %103 = arith.truncf %102 : vector<8x8xf32> to vector<8x8xbf16>
    %c0_33 = arith.constant 0 : index
    %c24 = arith.constant 24 : index
    %104 = vector.load %arg18[%c0_33, %c24] : memref<8x32xbf16, #tpu.memory_space<vmem>>, vector<8x8xbf16>
    tpu.vector_store %arg18[%c0_33, %c24], %103 {strides = array<i32>} : memref<8x32xbf16, #tpu.memory_space<vmem>>, vector<8x8xbf16>,
    %c0_34 = arith.constant 0 : index
    %c0_35 = arith.constant 0 : index
    %105 = vector.load %arg18[%c0_34, %c0_35] : memref<8x32xbf16, #tpu.memory_space<vmem>>, vector<8x32xbf16>
    %cst_36 = arith.constant dense<0.000000e+00> : vector<8x32xf32>
    %106 = tpu.matmul %105, %15, %cst_36 {dimension_numbers = #tpu.dot_dimension_numbers<[1], [0], [0], [1], [0, 0, 1, 1], [], []>} : vector<8x32xbf16>, vector<32x32xbf16>, vector<8x32xf32> -> vector<8x32xf32>
    %107 = vector.broadcast %16 : vector<1x32xf32> to vector<8x32xf32>
    %108 = arith.addf %106, %107 : vector<8x32xf32>
    %109 = vector.shape_cast %108 : vector<8x32xf32> to vector<1x8x32xf32>
    %110 = arith.addf %0, %109 : vector<1x8x32xf32>
    %111 = vector.shape_cast %110 : vector<1x8x32xf32> to vector<8x32xf32>
    %112 = vector.shape_cast %1 : vector<1x8x32xf32> to vector<8x32xf32>
    %113 = arith.truncf %111 : vector<8x32xf32> to vector<8x32xbf16>
    %c0_37 = arith.constant 0 : index
    %c0_38 = arith.constant 0 : index
    %114 = vector.load %arg7[%c0_37, %c0_38] : memref<32x32xbf16, #tpu.memory_space<vmem>>, vector<32x32xbf16>
    %cst_39 = arith.constant dense<0.000000e+00> : vector<8x32xf32>
    %115 = tpu.matmul %113, %114, %cst_39 {dimension_numbers = #tpu.dot_dimension_numbers<[1], [0], [0], [1], [0, 0, 1, 1], [], []>} : vector<8x32xbf16>, vector<32x32xbf16>, vector<8x32xf32> -> vector<8x32xf32>
    %c0_40 = arith.constant 0 : index
    %c0_41 = arith.constant 0 : index
    %116 = vector.load %arg8[%c0_40, %c0_41] : memref<1x32xf32, #tpu.memory_space<vmem>>, vector<1x32xf32>
    %117 = vector.broadcast %116 : vector<1x32xf32> to vector<8x32xf32>
    %118 = arith.addf %115, %117 : vector<8x32xf32>
    %119 = vector.shape_cast %118 : vector<8x32xf32> to vector<1x8x32xf32>
    %120 = arith.truncf %112 : vector<8x32xf32> to vector<8x32xbf16>
    %c0_42 = arith.constant 0 : index
    %c0_43 = arith.constant 0 : index
    %121 = vector.load %arg9[%c0_42, %c0_43] : memref<32x64xbf16, #tpu.memory_space<vmem>>, vector<32x64xbf16>
    %cst_44 = arith.constant dense<0.000000e+00> : vector<8x64xf32>
    %122 = tpu.matmul %120, %121, %cst_44 {dimension_numbers = #tpu.dot_dimension_numbers<[1], [0], [0], [1], [0, 0, 1, 1], [], []>} : vector<8x32xbf16>, vector<32x64xbf16>, vector<8x64xf32> -> vector<8x64xf32>
    %c0_45 = arith.constant 0 : index
    %c0_46 = arith.constant 0 : index
    %123 = vector.load %arg10[%c0_45, %c0_46] : memref<1x64xf32, #tpu.memory_space<vmem>>, vector<1x64xf32>
    %124 = vector.broadcast %123 : vector<1x64xf32> to vector<8x64xf32>
    %125 = arith.addf %122, %124 : vector<8x64xf32>
    %126 = vector.extract_strided_slice %125 {offsets = [0, 0], sizes = [8, 32], strides = [1, 1]} : vector<8x64xf32> to vector<8x32xf32>
    %127 = vector.shape_cast %126 : vector<8x32xf32> to vector<1x8x32xf32>
    %128 = vector.extract_strided_slice %125 {offsets = [0, 32], sizes = [8, 32], strides = [1, 1]} : vector<8x64xf32> to vector<8x32xf32>
    %129 = vector.shape_cast %128 : vector<8x32xf32> to vector<1x8x32xf32>
    %c0_47 = arith.constant 0 : index
    %c0_48 = arith.constant 0 : index
    %130 = vector.load %arg11[%c0_47, %c0_48] : memref<32x32xbf16, #tpu.memory_space<vmem>>, vector<32x32xbf16>
    %c0_49 = arith.constant 0 : index
    %c0_50 = arith.constant 0 : index
    %131 = vector.load %arg12[%c0_49, %c0_50] : memref<1x32xf32, #tpu.memory_space<vmem>>, vector<1x32xf32>
    %132 = vector.extract_strided_slice %119 {offsets = [0, 0, 0], sizes = [1, 8, 8], strides = [1, 1, 1]} : vector<1x8x32xf32> to vector<1x8x8xf32>
    %133 = arith.truncf %132 : vector<1x8x8xf32> to vector<1x8x8xbf16>
    %134 = vector.extract_strided_slice %127 {offsets = [0, 0, 0], sizes = [1, 8, 8], strides = [1, 1, 1]} : vector<1x8x32xf32> to vector<1x8x8xf32>
    %135 = arith.truncf %134 : vector<1x8x8xf32> to vector<1x8x8xbf16>
    %136 = vector.extract_strided_slice %129 {offsets = [0, 0, 0], sizes = [1, 8, 8], strides = [1, 1, 1]} : vector<1x8x32xf32> to vector<1x8x8xf32>
    %137 = arith.truncf %136 : vector<1x8x8xf32> to vector<1x8x8xbf16>
    "tpu.trace_start"() <{level = 10 : i32, message = "bqd,bkd->bqk"}> : () -> ()
    %cst_51 = arith.constant dense<0.000000e+00> : vector<1x8x8xf32>
    %138 = tpu.matmul %133, %135, %cst_51 {dimension_numbers = #tpu.dot_dimension_numbers<[2], [2], [1], [1], [0, 0, 0, 1, 1, 1], [0], [0]>} : vector<1x8x8xbf16>, vector<1x8x8xbf16>, vector<1x8x8xf32> -> vector<1x8x8xf32>
    "tpu.trace_stop"() : () -> ()
    %cst_52 = arith.constant dense<0xFF800000> : vector<1x8xf32>
    %139 = vector.multi_reduction <maximumf>, %138, %cst_52 [2] : vector<1x8x8xf32> to vector<1x8xf32>
    %140 = vector.shape_cast %139 : vector<1x8xf32> to vector<1x8x1xf32>
    %141 = vector.broadcast %140 : vector<1x8x1xf32> to vector<1x8x8xf32>
    %142 = arith.subf %138, %141 : vector<1x8x8xf32>
    %143 = math.exp %142 : vector<1x8x8xf32>
    %cst_53 = arith.constant dense<0.000000e+00> : vector<1x8xf32>
    %144 = vector.multi_reduction <add>, %143, %cst_53 [2] : vector<1x8x8xf32> to vector<1x8xf32>
    %145 = vector.shape_cast %144 : vector<1x8xf32> to vector<1x8x1xf32>
    %146 = tpu.reciprocal %145 {approx = true} : vector<1x8x1xf32> -> vector<1x8x1xf32>
    %147 = vector.broadcast %146 : vector<1x8x1xf32> to vector<1x8x8xf32>
    %148 = arith.mulf %143, %147 : vector<1x8x8xf32>
    %149 = arith.truncf %148 : vector<1x8x8xf32> to vector<1x8x8xbf16>
    "tpu.trace_start"() <{level = 10 : i32, message = "bqk,bkd->bqd"}> : () -> ()
    %cst_54 = arith.constant dense<0.000000e+00> : vector<1x8x8xf32>
    %150 = tpu.matmul %149, %137, %cst_54 {dimension_numbers = #tpu.dot_dimension_numbers<[2], [1], [1], [2], [0, 0, 0, 1, 1, 2], [0], [0]>} : vector<1x8x8xbf16>, vector<1x8x8xbf16>, vector<1x8x8xf32> -> vector<1x8x8xf32>
    "tpu.trace_stop"() : () -> ()
    %151 = vector.shape_cast %150 : vector<1x8x8xf32> to vector<8x8xf32>
    %152 = arith.truncf %151 : vector<8x8xf32> to vector<8x8xbf16>
    %c0_55 = arith.constant 0 : index
    %c0_56 = arith.constant 0 : index
    %153 = vector.load %arg18[%c0_55, %c0_56] : memref<8x32xbf16, #tpu.memory_space<vmem>>, vector<8x8xbf16>
    tpu.vector_store %arg18[%c0_55, %c0_56], %152 {strides = array<i32>} : memref<8x32xbf16, #tpu.memory_space<vmem>>, vector<8x8xbf16>,
    %154 = vector.extract_strided_slice %119 {offsets = [0, 0, 8], sizes = [1, 8, 8], strides = [1, 1, 1]} : vector<1x8x32xf32> to vector<1x8x8xf32>
    %155 = arith.truncf %154 : vector<1x8x8xf32> to vector<1x8x8xbf16>
    %156 = vector.extract_strided_slice %127 {offsets = [0, 0, 8], sizes = [1, 8, 8], strides = [1, 1, 1]} : vector<1x8x32xf32> to vector<1x8x8xf32>
    %157 = arith.truncf %156 : vector<1x8x8xf32> to vector<1x8x8xbf16>
    %158 = vector.extract_strided_slice %129 {offsets = [0, 0, 8], sizes = [1, 8, 8], strides = [1, 1, 1]} : vector<1x8x32xf32> to vector<1x8x8xf32>
    %159 = arith.truncf %158 : vector<1x8x8xf32> to vector<1x8x8xbf16>
    "tpu.trace_start"() <{level = 10 : i32, message = "bqd,bkd->bqk"}> : () -> ()
    %cst_57 = arith.constant dense<0.000000e+00> : vector<1x8x8xf32>
    %160 = tpu.matmul %155, %157, %cst_57 {dimension_numbers = #tpu.dot_dimension_numbers<[2], [2], [1], [1], [0, 0, 0, 1, 1, 1], [0], [0]>} : vector<1x8x8xbf16>, vector<1x8x8xbf16>, vector<1x8x8xf32> -> vector<1x8x8xf32>
    "tpu.trace_stop"() : () -> ()
    %cst_58 = arith.constant dense<0xFF800000> : vector<1x8xf32>
    %161 = vector.multi_reduction <maximumf>, %160, %cst_58 [2] : vector<1x8x8xf32> to vector<1x8xf32>
    %162 = vector.shape_cast %161 : vector<1x8xf32> to vector<1x8x1xf32>
    %163 = vector.broadcast %162 : vector<1x8x1xf32> to vector<1x8x8xf32>
    %164 = arith.subf %160, %163 : vector<1x8x8xf32>
    %165 = math.exp %164 : vector<1x8x8xf32>
    %cst_59 = arith.constant dense<0.000000e+00> : vector<1x8xf32>
    %166 = vector.multi_reduction <add>, %165, %cst_59 [2] : vector<1x8x8xf32> to vector<1x8xf32>
    %167 = vector.shape_cast %166 : vector<1x8xf32> to vector<1x8x1xf32>
    %168 = tpu.reciprocal %167 {approx = true} : vector<1x8x1xf32> -> vector<1x8x1xf32>
    %169 = vector.broadcast %168 : vector<1x8x1xf32> to vector<1x8x8xf32>
    %170 = arith.mulf %165, %169 : vector<1x8x8xf32>
    %171 = arith.truncf %170 : vector<1x8x8xf32> to vector<1x8x8xbf16>
    "tpu.trace_start"() <{level = 10 : i32, message = "bqk,bkd->bqd"}> : () -> ()
    %cst_60 = arith.constant dense<0.000000e+00> : vector<1x8x8xf32>
    %172 = tpu.matmul %171, %159, %cst_60 {dimension_numbers = #tpu.dot_dimension_numbers<[2], [1], [1], [2], [0, 0, 0, 1, 1, 2], [0], [0]>} : vector<1x8x8xbf16>, vector<1x8x8xbf16>, vector<1x8x8xf32> -> vector<1x8x8xf32>
    "tpu.trace_stop"() : () -> ()
    %173 = vector.shape_cast %172 : vector<1x8x8xf32> to vector<8x8xf32>
    %174 = arith.truncf %173 : vector<8x8xf32> to vector<8x8xbf16>
    %c0_61 = arith.constant 0 : index
    %c8_62 = arith.constant 8 : index
    %175 = vector.load %arg18[%c0_61, %c8_62] : memref<8x32xbf16, #tpu.memory_space<vmem>>, vector<8x8xbf16>
    tpu.vector_store %arg18[%c0_61, %c8_62], %174 {strides = array<i32>} : memref<8x32xbf16, #tpu.memory_space<vmem>>, vector<8x8xbf16>,
    %176 = vector.extract_strided_slice %119 {offsets = [0, 0, 16], sizes = [1, 8, 8], strides = [1, 1, 1]} : vector<1x8x32xf32> to vector<1x8x8xf32>
    %177 = arith.truncf %176 : vector<1x8x8xf32> to vector<1x8x8xbf16>
    %178 = vector.extract_strided_slice %127 {offsets = [0, 0, 16], sizes = [1, 8, 8], strides = [1, 1, 1]} : vector<1x8x32xf32> to vector<1x8x8xf32>
    %179 = arith.truncf %178 : vector<1x8x8xf32> to vector<1x8x8xbf16>
    %180 = vector.extract_strided_slice %129 {offsets = [0, 0, 16], sizes = [1, 8, 8], strides = [1, 1, 1]} : vector<1x8x32xf32> to vector<1x8x8xf32>
    %181 = arith.truncf %180 : vector<1x8x8xf32> to vector<1x8x8xbf16>
    "tpu.trace_start"() <{level = 10 : i32, message = "bqd,bkd->bqk"}> : () -> ()
    %cst_63 = arith.constant dense<0.000000e+00> : vector<1x8x8xf32>
    %182 = tpu.matmul %177, %179, %cst_63 {dimension_numbers = #tpu.dot_dimension_numbers<[2], [2], [1], [1], [0, 0, 0, 1, 1, 1], [0], [0]>} : vector<1x8x8xbf16>, vector<1x8x8xbf16>, vector<1x8x8xf32> -> vector<1x8x8xf32>
    "tpu.trace_stop"() : () -> ()
    %cst_64 = arith.constant dense<0xFF800000> : vector<1x8xf32>
    %183 = vector.multi_reduction <maximumf>, %182, %cst_64 [2] : vector<1x8x8xf32> to vector<1x8xf32>
    %184 = vector.shape_cast %183 : vector<1x8xf32> to vector<1x8x1xf32>
    %185 = vector.broadcast %184 : vector<1x8x1xf32> to vector<1x8x8xf32>
    %186 = arith.subf %182, %185 : vector<1x8x8xf32>
    %187 = math.exp %186 : vector<1x8x8xf32>
    %cst_65 = arith.constant dense<0.000000e+00> : vector<1x8xf32>
    %188 = vector.multi_reduction <add>, %187, %cst_65 [2] : vector<1x8x8xf32> to vector<1x8xf32>
    %189 = vector.shape_cast %188 : vector<1x8xf32> to vector<1x8x1xf32>
    %190 = tpu.reciprocal %189 {approx = true} : vector<1x8x1xf32> -> vector<1x8x1xf32>
    %191 = vector.broadcast %190 : vector<1x8x1xf32> to vector<1x8x8xf32>
    %192 = arith.mulf %187, %191 : vector<1x8x8xf32>
    %193 = arith.truncf %192 : vector<1x8x8xf32> to vector<1x8x8xbf16>
    "tpu.trace_start"() <{level = 10 : i32, message = "bqk,bkd->bqd"}> : () -> ()
    %cst_66 = arith.constant dense<0.000000e+00> : vector<1x8x8xf32>
    %194 = tpu.matmul %193, %181, %cst_66 {dimension_numbers = #tpu.dot_dimension_numbers<[2], [1], [1], [2], [0, 0, 0, 1, 1, 2], [0], [0]>} : vector<1x8x8xbf16>, vector<1x8x8xbf16>, vector<1x8x8xf32> -> vector<1x8x8xf32>
    "tpu.trace_stop"() : () -> ()
    %195 = vector.shape_cast %194 : vector<1x8x8xf32> to vector<8x8xf32>
    %196 = arith.truncf %195 : vector<8x8xf32> to vector<8x8xbf16>
    %c0_67 = arith.constant 0 : index
    %c16_68 = arith.constant 16 : index
    %197 = vector.load %arg18[%c0_67, %c16_68] : memref<8x32xbf16, #tpu.memory_space<vmem>>, vector<8x8xbf16>
    tpu.vector_store %arg18[%c0_67, %c16_68], %196 {strides = array<i32>} : memref<8x32xbf16, #tpu.memory_space<vmem>>, vector<8x8xbf16>,
    %198 = vector.extract_strided_slice %119 {offsets = [0, 0, 24], sizes = [1, 8, 8], strides = [1, 1, 1]} : vector<1x8x32xf32> to vector<1x8x8xf32>
    %199 = arith.truncf %198 : vector<1x8x8xf32> to vector<1x8x8xbf16>
    %200 = vector.extract_strided_slice %127 {offsets = [0, 0, 24], sizes = [1, 8, 8], strides = [1, 1, 1]} : vector<1x8x32xf32> to vector<1x8x8xf32>
    %201 = arith.truncf %200 : vector<1x8x8xf32> to vector<1x8x8xbf16>
    %202 = vector.extract_strided_slice %129 {offsets = [0, 0, 24], sizes = [1, 8, 8], strides = [1, 1, 1]} : vector<1x8x32xf32> to vector<1x8x8xf32>
    %203 = arith.truncf %202 : vector<1x8x8xf32> to vector<1x8x8xbf16>
    "tpu.trace_start"() <{level = 10 : i32, message = "bqd,bkd->bqk"}> : () -> ()
    %cst_69 = arith.constant dense<0.000000e+00> : vector<1x8x8xf32>
    %204 = tpu.matmul %199, %201, %cst_69 {dimension_numbers = #tpu.dot_dimension_numbers<[2], [2], [1], [1], [0, 0, 0, 1, 1, 1], [0], [0]>} : vector<1x8x8xbf16>, vector<1x8x8xbf16>, vector<1x8x8xf32> -> vector<1x8x8xf32>
    "tpu.trace_stop"() : () -> ()
    %cst_70 = arith.constant dense<0xFF800000> : vector<1x8xf32>
    %205 = vector.multi_reduction <maximumf>, %204, %cst_70 [2] : vector<1x8x8xf32> to vector<1x8xf32>
    %206 = vector.shape_cast %205 : vector<1x8xf32> to vector<1x8x1xf32>
    %207 = vector.broadcast %206 : vector<1x8x1xf32> to vector<1x8x8xf32>
    %208 = arith.subf %204, %207 : vector<1x8x8xf32>
    %209 = math.exp %208 : vector<1x8x8xf32>
    %cst_71 = arith.constant dense<0.000000e+00> : vector<1x8xf32>
    %210 = vector.multi_reduction <add>, %209, %cst_71 [2] : vector<1x8x8xf32> to vector<1x8xf32>
    %211 = vector.shape_cast %210 : vector<1x8xf32> to vector<1x8x1xf32>
    %212 = tpu.reciprocal %211 {approx = true} : vector<1x8x1xf32> -> vector<1x8x1xf32>
    %213 = vector.broadcast %212 : vector<1x8x1xf32> to vector<1x8x8xf32>
    %214 = arith.mulf %209, %213 : vector<1x8x8xf32>
    %215 = arith.truncf %214 : vector<1x8x8xf32> to vector<1x8x8xbf16>
    "tpu.trace_start"() <{level = 10 : i32, message = "bqk,bkd->bqd"}> : () -> ()
    %cst_72 = arith.constant dense<0.000000e+00> : vector<1x8x8xf32>
    %216 = tpu.matmul %215, %203, %cst_72 {dimension_numbers = #tpu.dot_dimension_numbers<[2], [1], [1], [2], [0, 0, 0, 1, 1, 2], [0], [0]>} : vector<1x8x8xbf16>, vector<1x8x8xbf16>, vector<1x8x8xf32> -> vector<1x8x8xf32>
    "tpu.trace_stop"() : () -> ()
    %217 = vector.shape_cast %216 : vector<1x8x8xf32> to vector<8x8xf32>
    %218 = arith.truncf %217 : vector<8x8xf32> to vector<8x8xbf16>
    %c0_73 = arith.constant 0 : index
    %c24_74 = arith.constant 24 : index
    %219 = vector.load %arg18[%c0_73, %c24_74] : memref<8x32xbf16, #tpu.memory_space<vmem>>, vector<8x8xbf16>
    tpu.vector_store %arg18[%c0_73, %c24_74], %218 {strides = array<i32>} : memref<8x32xbf16, #tpu.memory_space<vmem>>, vector<8x8xbf16>,
    %c0_75 = arith.constant 0 : index
    %c0_76 = arith.constant 0 : index
    %220 = vector.load %arg18[%c0_75, %c0_76] : memref<8x32xbf16, #tpu.memory_space<vmem>>, vector<8x32xbf16>
    %cst_77 = arith.constant dense<0.000000e+00> : vector<8x32xf32>
    %221 = tpu.matmul %220, %130, %cst_77 {dimension_numbers = #tpu.dot_dimension_numbers<[1], [0], [0], [1], [0, 0, 1, 1], [], []>} : vector<8x32xbf16>, vector<32x32xbf16>, vector<8x32xf32> -> vector<8x32xf32>
    %222 = vector.broadcast %131 : vector<1x32xf32> to vector<8x32xf32>
    %223 = arith.addf %221, %222 : vector<8x32xf32>
    %224 = vector.shape_cast %223 : vector<8x32xf32> to vector<1x8x32xf32>
    %225 = arith.addf %110, %224 : vector<1x8x32xf32>
    %226 = vector.shape_cast %225 : vector<1x8x32xf32> to vector<8x32xf32>
    %227 = arith.truncf %226 : vector<8x32xf32> to vector<8x32xbf16>
    %c0_78 = arith.constant 0 : index
    %c0_79 = arith.constant 0 : index
    %228 = vector.load %arg13[%c0_78, %c0_79] : memref<32x128xbf16, #tpu.memory_space<vmem>>, vector<32x128xbf16>
    %cst_80 = arith.constant dense<0.000000e+00> : vector<8x128xf32>
    %229 = tpu.matmul %227, %228, %cst_80 {dimension_numbers = #tpu.dot_dimension_numbers<[1], [0], [0], [1], [0, 0, 1, 1], [], []>} : vector<8x32xbf16>, vector<32x128xbf16>, vector<8x128xf32> -> vector<8x128xf32>
    %c0_81 = arith.constant 0 : index
    %c0_82 = arith.constant 0 : index
    %230 = vector.load %arg14[%c0_81, %c0_82] : memref<1x128xf32, #tpu.memory_space<vmem>>, vector<1x128xf32>
    %231 = vector.broadcast %230 : vector<1x128xf32> to vector<8x128xf32>
    %232 = arith.addf %229, %231 : vector<8x128xf32>
    %233 = arith.truncf %232 : vector<8x128xf32> to vector<8x128xbf16>
    %c0_83 = arith.constant 0 : index
    %c0_84 = arith.constant 0 : index
    %234 = vector.load %arg15[%c0_83, %c0_84] : memref<128x32xbf16, #tpu.memory_space<vmem>>, vector<128x32xbf16>
    %cst_85 = arith.constant dense<0.000000e+00> : vector<8x32xf32>
    %235 = tpu.matmul %233, %234, %cst_85 {dimension_numbers = #tpu.dot_dimension_numbers<[1], [0], [0], [1], [0, 0, 1, 1], [], []>} : vector<8x128xbf16>, vector<128x32xbf16>, vector<8x32xf32> -> vector<8x32xf32>
    %c0_86 = arith.constant 0 : index
    %c0_87 = arith.constant 0 : index
    %236 = vector.load %arg16[%c0_86, %c0_87] : memref<1x32xf32, #tpu.memory_space<vmem>>, vector<1x32xf32>
    %237 = vector.broadcast %236 : vector<1x32xf32> to vector<8x32xf32>
    %238 = arith.addf %235, %237 : vector<8x32xf32>
    %239 = vector.shape_cast %238 : vector<8x32xf32> to vector<1x8x32xf32>
    %240 = arith.addf %225, %239 : vector<1x8x32xf32>
    %c0_88 = arith.constant 0 : index
    %c0_89 = arith.constant 0 : index
    %c0_90 = arith.constant 0 : index
    %241 = vector.load %arg17[%c0_88, %c0_89, %c0_90] : memref<1x8x32xf32, #tpu.memory_space<vmem>>, vector<1x8x32xf32>
    tpu.vector_store %arg17[%c0_88, %c0_89, %c0_90], %240 {strides = array<i32>} : memref<1x8x32xf32, #tpu.memory_space<vmem>>, vector<1x8x32xf32>,
    return
  }
  func.func @transform_0(%arg0: i32) -> (i32, i32, i32) {
    %c0_i32 = arith.constant 0 : i32
    %c0_i32_0 = arith.constant 0 : i32
    %c0_i32_1 = arith.constant 0 : i32
    return %arg0, %c0_i32, %c0_i32_0 : i32, i32, i32
  }
  func.func @transform_1(%arg0: i32) -> (i32, i32, i32) {
    %c0_i32 = arith.constant 0 : i32
    %c0_i32_0 = arith.constant 0 : i32
    %c0_i32_1 = arith.constant 0 : i32
    return %arg0, %c0_i32, %c0_i32_0 : i32, i32, i32
  }
  func.func @transform_2(%arg0: i32) -> (i32, i32) {
    %c0_i32 = arith.constant 0 : i32
    %c0_i32_0 = arith.constant 0 : i32
    %c0_i32_1 = arith.constant 0 : i32
    return %c0_i32, %c0_i32_0 : i32, i32
  }
  func.func @transform_3(%arg0: i32) -> (i32, i32) {
    %c0_i32 = arith.constant 0 : i32
    %c0_i32_0 = arith.constant 0 : i32
    %c0_i32_1 = arith.constant 0 : i32
    return %c0_i32, %c0_i32_0 : i32, i32
  }
  func.func @transform_4(%arg0: i32) -> (i32, i32) {
    %c0_i32 = arith.constant 0 : i32
    %c0_i32_0 = arith.constant 0 : i32
    %c0_i32_1 = arith.constant 0 : i32
    return %c0_i32, %c0_i32_0 : i32, i32
  }
  func.func @transform_5(%arg0: i32) -> (i32, i32) {
    %c0_i32 = arith.constant 0 : i32
    %c0_i32_0 = arith.constant 0 : i32
    %c0_i32_1 = arith.constant 0 : i32
    return %c0_i32, %c0_i32_0 : i32, i32
  }
  func.func @transform_6(%arg0: i32) -> (i32, i32) {
    %c0_i32 = arith.constant 0 : i32
    %c0_i32_0 = arith.constant 0 : i32
    %c0_i32_1 = arith.constant 0 : i32
    return %c0_i32, %c0_i32_0 : i32, i32
  }
  func.func @transform_7(%arg0: i32) -> (i32, i32) {
    %c0_i32 = arith.constant 0 : i32
    %c0_i32_0 = arith.constant 0 : i32
    %c0_i32_1 = arith.constant 0 : i32
    return %c0_i32, %c0_i32_0 : i32, i32
  }
  func.func @transform_8(%arg0: i32) -> (i32, i32) {
    %c0_i32 = arith.constant 0 : i32
    %c0_i32_0 = arith.constant 0 : i32
    %c0_i32_1 = arith.constant 0 : i32
    return %c0_i32, %c0_i32_0 : i32, i32
  }
  func.func @transform_9(%arg0: i32) -> (i32, i32) {
    %c0_i32 = arith.constant 0 : i32
    %c0_i32_0 = arith.constant 0 : i32
    %c0_i32_1 = arith.constant 0 : i32
    return %c0_i32, %c0_i32_0 : i32, i32
  }
  func.func @transform_10(%arg0: i32) -> (i32, i32) {
    %c0_i32 = arith.constant 0 : i32
    %c0_i32_0 = arith.constant 0 : i32
    %c0_i32_1 = arith.constant 0 : i32
    return %c0_i32, %c0_i32_0 : i32, i32
  }
  func.func @transform_11(%arg0: i32) -> (i32, i32) {
    %c0_i32 = arith.constant 0 : i32
    %c0_i32_0 = arith.constant 0 : i32
    %c0_i32_1 = arith.constant 0 : i32
    return %c0_i32, %c0_i32_0 : i32, i32
  }
  func.func @transform_12(%arg0: i32) -> (i32, i32) {
    %c0_i32 = arith.constant 0 : i32
    %c0_i32_0 = arith.constant 0 : i32
    %c0_i32_1 = arith.constant 0 : i32
    return %c0_i32, %c0_i32_0 : i32, i32
  }
  func.func @transform_13(%arg0: i32) -> (i32, i32) {
    %c0_i32 = arith.constant 0 : i32
    %c0_i32_0 = arith.constant 0 : i32
    %c0_i32_1 = arith.constant 0 : i32
    return %c0_i32, %c0_i32_0 : i32, i32
  }
  func.func @transform_14(%arg0: i32) -> (i32, i32) {
    %c0_i32 = arith.constant 0 : i32
    %c0_i32_0 = arith.constant 0 : i32
    %c0_i32_1 = arith.constant 0 : i32
    return %c0_i32, %c0_i32_0 : i32, i32
  }
  func.func @transform_15(%arg0: i32) -> (i32, i32) {
    %c0_i32 = arith.constant 0 : i32
    %c0_i32_0 = arith.constant 0 : i32
    %c0_i32_1 = arith.constant 0 : i32
    return %c0_i32, %c0_i32_0 : i32, i32
  }
  func.func @transform_16(%arg0: i32) -> (i32, i32, i32) {
    %c0_i32 = arith.constant 0 : i32
    %c0_i32_0 = arith.constant 0 : i32
    %c0_i32_1 = arith.constant 0 : i32
    return %arg0, %c0_i32, %c0_i32_0 : i32, i32, i32
  }
}

module attributes {stable_mosaic.version = 11 : i64} {
  func.func @decoder_layer_kernel(%arg0: i32, %arg1: memref<1x8x32xf32, #tpu.memory_space<vmem>>, %arg2: memref<1x8x32xf32, #tpu.memory_space<vmem>>, %arg3: memref<32x96xbf16, #tpu.memory_space<vmem>>, %arg4: memref<1x96xf32, #tpu.memory_space<vmem>>, %arg5: memref<32x32xbf16, #tpu.memory_space<vmem>>, %arg6: memref<1x32xf32, #tpu.memory_space<vmem>>, %arg7: memref<32x32xbf16, #tpu.memory_space<vmem>>, %arg8: memref<1x32xf32, #tpu.memory_space<vmem>>, %arg9: memref<32x64xbf16, #tpu.memory_space<vmem>>, %arg10: memref<1x64xf32, #tpu.memory_space<vmem>>, %arg11: memref<32x32xbf16, #tpu.memory_space<vmem>>, %arg12: memref<1x32xf32, #tpu.memory_space<vmem>>, %arg13: memref<32x128xbf16, #tpu.memory_space<vmem>>, %arg14: memref<1x128xf32, #tpu.memory_space<vmem>>, %arg15: memref<128x32xbf16, #tpu.memory_space<vmem>>, %arg16: memref<1x32xf32, #tpu.memory_space<vmem>>, %arg17: memref<1x8x32xf32, #tpu.memory_space<vmem>>, %arg18: memref<8x32xbf16, #tpu.memory_space<vmem>>) attributes {dimension_semantics = [#tpu.dimension_semantics<parallel>], iteration_bounds = array<i64: 2>, scalar_prefetch = 0 : i64, scratch_operands = 1 : i64, tpu.core_type = #tpu.core_type<tc>, window_params = [{transform_indices = @transform_0, window_bounds = array<i64: 1, 8, 32>}, {transform_indices = @transform_1, window_bounds = array<i64: 1, 8, 32>}, {pipeline_mode = #tpu.pipeline_mode<synchronous>, transform_indices = @transform_2, window_bounds = array<i64: 32, 96>}, {pipeline_mode = #tpu.pipeline_mode<synchronous>, transform_indices = @transform_3, window_bounds = array<i64: 1, 96>}, {pipeline_mode = #tpu.pipeline_mode<synchronous>, transform_indices = @transform_4, window_bounds = array<i64: 32, 32>}, {pipeline_mode = #tpu.pipeline_mode<synchronous>, transform_indices = @transform_5, window_bounds = array<i64: 1, 32>}, {pipeline_mode = #tpu.pipeline_mode<synchronous>, transform_indices = @transform_6, window_bounds = array<i64: 32, 32>}, {pipeline_mode = #tpu.pipeline_mode<synchronous>, transform_indices = @transform_7, window_bounds = array<i64: 1, 32>}, {pipeline_mode = #tpu.pipeline_mode<synchronous>, transform_indices = @transform_8, window_bounds = array<i64: 32, 64>}, {pipeline_mode = #tpu.pipeline_mode<synchronous>, transform_indices = @transform_9, window_bounds = array<i64: 1, 64>}, {pipeline_mode = #tpu.pipeline_mode<synchronous>, transform_indices = @transform_10, window_bounds = array<i64: 32, 32>}, {pipeline_mode = #tpu.pipeline_mode<synchronous>, transform_indices = @transform_11, window_bounds = array<i64: 1, 32>}, {pipeline_mode = #tpu.pipeline_mode<synchronous>, transform_indices = @transform_12, window_bounds = array<i64: 32, 128>}, {pipeline_mode = #tpu.pipeline_mode<synchronous>, transform_indices = @transform_13, window_bounds = array<i64: 1, 128>}, {pipeline_mode = #tpu.pipeline_mode<synchronous>, transform_indices = @transform_14, window_bounds = array<i64: 128, 32>}, {pipeline_mode = #tpu.pipeline_mode<synchronous>, transform_indices = @transform_15, window_bounds = array<i64: 1, 32>}, {transform_indices = @transform_16, window_bounds = array<i64: 1, 8, 32>}]} {
    %c0 = arith.constant 0 : index
    %c0_0 = arith.constant 0 : index
    %c0_1 = arith.constant 0 : index
    %0 = vector.load %arg1[%c0, %c0_0, %c0_1] : memref<1x8x32xf32, #tpu.memory_space<vmem>>, vector<1x8x32xf32>
    %c0_2 = arith.constant 0 : index
    %c0_3 = arith.constant 0 : index
    %c0_4 = arith.constant 0 : index
    %1 = vector.load %arg2[%c0_2, %c0_3, %c0_4] : memref<1x8x32xf32, #tpu.memory_space<vmem>>, vector<1x8x32xf32>
    %2 = vector.shape_cast %0 : vector<1x8x32xf32> to vector<8x32xf32>
    %3 = arith.truncf %2 : vector<8x32xf32> to vector<8x32xbf16>
    %c0_5 = arith.constant 0 : index
    %c0_6 = arith.constant 0 : index
    %4 = vector.load %arg3[%c0_5, %c0_6] : memref<32x96xbf16, #tpu.memory_space<vmem>>, vector<32x96xbf16>
    %cst = arith.constant dense<0.000000e+00> : vector<8x96xf32>
    %5 = tpu.matmul %3, %4, %cst {dimension_numbers = #tpu.dot_dimension_numbers<[1], [0], [0], [1], [0, 0, 1, 1], [], []>} : vector<8x32xbf16>, vector<32x96xbf16>, vector<8x96xf32> -> vector<8x96xf32>
    %c0_7 = arith.constant 0 : index
    %c0_8 = arith.constant 0 : index
    %6 = vector.load %arg4[%c0_7, %c0_8] : memref<1x96xf32, #tpu.memory_space<vmem>>, vector<1x96xf32>
    %7 = vector.broadcast %6 : vector<1x96xf32> to vector<8x96xf32>
    %8 = arith.addf %5, %7 : vector<8x96xf32>
    %9 = vector.extract_strided_slice %8 {offsets = [0, 0], sizes = [8, 32], strides = [1, 1]} : vector<8x96xf32> to vector<8x32xf32>
    %10 = vector.shape_cast %9 : vector<8x32xf32> to vector<1x8x32xf32>
    %11 = vector.extract_strided_slice %8 {offsets = [0, 32], sizes = [8, 32], strides = [1, 1]} : vector<8x96xf32> to vector<8x32xf32>
    %12 = vector.shape_cast %11 : vector<8x32xf32> to vector<1x8x32xf32>
    %13 = vector.extract_strided_slice %8 {offsets = [0, 64], sizes = [8, 32], strides = [1, 1]} : vector<8x96xf32> to vector<8x32xf32>
    %14 = vector.shape_cast %13 : vector<8x32xf32> to vector<1x8x32xf32>
    %c0_9 = arith.constant 0 : index
    %c0_10 = arith.constant 0 : index
    %15 = vector.load %arg5[%c0_9, %c0_10] : memref<32x32xbf16, #tpu.memory_space<vmem>>, vector<32x32xbf16>
    %c0_11 = arith.constant 0 : index
    %c0_12 = arith.constant 0 : index
    %16 = vector.load %arg6[%c0_11, %c0_12] : memref<1x32xf32, #tpu.memory_space<vmem>>, vector<1x32xf32>
    %17 = vector.extract_strided_slice %10 {offsets = [0, 0, 0], sizes = [1, 8, 8], strides = [1, 1, 1]} : vector<1x8x32xf32> to vector<1x8x8xf32>
    %18 = arith.truncf %17 : vector<1x8x8xf32> to vector<1x8x8xbf16>
    %19 = vector.extract_strided_slice %12 {offsets = [0, 0, 0], sizes = [1, 8, 8], strides = [1, 1, 1]} : vector<1x8x32xf32> to vector<1x8x8xf32>
    %20 = arith.truncf %19 : vector<1x8x8xf32> to vector<1x8x8xbf16>
    %21 = vector.extract_strided_slice %14 {offsets = [0, 0, 0], sizes = [1, 8, 8], strides = [1, 1, 1]} : vector<1x8x32xf32> to vector<1x8x8xf32>
    %22 = arith.truncf %21 : vector<1x8x8xf32> to vector<1x8x8xbf16>
    "tpu.trace_start"() <{level = 10 : i32, message = "bqd,bkd->bqk"}> : () -> ()
    %cst_13 = arith.constant dense<0.000000e+00> : vector<1x8x8xf32>
    %23 = tpu.matmul %18, %20, %cst_13 {dimension_numbers = #tpu.dot_dimension_numbers<[2], [2], [1], [1], [0, 0, 0, 1, 1, 1], [0], [0]>} : vector<1x8x8xbf16>, vector<1x8x8xbf16>, vector<1x8x8xf32> -> vector<1x8x8xf32>
    "tpu.trace_stop"() : () -> ()
    %cst_14 = arith.constant dense<0xFF800000> : vector<1x8xf32>
    %24 = vector.multi_reduction <maximumf>, %23, %cst_14 [2] : vector<1x8x8xf32> to vector<1x8xf32>
    %25 = vector.shape_cast %24 : vector<1x8xf32> to vector<1x8x1xf32>
    %26 = vector.broadcast %25 : vector<1x8x1xf32> to vector<1x8x8xf32>
    %27 = arith.subf %23, %26 : vector<1x8x8xf32>
    %28 = math.exp %27 : vector<1x8x8xf32>
    %cst_15 = arith.constant dense<0.000000e+00> : vector<1x8xf32>
    %29 = vector.multi_reduction <add>, %28, %cst_15 [2] : vector<1x8x8xf32> to vector<1x8xf32>
    %30 = vector.shape_cast %29 : vector<1x8xf32> to vector<1x8x1xf32>
    %31 = tpu.reciprocal %30 {approx = true} : vector<1x8x1xf32> -> vector<1x8x1xf32>
    %32 = vector.broadcast %31 : vector<1x8x1xf32> to vector<1x8x8xf32>
    %33 = arith.mulf %28, %32 : vector<1x8x8xf32>
    %34 = arith.truncf %33 : vector<1x8x8xf32> to vector<1x8x8xbf16>
    "tpu.trace_start"() <{level = 10 : i32, message = "bqk,bkd->bqd"}> : () -> ()
    %cst_16 = arith.constant dense<0.000000e+00> : vector<1x8x8xf32>
    %35 = tpu.matmul %34, %22, %cst_16 {dimension_numbers = #tpu.dot_dimension_numbers<[2], [1], [1], [2], [0, 0, 0, 1, 1, 2], [0], [0]>} : vector<1x8x8xbf16>, vector<1x8x8xbf16>, vector<1x8x8xf32> -> vector<1x8x8xf32>
    "tpu.trace_stop"() : () -> ()
    %36 = vector.shape_cast %35 : vector<1x8x8xf32> to vector<8x8xf32>
    %37 = arith.truncf %36 : vector<8x8xf32> to vector<8x8xbf16>
    %c0_17 = arith.constant 0 : index
    %c0_18 = arith.constant 0 : index
    %38 = vector.load %arg18[%c0_17, %c0_18] : memref<8x32xbf16, #tpu.memory_space<vmem>>, vector<8x8xbf16>
    tpu.vector_store %arg18[%c0_17, %c0_18], %37 {strides = array<i32>} : memref<8x32xbf16, #tpu.memory_space<vmem>>, vector<8x8xbf16>,
    %39 = vector.extract_strided_slice %10 {offsets = [0, 0, 8], sizes = [1, 8, 8], strides = [1, 1, 1]} : vector<1x8x32xf32> to vector<1x8x8xf32>
    %40 = arith.truncf %39 : vector<1x8x8xf32> to vector<1x8x8xbf16>
    %41 = vector.extract_strided_slice %12 {offsets = [0, 0, 8], sizes = [1, 8, 8], strides = [1, 1, 1]} : vector<1x8x32xf32> to vector<1x8x8xf32>
    %42 = arith.truncf %41 : vector<1x8x8xf32> to vector<1x8x8xbf16>
    %43 = vector.extract_strided_slice %14 {offsets = [0, 0, 8], sizes = [1, 8, 8], strides = [1, 1, 1]} : vector<1x8x32xf32> to vector<1x8x8xf32>
    %44 = arith.truncf %43 : vector<1x8x8xf32> to vector<1x8x8xbf16>
    "tpu.trace_start"() <{level = 10 : i32, message = "bqd,bkd->bqk"}> : () -> ()
    %cst_19 = arith.constant dense<0.000000e+00> : vector<1x8x8xf32>
    %45 = tpu.matmul %40, %42, %cst_19 {dimension_numbers = #tpu.dot_dimension_numbers<[2], [2], [1], [1], [0, 0, 0, 1, 1, 1], [0], [0]>} : vector<1x8x8xbf16>, vector<1x8x8xbf16>, vector<1x8x8xf32> -> vector<1x8x8xf32>
    "tpu.trace_stop"() : () -> ()
    %cst_20 = arith.constant dense<0xFF800000> : vector<1x8xf32>
    %46 = vector.multi_reduction <maximumf>, %45, %cst_20 [2] : vector<1x8x8xf32> to vector<1x8xf32>
    %47 = vector.shape_cast %46 : vector<1x8xf32> to vector<1x8x1xf32>
    %48 = vector.broadcast %47 : vector<1x8x1xf32> to vector<1x8x8xf32>
    %49 = arith.subf %45, %48 : vector<1x8x8xf32>
    %50 = math.exp %49 : vector<1x8x8xf32>
    %cst_21 = arith.constant dense<0.000000e+00> : vector<1x8xf32>
    %51 = vector.multi_reduction <add>, %50, %cst_21 [2] : vector<1x8x8xf32> to vector<1x8xf32>
    %52 = vector.shape_cast %51 : vector<1x8xf32> to vector<1x8x1xf32>
    %53 = tpu.reciprocal %52 {approx = true} : vector<1x8x1xf32> -> vector<1x8x1xf32>
    %54 = vector.broadcast %53 : vector<1x8x1xf32> to vector<1x8x8xf32>
    %55 = arith.mulf %50, %54 : vector<1x8x8xf32>
    %56 = arith.truncf %55 : vector<1x8x8xf32> to vector<1x8x8xbf16>
    "tpu.trace_start"() <{level = 10 : i32, message = "bqk,bkd->bqd"}> : () -> ()
    %cst_22 = arith.constant dense<0.000000e+00> : vector<1x8x8xf32>
    %57 = tpu.matmul %56, %44, %cst_22 {dimension_numbers = #tpu.dot_dimension_numbers<[2], [1], [1], [2], [0, 0, 0, 1, 1, 2], [0], [0]>} : vector<1x8x8xbf16>, vector<1x8x8xbf16>, vector<1x8x8xf32> -> vector<1x8x8xf32>
    "tpu.trace_stop"() : () -> ()
    %58 = vector.shape_cast %57 : vector<1x8x8xf32> to vector<8x8xf32>
    %59 = arith.truncf %58 : vector<8x8xf32> to vector<8x8xbf16>
    %c0_23 = arith.constant 0 : index
    %c8 = arith.constant 8 : index
    %60 = vector.load %arg18[%c0_23, %c8] : memref<8x32xbf16, #tpu.memory_space<vmem>>, vector<8x8xbf16>
    tpu.vector_store %arg18[%c0_23, %c8], %59 {strides = array<i32>} : memref<8x32xbf16, #tpu.memory_space<vmem>>, vector<8x8xbf16>,
    %61 = vector.extract_strided_slice %10 {offsets = [0, 0, 16], sizes = [1, 8, 8], strides = [1, 1, 1]} : vector<1x8x32xf32> to vector<1x8x8xf32>
    %62 = arith.truncf %61 : vector<1x8x8xf32> to vector<1x8x8xbf16>
    %63 = vector.extract_strided_slice %12 {offsets = [0, 0, 16], sizes = [1, 8, 8], strides = [1, 1, 1]} : vector<1x8x32xf32> to vector<1x8x8xf32>
    %64 = arith.truncf %63 : vector<1x8x8xf32> to vector<1x8x8xbf16>
    %65 = vector.extract_strided_slice %14 {offsets = [0, 0, 16], sizes = [1, 8, 8], strides = [1, 1, 1]} : vector<1x8x32xf32> to vector<1x8x8xf32>
    %66 = arith.truncf %65 : vector<1x8x8xf32> to vector<1x8x8xbf16>
    "tpu.trace_start"() <{level = 10 : i32, message = "bqd,bkd->bqk"}> : () -> ()
    %cst_24 = arith.constant dense<0.000000e+00> : vector<1x8x8xf32>
    %67 = tpu.matmul %62, %64, %cst_24 {dimension_numbers = #tpu.dot_dimension_numbers<[2], [2], [1], [1], [0, 0, 0, 1, 1, 1], [0], [0]>} : vector<1x8x8xbf16>, vector<1x8x8xbf16>, vector<1x8x8xf32> -> vector<1x8x8xf32>
    "tpu.trace_stop"() : () -> ()
    %cst_25 = arith.constant dense<0xFF800000> : vector<1x8xf32>
    %68 = vector.multi_reduction <maximumf>, %67, %cst_25 [2] : vector<1x8x8xf32> to vector<1x8xf32>
    %69 = vector.shape_cast %68 : vector<1x8xf32> to vector<1x8x1xf32>
    %70 = vector.broadcast %69 : vector<1x8x1xf32> to vector<1x8x8xf32>
    %71 = arith.subf %67, %70 : vector<1x8x8xf32>
    %72 = math.exp %71 : vector<1x8x8xf32>
    %cst_26 = arith.constant dense<0.000000e+00> : vector<1x8xf32>
    %73 = vector.multi_reduction <add>, %72, %cst_26 [2] : vector<1x8x8xf32> to vector<1x8xf32>
    %74 = vector.shape_cast %73 : vector<1x8xf32> to vector<1x8x1xf32>
    %75 = tpu.reciprocal %74 {approx = true} : vector<1x8x1xf32> -> vector<1x8x1xf32>
    %76 = vector.broadcast %75 : vector<1x8x1xf32> to vector<1x8x8xf32>
    %77 = arith.mulf %72, %76 : vector<1x8x8xf32>
    %78 = arith.truncf %77 : vector<1x8x8xf32> to vector<1x8x8xbf16>
    "tpu.trace_start"() <{level = 10 : i32, message = "bqk,bkd->bqd"}> : () -> ()
    %cst_27 = arith.constant dense<0.000000e+00> : vector<1x8x8xf32>
    %79 = tpu.matmul %78, %66, %cst_27 {dimension_numbers = #tpu.dot_dimension_numbers<[2], [1], [1], [2], [0, 0, 0, 1, 1, 2], [0], [0]>} : vector<1x8x8xbf16>, vector<1x8x8xbf16>, vector<1x8x8xf32> -> vector<1x8x8xf32>
    "tpu.trace_stop"() : () -> ()
    %80 = vector.shape_cast %79 : vector<1x8x8xf32> to vector<8x8xf32>
    %81 = arith.truncf %80 : vector<8x8xf32> to vector<8x8xbf16>
    %c0_28 = arith.constant 0 : index
    %c16 = arith.constant 16 : index
    %82 = vector.load %arg18[%c0_28, %c16] : memref<8x32xbf16, #tpu.memory_space<vmem>>, vector<8x8xbf16>
    tpu.vector_store %arg18[%c0_28, %c16], %81 {strides = array<i32>} : memref<8x32xbf16, #tpu.memory_space<vmem>>, vector<8x8xbf16>,
    %83 = vector.extract_strided_slice %10 {offsets = [0, 0, 24], sizes = [1, 8, 8], strides = [1, 1, 1]} : vector<1x8x32xf32> to vector<1x8x8xf32>
    %84 = arith.truncf %83 : vector<1x8x8xf32> to vector<1x8x8xbf16>
    %85 = vector.extract_strided_slice %12 {offsets = [0, 0, 24], sizes = [1, 8, 8], strides = [1, 1, 1]} : vector<1x8x32xf32> to vector<1x8x8xf32>
    %86 = arith.truncf %85 : vector<1x8x8xf32> to vector<1x8x8xbf16>
    %87 = vector.extract_strided_slice %14 {offsets = [0, 0, 24], sizes = [1, 8, 8], strides = [1, 1, 1]} : vector<1x8x32xf32> to vector<1x8x8xf32>
    %88 = arith.truncf %87 : vector<1x8x8xf32> to vector<1x8x8xbf16>
    "tpu.trace_start"() <{level = 10 : i32, message = "bqd,bkd->bqk"}> : () -> ()
    %cst_29 = arith.constant dense<0.000000e+00> : vector<1x8x8xf32>
    %89 = tpu.matmul %84, %86, %cst_29 {dimension_numbers = #tpu.dot_dimension_numbers<[2], [2], [1], [1], [0, 0, 0, 1, 1, 1], [0], [0]>} : vector<1x8x8xbf16>, vector<1x8x8xbf16>, vector<1x8x8xf32> -> vector<1x8x8xf32>
    "tpu.trace_stop"() : () -> ()
    %cst_30 = arith.constant dense<0xFF800000> : vector<1x8xf32>
    %90 = vector.multi_reduction <maximumf>, %89, %cst_30 [2] : vector<1x8x8xf32> to vector<1x8xf32>
    %91 = vector.shape_cast %90 : vector<1x8xf32> to vector<1x8x1xf32>
    %92 = vector.broadcast %91 : vector<1x8x1xf32> to vector<1x8x8xf32>
    %93 = arith.subf %89, %92 : vector<1x8x8xf32>
    %94 = math.exp %93 : vector<1x8x8xf32>
    %cst_31 = arith.constant dense<0.000000e+00> : vector<1x8xf32>
    %95 = vector.multi_reduction <add>, %94, %cst_31 [2] : vector<1x8x8xf32> to vector<1x8xf32>
    %96 = vector.shape_cast %95 : vector<1x8xf32> to vector<1x8x1xf32>
    %97 = tpu.reciprocal %96 {approx = true} : vector<1x8x1xf32> -> vector<1x8x1xf32>
    %98 = vector.broadcast %97 : vector<1x8x1xf32> to vector<1x8x8xf32>
    %99 = arith.mulf %94, %98 : vector<1x8x8xf32>
    %100 = arith.truncf %99 : vector<1x8x8xf32> to vector<1x8x8xbf16>
    "tpu.trace_start"() <{level = 10 : i32, message = "bqk,bkd->bqd"}> : () -> ()
    %cst_32 = arith.constant dense<0.000000e+00> : vector<1x8x8xf32>
    %101 = tpu.matmul %100, %88, %cst_32 {dimension_numbers = #tpu.dot_dimension_numbers<[2], [1], [1], [2], [0, 0, 0, 1, 1, 2], [0], [0]>} : vector<1x8x8xbf16>, vector<1x8x8xbf16>, vector<1x8x8xf32> -> vector<1x8x8xf32>
    "tpu.trace_stop"() : () -> ()
    %102 = vector.shape_cast %101 : vector<1x8x8xf32> to vector<8x8xf32>
    %103 = arith.truncf %102 : vector<8x8xf32> to vector<8x8xbf16>
    %c0_33 = arith.constant 0 : index
    %c24 = arith.constant 24 : index
    %104 = vector.load %arg18[%c0_33, %c24] : memref<8x32xbf16, #tpu.memory_space<vmem>>, vector<8x8xbf16>
    tpu.vector_store %arg18[%c0_33, %c24], %103 {strides = array<i32>} : memref<8x32xbf16, #tpu.memory_space<vmem>>, vector<8x8xbf16>,
    %c0_34 = arith.constant 0 : index
    %c0_35 = arith.constant 0 : index
    %105 = vector.load %arg18[%c0_34, %c0_35] : memref<8x32xbf16, #tpu.memory_space<vmem>>, vector<8x32xbf16>
    %cst_36 = arith.constant dense<0.000000e+00> : vector<8x32xf32>
    %106 = tpu.matmul %105, %15, %cst_36 {dimension_numbers = #tpu.dot_dimension_numbers<[1], [0], [0], [1], [0, 0, 1, 1], [], []>} : vector<8x32xbf16>, vector<32x32xbf16>, vector<8x32xf32> -> vector<8x32xf32>
    %107 = vector.broadcast %16 : vector<1x32xf32> to vector<8x32xf32>
    %108 = arith.addf %106, %107 : vector<8x32xf32>
    %109 = vector.shape_cast %108 : vector<8x32xf32> to vector<1x8x32xf32>
    %110 = arith.addf %0, %109 : vector<1x8x32xf32>
    %111 = vector.shape_cast %110 : vector<1x8x32xf32> to vector<8x32xf32>
    %112 = vector.shape_cast %1 : vector<1x8x32xf32> to vector<8x32xf32>
    %113 = arith.truncf %111 : vector<8x32xf32> to vector<8x32xbf16>
    %c0_37 = arith.constant 0 : index
    %c0_38 = arith.constant 0 : index
    %114 = vector.load %arg7[%c0_37, %c0_38] : memref<32x32xbf16, #tpu.memory_space<vmem>>, vector<32x32xbf16>
    %cst_39 = arith.constant dense<0.000000e+00> : vector<8x32xf32>
    %115 = tpu.matmul %113, %114, %cst_39 {dimension_numbers = #tpu.dot_dimension_numbers<[1], [0], [0], [1], [0, 0, 1, 1], [], []>} : vector<8x32xbf16>, vector<32x32xbf16>, vector<8x32xf32> -> vector<8x32xf32>
    %c0_40 = arith.constant 0 : index
    %c0_41 = arith.constant 0 : index
    %116 = vector.load %arg8[%c0_40, %c0_41] : memref<1x32xf32, #tpu.memory_space<vmem>>, vector<1x32xf32>
    %117 = vector.broadcast %116 : vector<1x32xf32> to vector<8x32xf32>
    %118 = arith.addf %115, %117 : vector<8x32xf32>
    %119 = vector.shape_cast %118 : vector<8x32xf32> to vector<1x8x32xf32>
    %120 = arith.truncf %112 : vector<8x32xf32> to vector<8x32xbf16>
    %c0_42 = arith.constant 0 : index
    %c0_43 = arith.constant 0 : index
    %121 = vector.load %arg9[%c0_42, %c0_43] : memref<32x64xbf16, #tpu.memory_space<vmem>>, vector<32x64xbf16>
    %cst_44 = arith.constant dense<0.000000e+00> : vector<8x64xf32>
    %122 = tpu.matmul %120, %121, %cst_44 {dimension_numbers = #tpu.dot_dimension_numbers<[1], [0], [0], [1], [0, 0, 1, 1], [], []>} : vector<8x32xbf16>, vector<32x64xbf16>, vector<8x64xf32> -> vector<8x64xf32>
    %c0_45 = arith.constant 0 : index
    %c0_46 = arith.constant 0 : index
    %123 = vector.load %arg10[%c0_45, %c0_46] : memref<1x64xf32, #tpu.memory_space<vmem>>, vector<1x64xf32>
    %124 = vector.broadcast %123 : vector<1x64xf32> to vector<8x64xf32>
    %125 = arith.addf %122, %124 : vector<8x64xf32>
    %126 = vector.extract_strided_slice %125 {offsets = [0, 0], sizes = [8, 32], strides = [1, 1]} : vector<8x64xf32> to vector<8x32xf32>
    %127 = vector.shape_cast %126 : vector<8x32xf32> to vector<1x8x32xf32>
    %128 = vector.extract_strided_slice %125 {offsets = [0, 32], sizes = [8, 32], strides = [1, 1]} : vector<8x64xf32> to vector<8x32xf32>
    %129 = vector.shape_cast %128 : vector<8x32xf32> to vector<1x8x32xf32>
    %c0_47 = arith.constant 0 : index
    %c0_48 = arith.constant 0 : index
    %130 = vector.load %arg11[%c0_47, %c0_48] : memref<32x32xbf16, #tpu.memory_space<vmem>>, vector<32x32xbf16>
    %c0_49 = arith.constant 0 : index
    %c0_50 = arith.constant 0 : index
    %131 = vector.load %arg12[%c0_49, %c0_50] : memref<1x32xf32, #tpu.memory_space<vmem>>, vector<1x32xf32>
    %132 = vector.extract_strided_slice %119 {offsets = [0, 0, 0], sizes = [1, 8, 8], strides = [1, 1, 1]} : vector<1x8x32xf32> to vector<1x8x8xf32>
    %133 = arith.truncf %132 : vector<1x8x8xf32> to vector<1x8x8xbf16>
    %134 = vector.extract_strided_slice %127 {offsets = [0, 0, 0], sizes = [1, 8, 8], strides = [1, 1, 1]} : vector<1x8x32xf32> to vector<1x8x8xf32>
    %135 = arith.truncf %134 : vector<1x8x8xf32> to vector<1x8x8xbf16>
    %136 = vector.extract_strided_slice %129 {offsets = [0, 0, 0], sizes = [1, 8, 8], strides = [1, 1, 1]} : vector<1x8x32xf32> to vector<1x8x8xf32>
    %137 = arith.truncf %136 : vector<1x8x8xf32> to vector<1x8x8xbf16>
    "tpu.trace_start"() <{level = 10 : i32, message = "bqd,bkd->bqk"}> : () -> ()
    %cst_51 = arith.constant dense<0.000000e+00> : vector<1x8x8xf32>
    %138 = tpu.matmul %133, %135, %cst_51 {dimension_numbers = #tpu.dot_dimension_numbers<[2], [2], [1], [1], [0, 0, 0, 1, 1, 1], [0], [0]>} : vector<1x8x8xbf16>, vector<1x8x8xbf16>, vector<1x8x8xf32> -> vector<1x8x8xf32>
    "tpu.trace_stop"() : () -> ()
    %cst_52 = arith.constant dense<0xFF800000> : vector<1x8xf32>
    %139 = vector.multi_reduction <maximumf>, %138, %cst_52 [2] : vector<1x8x8xf32> to vector<1x8xf32>
    %140 = vector.shape_cast %139 : vector<1x8xf32> to vector<1x8x1xf32>
    %141 = vector.broadcast %140 : vector<1x8x1xf32> to vector<1x8x8xf32>
    %142 = arith.subf %138, %141 : vector<1x8x8xf32>
    %143 = math.exp %142 : vector<1x8x8xf32>
    %cst_53 = arith.constant dense<0.000000e+00> : vector<1x8xf32>
    %144 = vector.multi_reduction <add>, %143, %cst_53 [2] : vector<1x8x8xf32> to vector<1x8xf32>
    %145 = vector.shape_cast %144 : vector<1x8xf32> to vector<1x8x1xf32>
    %146 = tpu.reciprocal %145 {approx = true} : vector<1x8x1xf32> -> vector<1x8x1xf32>
    %147 = vector.broadcast %146 : vector<1x8x1xf32> to vector<1x8x8xf32>
    %148 = arith.mulf %143, %147 : vector<1x8x8xf32>
    %149 = arith.truncf %148 : vector<1x8x8xf32> to vector<1x8x8xbf16>
    "tpu.trace_start"() <{level = 10 : i32, message = "bqk,bkd->bqd"}> : () -> ()
    %cst_54 = arith.constant dense<0.000000e+00> : vector<1x8x8xf32>
    %150 = tpu.matmul %149, %137, %cst_54 {dimension_numbers = #tpu.dot_dimension_numbers<[2], [1], [1], [2], [0, 0, 0, 1, 1, 2], [0], [0]>} : vector<1x8x8xbf16>, vector<1x8x8xbf16>, vector<1x8x8xf32> -> vector<1x8x8xf32>
    "tpu.trace_stop"() : () -> ()
    %151 = vector.shape_cast %150 : vector<1x8x8xf32> to vector<8x8xf32>
    %152 = arith.truncf %151 : vector<8x8xf32> to vector<8x8xbf16>
    %c0_55 = arith.constant 0 : index
    %c0_56 = arith.constant 0 : index
    %153 = vector.load %arg18[%c0_55, %c0_56] : memref<8x32xbf16, #tpu.memory_space<vmem>>, vector<8x8xbf16>
    tpu.vector_store %arg18[%c0_55, %c0_56], %152 {strides = array<i32>} : memref<8x32xbf16, #tpu.memory_space<vmem>>, vector<8x8xbf16>,
    %154 = vector.extract_strided_slice %119 {offsets = [0, 0, 8], sizes = [1, 8, 8], strides = [1, 1, 1]} : vector<1x8x32xf32> to vector<1x8x8xf32>
    %155 = arith.truncf %154 : vector<1x8x8xf32> to vector<1x8x8xbf16>
    %156 = vector.extract_strided_slice %127 {offsets = [0, 0, 8], sizes = [1, 8, 8], strides = [1, 1, 1]} : vector<1x8x32xf32> to vector<1x8x8xf32>
    %157 = arith.truncf %156 : vector<1x8x8xf32> to vector<1x8x8xbf16>
    %158 = vector.extract_strided_slice %129 {offsets = [0, 0, 8], sizes = [1, 8, 8], strides = [1, 1, 1]} : vector<1x8x32xf32> to vector<1x8x8xf32>
    %159 = arith.truncf %158 : vector<1x8x8xf32> to vector<1x8x8xbf16>
    "tpu.trace_start"() <{level = 10 : i32, message = "bqd,bkd->bqk"}> : () -> ()
    %cst_57 = arith.constant dense<0.000000e+00> : vector<1x8x8xf32>
    %160 = tpu.matmul %155, %157, %cst_57 {dimension_numbers = #tpu.dot_dimension_numbers<[2], [2], [1], [1], [0, 0, 0, 1, 1, 1], [0], [0]>} : vector<1x8x8xbf16>, vector<1x8x8xbf16>, vector<1x8x8xf32> -> vector<1x8x8xf32>
    "tpu.trace_stop"() : () -> ()
    %cst_58 = arith.constant dense<0xFF800000> : vector<1x8xf32>
    %161 = vector.multi_reduction <maximumf>, %160, %cst_58 [2] : vector<1x8x8xf32> to vector<1x8xf32>
    %162 = vector.shape_cast %161 : vector<1x8xf32> to vector<1x8x1xf32>
    %163 = vector.broadcast %162 : vector<1x8x1xf32> to vector<1x8x8xf32>
    %164 = arith.subf %160, %163 : vector<1x8x8xf32>
    %165 = math.exp %164 : vector<1x8x8xf32>
    %cst_59 = arith.constant dense<0.000000e+00> : vector<1x8xf32>
    %166 = vector.multi_reduction <add>, %165, %cst_59 [2] : vector<1x8x8xf32> to vector<1x8xf32>
    %167 = vector.shape_cast %166 : vector<1x8xf32> to vector<1x8x1xf32>
    %168 = tpu.reciprocal %167 {approx = true} : vector<1x8x1xf32> -> vector<1x8x1xf32>
    %169 = vector.broadcast %168 : vector<1x8x1xf32> to vector<1x8x8xf32>
    %170 = arith.mulf %165, %169 : vector<1x8x8xf32>
    %171 = arith.truncf %170 : vector<1x8x8xf32> to vector<1x8x8xbf16>
    "tpu.trace_start"() <{level = 10 : i32, message = "bqk,bkd->bqd"}> : () -> ()
    %cst_60 = arith.constant dense<0.000000e+00> : vector<1x8x8xf32>
    %172 = tpu.matmul %171, %159, %cst_60 {dimension_numbers = #tpu.dot_dimension_numbers<[2], [1], [1], [2], [0, 0, 0, 1, 1, 2], [0], [0]>} : vector<1x8x8xbf16>, vector<1x8x8xbf16>, vector<1x8x8xf32> -> vector<1x8x8xf32>
    "tpu.trace_stop"() : () -> ()
    %173 = vector.shape_cast %172 : vector<1x8x8xf32> to vector<8x8xf32>
    %174 = arith.truncf %173 : vector<8x8xf32> to vector<8x8xbf16>
    %c0_61 = arith.constant 0 : index
    %c8_62 = arith.constant 8 : index
    %175 = vector.load %arg18[%c0_61, %c8_62] : memref<8x32xbf16, #tpu.memory_space<vmem>>, vector<8x8xbf16>
    tpu.vector_store %arg18[%c0_61, %c8_62], %174 {strides = array<i32>} : memref<8x32xbf16, #tpu.memory_space<vmem>>, vector<8x8xbf16>,
    %176 = vector.extract_strided_slice %119 {offsets = [0, 0, 16], sizes = [1, 8, 8], strides = [1, 1, 1]} : vector<1x8x32xf32> to vector<1x8x8xf32>
    %177 = arith.truncf %176 : vector<1x8x8xf32> to vector<1x8x8xbf16>
    %178 = vector.extract_strided_slice %127 {offsets = [0, 0, 16], sizes = [1, 8, 8], strides = [1, 1, 1]} : vector<1x8x32xf32> to vector<1x8x8xf32>
    %179 = arith.truncf %178 : vector<1x8x8xf32> to vector<1x8x8xbf16>
    %180 = vector.extract_strided_slice %129 {offsets = [0, 0, 16], sizes = [1, 8, 8], strides = [1, 1, 1]} : vector<1x8x32xf32> to vector<1x8x8xf32>
    %181 = arith.truncf %180 : vector<1x8x8xf32> to vector<1x8x8xbf16>
    "tpu.trace_start"() <{level = 10 : i32, message = "bqd,bkd->bqk"}> : () -> ()
    %cst_63 = arith.constant dense<0.000000e+00> : vector<1x8x8xf32>
    %182 = tpu.matmul %177, %179, %cst_63 {dimension_numbers = #tpu.dot_dimension_numbers<[2], [2], [1], [1], [0, 0, 0, 1, 1, 1], [0], [0]>} : vector<1x8x8xbf16>, vector<1x8x8xbf16>, vector<1x8x8xf32> -> vector<1x8x8xf32>
    "tpu.trace_stop"() : () -> ()
    %cst_64 = arith.constant dense<0xFF800000> : vector<1x8xf32>
    %183 = vector.multi_reduction <maximumf>, %182, %cst_64 [2] : vector<1x8x8xf32> to vector<1x8xf32>
    %184 = vector.shape_cast %183 : vector<1x8xf32> to vector<1x8x1xf32>
    %185 = vector.broadcast %184 : vector<1x8x1xf32> to vector<1x8x8xf32>
    %186 = arith.subf %182, %185 : vector<1x8x8xf32>
    %187 = math.exp %186 : vector<1x8x8xf32>
    %cst_65 = arith.constant dense<0.000000e+00> : vector<1x8xf32>
    %188 = vector.multi_reduction <add>, %187, %cst_65 [2] : vector<1x8x8xf32> to vector<1x8xf32>
    %189 = vector.shape_cast %188 : vector<1x8xf32> to vector<1x8x1xf32>
    %190 = tpu.reciprocal %189 {approx = true} : vector<1x8x1xf32> -> vector<1x8x1xf32>
    %191 = vector.broadcast %190 : vector<1x8x1xf32> to vector<1x8x8xf32>
    %192 = arith.mulf %187, %191 : vector<1x8x8xf32>
    %193 = arith.truncf %192 : vector<1x8x8xf32> to vector<1x8x8xbf16>
    "tpu.trace_start"() <{level = 10 : i32, message = "bqk,bkd->bqd"}> : () -> ()
    %cst_66 = arith.constant dense<0.000000e+00> : vector<1x8x8xf32>
    %194 = tpu.matmul %193, %181, %cst_66 {dimension_numbers = #tpu.dot_dimension_numbers<[2], [1], [1], [2], [0, 0, 0, 1, 1, 2], [0], [0]>} : vector<1x8x8xbf16>, vector<1x8x8xbf16>, vector<1x8x8xf32> -> vector<1x8x8xf32>
    "tpu.trace_stop"() : () -> ()
    %195 = vector.shape_cast %194 : vector<1x8x8xf32> to vector<8x8xf32>
    %196 = arith.truncf %195 : vector<8x8xf32> to vector<8x8xbf16>
    %c0_67 = arith.constant 0 : index
    %c16_68 = arith.constant 16 : index
    %197 = vector.load %arg18[%c0_67, %c16_68] : memref<8x32xbf16, #tpu.memory_space<vmem>>, vector<8x8xbf16>
    tpu.vector_store %arg18[%c0_67, %c16_68], %196 {strides = array<i32>} : memref<8x32xbf16, #tpu.memory_space<vmem>>, vector<8x8xbf16>,
    %198 = vector.extract_strided_slice %119 {offsets = [0, 0, 24], sizes = [1, 8, 8], strides = [1, 1, 1]} : vector<1x8x32xf32> to vector<1x8x8xf32>
    %199 = arith.truncf %198 : vector<1x8x8xf32> to vector<1x8x8xbf16>
    %200 = vector.extract_strided_slice %127 {offsets = [0, 0, 24], sizes = [1, 8, 8], strides = [1, 1, 1]} : vector<1x8x32xf32> to vector<1x8x8xf32>
    %201 = arith.truncf %200 : vector<1x8x8xf32> to vector<1x8x8xbf16>
    %202 = vector.extract_strided_slice %129 {offsets = [0, 0, 24], sizes = [1, 8, 8], strides = [1, 1, 1]} : vector<1x8x32xf32> to vector<1x8x8xf32>
    %203 = arith.truncf %202 : vector<1x8x8xf32> to vector<1x8x8xbf16>
    "tpu.trace_start"() <{level = 10 : i32, message = "bqd,bkd->bqk"}> : () -> ()
    %cst_69 = arith.constant dense<0.000000e+00> : vector<1x8x8xf32>
    %204 = tpu.matmul %199, %201, %cst_69 {dimension_numbers = #tpu.dot_dimension_numbers<[2], [2], [1], [1], [0, 0, 0, 1, 1, 1], [0], [0]>} : vector<1x8x8xbf16>, vector<1x8x8xbf16>, vector<1x8x8xf32> -> vector<1x8x8xf32>
    "tpu.trace_stop"() : () -> ()
    %cst_70 = arith.constant dense<0xFF800000> : vector<1x8xf32>
    %205 = vector.multi_reduction <maximumf>, %204, %cst_70 [2] : vector<1x8x8xf32> to vector<1x8xf32>
    %206 = vector.shape_cast %205 : vector<1x8xf32> to vector<1x8x1xf32>
    %207 = vector.broadcast %206 : vector<1x8x1xf32> to vector<1x8x8xf32>
    %208 = arith.subf %204, %207 : vector<1x8x8xf32>
    %209 = math.exp %208 : vector<1x8x8xf32>
    %cst_71 = arith.constant dense<0.000000e+00> : vector<1x8xf32>
    %210 = vector.multi_reduction <add>, %209, %cst_71 [2] : vector<1x8x8xf32> to vector<1x8xf32>
    %211 = vector.shape_cast %210 : vector<1x8xf32> to vector<1x8x1xf32>
    %212 = tpu.reciprocal %211 {approx = true} : vector<1x8x1xf32> -> vector<1x8x1xf32>
    %213 = vector.broadcast %212 : vector<1x8x1xf32> to vector<1x8x8xf32>
    %214 = arith.mulf %209, %213 : vector<1x8x8xf32>
    %215 = arith.truncf %214 : vector<1x8x8xf32> to vector<1x8x8xbf16>
    "tpu.trace_start"() <{level = 10 : i32, message = "bqk,bkd->bqd"}> : () -> ()
    %cst_72 = arith.constant dense<0.000000e+00> : vector<1x8x8xf32>
    %216 = tpu.matmul %215, %203, %cst_72 {dimension_numbers = #tpu.dot_dimension_numbers<[2], [1], [1], [2], [0, 0, 0, 1, 1, 2], [0], [0]>} : vector<1x8x8xbf16>, vector<1x8x8xbf16>, vector<1x8x8xf32> -> vector<1x8x8xf32>
    "tpu.trace_stop"() : () -> ()
    %217 = vector.shape_cast %216 : vector<1x8x8xf32> to vector<8x8xf32>
    %218 = arith.truncf %217 : vector<8x8xf32> to vector<8x8xbf16>
    %c0_73 = arith.constant 0 : index
    %c24_74 = arith.constant 24 : index
    %219 = vector.load %arg18[%c0_73, %c24_74] : memref<8x32xbf16, #tpu.memory_space<vmem>>, vector<8x8xbf16>
    tpu.vector_store %arg18[%c0_73, %c24_74], %218 {strides = array<i32>} : memref<8x32xbf16, #tpu.memory_space<vmem>>, vector<8x8xbf16>,
    %c0_75 = arith.constant 0 : index
    %c0_76 = arith.constant 0 : index
    %220 = vector.load %arg18[%c0_75, %c0_76] : memref<8x32xbf16, #tpu.memory_space<vmem>>, vector<8x32xbf16>
    %cst_77 = arith.constant dense<0.000000e+00> : vector<8x32xf32>
    %221 = tpu.matmul %220, %130, %cst_77 {dimension_numbers = #tpu.dot_dimension_numbers<[1], [0], [0], [1], [0, 0, 1, 1], [], []>} : vector<8x32xbf16>, vector<32x32xbf16>, vector<8x32xf32> -> vector<8x32xf32>
    %222 = vector.broadcast %131 : vector<1x32xf32> to vector<8x32xf32>
    %223 = arith.addf %221, %222 : vector<8x32xf32>
    %224 = vector.shape_cast %223 : vector<8x32xf32> to vector<1x8x32xf32>
    %225 = arith.addf %110, %224 : vector<1x8x32xf32>
    %226 = vector.shape_cast %225 : vector<1x8x32xf32> to vector<8x32xf32>
    %227 = arith.truncf %226 : vector<8x32xf32> to vector<8x32xbf16>
    %c0_78 = arith.constant 0 : index
    %c0_79 = arith.constant 0 : index
    %228 = vector.load %arg13[%c0_78, %c0_79] : memref<32x128xbf16, #tpu.memory_space<vmem>>, vector<32x128xbf16>
    %cst_80 = arith.constant dense<0.000000e+00> : vector<8x128xf32>
    %229 = tpu.matmul %227, %228, %cst_80 {dimension_numbers = #tpu.dot_dimension_numbers<[1], [0], [0], [1], [0, 0, 1, 1], [], []>} : vector<8x32xbf16>, vector<32x128xbf16>, vector<8x128xf32> -> vector<8x128xf32>
    %c0_81 = arith.constant 0 : index
    %c0_82 = arith.constant 0 : index
    %230 = vector.load %arg14[%c0_81, %c0_82] : memref<1x128xf32, #tpu.memory_space<vmem>>, vector<1x128xf32>
    %231 = vector.broadcast %230 : vector<1x128xf32> to vector<8x128xf32>
    %232 = arith.addf %229, %231 : vector<8x128xf32>
    %233 = arith.truncf %232 : vector<8x128xf32> to vector<8x128xbf16>
    %c0_83 = arith.constant 0 : index
    %c0_84 = arith.constant 0 : index
    %234 = vector.load %arg15[%c0_83, %c0_84] : memref<128x32xbf16, #tpu.memory_space<vmem>>, vector<128x32xbf16>
    %cst_85 = arith.constant dense<0.000000e+00> : vector<8x32xf32>
    %235 = tpu.matmul %233, %234, %cst_85 {dimension_numbers = #tpu.dot_dimension_numbers<[1], [0], [0], [1], [0, 0, 1, 1], [], []>} : vector<8x128xbf16>, vector<128x32xbf16>, vector<8x32xf32> -> vector<8x32xf32>
    %c0_86 = arith.constant 0 : index
    %c0_87 = arith.constant 0 : index
    %236 = vector.load %arg16[%c0_86, %c0_87] : memref<1x32xf32, #tpu.memory_space<vmem>>, vector<1x32xf32>
    %237 = vector.broadcast %236 : vector<1x32xf32> to vector<8x32xf32>
    %238 = arith.addf %235, %237 : vector<8x32xf32>
    %239 = vector.shape_cast %238 : vector<8x32xf32> to vector<1x8x32xf32>
    %240 = arith.addf %225, %239 : vector<1x8x32xf32>
    %c0_88 = arith.constant 0 : index
    %c0_89 = arith.constant 0 : index
    %c0_90 = arith.constant 0 : index
    %241 = vector.load %arg17[%c0_88, %c0_89, %c0_90] : memref<1x8x32xf32, #tpu.memory_space<vmem>>, vector<1x8x32xf32>
    tpu.vector_store %arg17[%c0_88, %c0_89, %c0_90], %240 {strides = array<i32>} : memref<1x8x32xf32, #tpu.memory_space<vmem>>, vector<1x8x32xf32>,
    return
  }
  func.func @transform_0(%arg0: i32) -> (i32, i32, i32) {
    %c0_i32 = arith.constant 0 : i32
    %c0_i32_0 = arith.constant 0 : i32
    %c0_i32_1 = arith.constant 0 : i32
    return %arg0, %c0_i32, %c0_i32_0 : i32, i32, i32
  }
  func.func @transform_1(%arg0: i32) -> (i32, i32, i32) {
    %c0_i32 = arith.constant 0 : i32
    %c0_i32_0 = arith.constant 0 : i32
    %c0_i32_1 = arith.constant 0 : i32
    return %arg0, %c0_i32, %c0_i32_0 : i32, i32, i32
  }
  func.func @transform_2(%arg0: i32) -> (i32, i32) {
    %c0_i32 = arith.constant 0 : i32
    %c0_i32_0 = arith.constant 0 : i32
    %c0_i32_1 = arith.constant 0 : i32
    return %c0_i32, %c0_i32_0 : i32, i32
  }
  func.func @transform_3(%arg0: i32) -> (i32, i32) {
    %c0_i32 = arith.constant 0 : i32
    %c0_i32_0 = arith.constant 0 : i32
    %c0_i32_1 = arith.constant 0 : i32
    return %c0_i32, %c0_i32_0 : i32, i32
  }
  func.func @transform_4(%arg0: i32) -> (i32, i32) {
    %c0_i32 = arith.constant 0 : i32
    %c0_i32_0 = arith.constant 0 : i32
    %c0_i32_1 = arith.constant 0 : i32
    return %c0_i32, %c0_i32_0 : i32, i32
  }
  func.func @transform_5(%arg0: i32) -> (i32, i32) {
    %c0_i32 = arith.constant 0 : i32
    %c0_i32_0 = arith.constant 0 : i32
    %c0_i32_1 = arith.constant 0 : i32
    return %c0_i32, %c0_i32_0 : i32, i32
  }
  func.func @transform_6(%arg0: i32) -> (i32, i32) {
    %c0_i32 = arith.constant 0 : i32
    %c0_i32_0 = arith.constant 0 : i32
    %c0_i32_1 = arith.constant 0 : i32
    return %c0_i32, %c0_i32_0 : i32, i32
  }
  func.func @transform_7(%arg0: i32) -> (i32, i32) {
    %c0_i32 = arith.constant 0 : i32
    %c0_i32_0 = arith.constant 0 : i32
    %c0_i32_1 = arith.constant 0 : i32
    return %c0_i32, %c0_i32_0 : i32, i32
  }
  func.func @transform_8(%arg0: i32) -> (i32, i32) {
    %c0_i32 = arith.constant 0 : i32
    %c0_i32_0 = arith.constant 0 : i32
    %c0_i32_1 = arith.constant 0 : i32
    return %c0_i32, %c0_i32_0 : i32, i32
  }
  func.func @transform_9(%arg0: i32) -> (i32, i32) {
    %c0_i32 = arith.constant 0 : i32
    %c0_i32_0 = arith.constant 0 : i32
    %c0_i32_1 = arith.constant 0 : i32
    return %c0_i32, %c0_i32_0 : i32, i32
  }
  func.func @transform_10(%arg0: i32) -> (i32, i32) {
    %c0_i32 = arith.constant 0 : i32
    %c0_i32_0 = arith.constant 0 : i32
    %c0_i32_1 = arith.constant 0 : i32
    return %c0_i32, %c0_i32_0 : i32, i32
  }
  func.func @transform_11(%arg0: i32) -> (i32, i32) {
    %c0_i32 = arith.constant 0 : i32
    %c0_i32_0 = arith.constant 0 : i32
    %c0_i32_1 = arith.constant 0 : i32
    return %c0_i32, %c0_i32_0 : i32, i32
  }
  func.func @transform_12(%arg0: i32) -> (i32, i32) {
    %c0_i32 = arith.constant 0 : i32
    %c0_i32_0 = arith.constant 0 : i32
    %c0_i32_1 = arith.constant 0 : i32
    return %c0_i32, %c0_i32_0 : i32, i32
  }
  func.func @transform_13(%arg0: i32) -> (i32, i32) {
    %c0_i32 = arith.constant 0 : i32
    %c0_i32_0 = arith.constant 0 : i32
    %c0_i32_1 = arith.constant 0 : i32
    return %c0_i32, %c0_i32_0 : i32, i32
  }
  func.func @transform_14(%arg0: i32) -> (i32, i32) {
    %c0_i32 = arith.constant 0 : i32
    %c0_i32_0 = arith.constant 0 : i32
    %c0_i32_1 = arith.constant 0 : i32
    return %c0_i32, %c0_i32_0 : i32, i32
  }
  func.func @transform_15(%arg0: i32) -> (i32, i32) {
    %c0_i32 = arith.constant 0 : i32
    %c0_i32_0 = arith.constant 0 : i32
    %c0_i32_1 = arith.constant 0 : i32
    return %c0_i32, %c0_i32_0 : i32, i32
  }
  func.func @transform_16(%arg0: i32) -> (i32, i32, i32) {
    %c0_i32 = arith.constant 0 : i32
    %c0_i32_0 = arith.constant 0 : i32
    %c0_i32_1 = arith.constant 0 : i32
    return %arg0, %c0_i32, %c0_i32_0 : i32, i32, i32
  }
}

</mosaic_0001>

<bundles_post_ra>
// kernel: tpu_custom_call.1
= control target key start
LH: loop header
LB: loop body
LE: loop exit
PB: predicated region body
PF: predicated region fallthrough
CT: control target
= control target key end

     0   :  { %s3273_s0 = inlined_call_operand.vmem [shape: f32[2,8,32], index: 0, kind: input, shape index: {}]   ;;  %s3274_s1 = inlined_call_operand.vmem [shape: f32[2,8,32], index: 1, kind: input, shape index: {}]   ;;  %s3275_s2 = inlined_call_operand.vmem [shape: bf16[32,96], index: 2, kind: input, shape index: {}]   ;;  %s3276_s3 = inlined_call_operand.vmem [shape: f32[1,96], index: 3, kind: input, shape index: {}]   ;;  %s3277_s4 = inlined_call_operand.vmem [shape: bf16[32,32], index: 4, kind: input, shape index: {}]   ;;  %s3278_s5 = inlined_call_operand.vmem [shape: f32[1,32], index: 5, kind: input, shape index: {}]   ;;  %s3279_s6 = inlined_call_operand.vmem [shape: bf16[32,32], index: 6, kind: input, shape index: {}]   ;;  %s3280_s7 = inlined_call_operand.vmem [shape: f32[1,32], index: 7, kind: input, shape index: {}]   ;;  %s3281_s8 = inlined_call_operand.hbm [shape: bf16[32,64], index: 8, kind: input, shape index: {}]   ;;  %s3282_s9 = inlined_call_operand.vmem [shape: f32[1,64], index: 9, kind: input, shape index: {}]   ;;  %s3283_s10 = inlined_call_operand.hbm [shape: bf16[32,32], index: 10, kind: input, shape index: {}]   ;;  %s3284_s11 = inlined_call_operand.vmem [shape: f32[1,32], index: 11, kind: input, shape index: {}]   ;;  %s3285_s12 = inlined_call_operand.hbm [shape: bf16[32,128], index: 12, kind: input, shape index: {}]   ;;  %s3286_s13 = inlined_call_operand.vmem [shape: f32[1,128], index: 13, kind: input, shape index: {}]   ;;  %s3287_s14 = inlined_call_operand.vmem [shape: bf16[128,32], index: 14, kind: input, shape index: {}]   ;;  %s3288_s15 = inlined_call_operand.vmem [shape: f32[1,32], index: 15, kind: input, shape index: {}]   ;;  %s3289_s16 = inlined_call_operand.hbm [shape: f32[2,8,32], index: 16, kind: output, shape index: {}]  }
   0x1   :  { %3302 = sst [smem:[#allocation19_spill]] %s3273_s0 }
   0x2   :  { %21 = vsyncpa [#allocation4], 0 }
   0x3   :  { %22 = vsyncpa [#allocation7], 0 }
   0x4   :  { %23 = vsyncpa [#allocation5], 0 }
   0x5   :  { %25 = vsyncpa [#allocation5 + $0x1], 0  ;;  %s2850_s21 = smov 0   ;;  %s2852_s22 = smov 0  }
   0x6   :  { %s2854_s23 = smov 0   ;;  %s2856_s24 = smov 0  }
   0x7 LB: > { %3303 = sst [smem:[#allocation13_spill]] %s2729_s21  ;;  %s2871_s25 = sadd.s32 4294967295, %s2741_s24   ;;  %s2741_s24 = sphi %s2856_s24, %s3327_s24   ;;  %s2737_s23 = sphi %s2854_s23, %s3329_s23   ;;  %s2733_s22 = sphi %s2852_s22, %s3331_s22   ;;  %s2729_s21 = sphi %s2850_s21, %s3330_s21  }
   0x8   : > { %3304 = sst [smem:[#allocation14_spill]] %s2737_s23  ;;  %s2154_s26 = sadd.s32 4294967294, %s2741_s24  }
   0x9   : > { %3305 = sst [smem:[#allocation15_spill]] %s2741_s24  ;;  %s2875_s27 = sadd.s32 1, %s2741_s24  }
   0xa   : > { %3306 = sst [smem:[#allocation16_spill]] %s2875_s27  ;;  %s384_s28 = sadd.s32 1, %s2737_s23 }
   0xb   : > { %s381_s29 = ssub.s32 %s2741_s24, %s2875_s27  ;;  %p394_p0 = scmp.ne.s32.totalorder %s2737_s23, %s2733_s22 }
   0xc   : > { %p382_p1 = scmp.eq.s32.totalorder %s381_s29, 0  ;;  %p395_p2 = scmp.eq.s32.totalorder %s2871_s25, 1 }
   0xd   : > { %p400_p3 = scmp.ne.s32.totalorder %s2733_s22, %s2729_s21  ;;  %p401_p4 = scmp.eq.s32.totalorder %s2154_s26, 1 }
   0xe   : > { %s2886_s30 = scalar_select %p382_p1, %s2737_s23, %s384_s28  }
   0xf   : > { %p2888_p5 = por %p395_p2, %p394_p0  ;;  %p2892_p6 = por %p401_p4, %p400_p3 }
  0x10   : > { %3307 = sst [smem:[#allocation17_spill]] %s2886_s30  ;;  %p2155_p7 = scmp.ge.s32.totalorder %s2741_s24, 1 }
  0x11   : > { %s3308_s0 = scalar_select %p2888_p5, 1, 0 }
  0x12   : > { %s3309_s17 = scalar_select %p2892_p6, 1, 0 }
  0x13   : > { %p408_p8 = scmp.lt.s32.totalorder %s2741_s24, 3  ;;  %p3295_p9 = scmp.eq.s32.totalorder %s2871_s25, 0 }
  0x14   : > { %3310 = sst [smem:[#allocation18_spill]] %s3309_s17  ;;  %s2743_s19 = smov [#allocation6]  }
  0x15   : > { %p2899_p10 = pnand %p2155_p7, %p408_p8  ;;  %s454_s20 = sshll.u32 %s2743_s19, 4  ;;  %s455_s20 = int_to_ptr.vmem [resolvable:$true] %s454_s20 }
  0x16   : > { %s2744_s28 = smov [#allocation3]   ;;  %s2745_s30 = smov [#allocation8]  }
  0x17   : > { %p2469_p11 = pneg %p2899_p10  ;;  %s438_s29 = sshll.u32 %s2744_s28, 4  ;;  %s439_s29 = int_to_ptr.vmem [resolvable:$true] %s438_s29 }
  0x18   : > { %s470_s23 = sshll.u32 %s2745_s30, 4  ;;  %s2606_s27 = scalar_lea.vmem %s455_s20, 256  ;;  %s471_s23 = int_to_ptr.vmem [resolvable:$true] %s470_s23 }
  0x19   : > { %p2907_p12 = pnand %p3295_p9, %p2469_p11  ;;  %p2607_p0 = scmp.ne.s32.totalorder %s455_s20, %s2606_s27 }
  0x1a   : > { %p2614_p3 = scmp.lt.s32.totalorder %s455_s20, %s455_s20  ;;  %p2615_p4 = scmp.lt.s32.totalorder %s2606_s27, %s2606_s27 }
  0x1b   : > { %p2597_p13 = pneg %p2907_p12 }
  0x1c   : > { %p2616_p7 = por %p2615_p4, %p2614_p3 }
  0x1d   : > { %p2609_p1 = pnand %p2607_p0, %p2597_p13 }
  0x1f   : > { %p2610_p2 = pneg %p2609_p1 }
  0x21   : > { %p2617_p8 = pnand %p2616_p7, %p2610_p2 }
  0x23   : > { %2620 = shalt.err (!%p2617_p8)
}
  0x24   : > { %s2746_s19 = smov 64   ;;  %s2747_s28 = smov 4  }
  0x25   : > { %2475 = dma.hbm_to_vmem [thread:$0]  (!%p2907_p12), %s3283_s10, 256, %s455_s20, [#allocation7], %s2746_s19, %s2746_s19, %s2747_s28  }
  0x26   : > { %s2632_s21 = scalar_lea.vmem %s439_s29, 256  ;;  %p2640_p9 = scmp.lt.s32.totalorder %s439_s29, %s439_s29 }
  0x27   : > { %p2633_p11 = scmp.ne.s32.totalorder %s439_s29, %s2632_s21  ;;  %p2641_p6 = scmp.lt.s32.totalorder %s2632_s21, %s2632_s21 }
  0x29   : > { %p2635_p0 = pnand %p2633_p11, %p2597_p13  ;;  %p2642_p3 = por %p2641_p6, %p2640_p9 }
  0x2b   : > { %p2636_p1 = pneg %p2635_p0 }
  0x2d   : > { %p2643_p2 = pnand %p2642_p3, %p2636_p1 }
  0x2f   : > { %2646 = shalt.err (!%p2643_p2)
}
  0x30   : > { %2472 = dma.hbm_to_vmem [thread:$0]  (!%p2907_p12), %s3281_s8, 256, %s439_s29, [#allocation4], %s2746_s19, %s2746_s19, %s2747_s28  }
  0x31   : > { %s2658_s17 = scalar_lea.vmem %s471_s23, 256  ;;  %p2666_p11 = scmp.lt.s32.totalorder %s471_s23, %s471_s23 }
  0x32   : > { %p2659_p4 = scmp.ne.s32.totalorder %s471_s23, %s2658_s17  ;;  %p2667_p0 = scmp.lt.s32.totalorder %s2658_s17, %s2658_s17 }
  0x34   : > { %p2661_p7 = pnand %p2659_p4, %p2597_p13  ;;  %p2668_p5 = por %p2667_p0, %p2666_p11 }
  0x36   : > { %p2662_p8 = pneg %p2661_p7 }
  0x38   : > { %p2669_p6 = pnand %p2668_p5, %p2662_p8 }
  0x3a   : > { %2672 = shalt.err (!%p2669_p6)
}
  0x3b   : > { %2478 = dma.hbm_to_vmem [thread:$0]  (!%p2907_p12), %s3285_s12, 256, %s471_s23, [#allocation7], %s2746_s19, %s2746_s19, %s2747_s28  }
  0x3c   : > { %509 = sbr.rel (%p2899_p10) target bundleno = 3765 (0xeb5), region = 84  ;;  %p3313_p9 = scmp.eq.s32.totalorder (!%p2899_p10), %s2871_s25, 0 }
  0x41   : > { %2716 = dma.done.wait (%p3313_p9), [#allocation4], 256   ;;  %p3314_p13 = pmov %p3313_p9 }
  0x42   : > { %p3315_p1 = pmov %p3313_p9 }
  0x43   : > { %2718 = vsyncadd (%p3314_p13), [#allocation4], 4294967040 }
  0x44   : > { %2720 = dma.done.wait (%p3315_p1), [#allocation7], 512   ;;  %p3316_p5 = pmov %p3315_p1 }
  0x45   : > { %p570_p3 = scmp.lt.s32.totalorder %s2871_s25, 1  ;;  %v2748_v0 = vmov 0.0   ;;  %vm2749_vm0 = vmmov 0   ;;  %s3317_s29 = sld [smem:[#allocation19_spill]]  ;;  %v2543_v1 = vld [vmem:[%s3275_s2 + $0x8] sm:$0xff]   ;;  %v2544_v2 = vld [vmem:[%s3275_s2] sm:$0xff]  }
  0x46   : > { %2722 = vsyncadd (%p3316_p5), [#allocation7], 4294966784  ;;  %2291 = vmatprep.subr.bf16.mxu1 %v2748_v0  ;;  %2295 = vmatprep.mubr.msk.bf16.mxu1 %vm2749_vm0, %v2748_v0  ;;  %vm605_vm1 = vcmask 261120   ;;  %v2167_v5 = vld [vmem:[%s3276_s3] ss:$0 sm:$0xff]  ;;  %s2750_s18 = smov 64  }
  0x47   : > { %s2952_s23 = scalar_select %p570_p3, %s2871_s25, 1  ;;  %2317 = vmatprep.subr.bf16.mxu0 %v2748_v0  ;;  %2319 = vmatprep.mubr.msk.bf16.mxu0 %vm2749_vm0, %v2748_v0  ;;  %vm658_vm2 = vcmask 64512   ;;  %vm722_vm3 = vcmask 1043456   ;;  %vm767_vm4 = vcmask 60416   ;;  %vm886_vm5 = vcmask 126016  }
  0x48   : > { %2292 = vmatpush3.bf16.msra.mxu1 %v2543_v1  ;;  %s2751_s26 = smov 96   ;;  %s2754_s28 = smov 120   ;;  %vm1005_vm6 = vcmask 191616   ;;  %vm1124_vm7 = vcmask 257216  }
  0x49   : > { %s2165_s24 = sshll.u32 %s2952_s23, 3  ;;  %2293 = vmatprep.subr.bf16.mxu1 %v2748_v0  ;;  %s3300_s30 = smov 80  }
  0x4a   : > { %s2756_s27 = smov 112   ;;  %s2757_s17 = smov 104  }
  0x4b   : > { %s573_s19 = scalar_lea.vmem %s3317_s29, %s2165_s24  ;;  %s3298_s29 = smov 88  }
  0x4c   : > { %v2969_v3 = vld [vmem:[%s573_s19] sm:$0xff]  ;;  %2294 = vmatpush3.bf16.msra.mxu1 %v2544_v2  ;;  %s3299_s19 = smov 72   ;;  %s2758_s21 = smov 56  }
  0x4d   : > { %v581_v4 = vpack.c.bf16 %v2969_v3, %v2969_v3  ;;  %2299 = vmatprep.subr.bf16.mxu1 %v2748_v0  ;;  %s2759_s20 = smov 48   ;;  %p3322_p12 = scmp.ne.s32.totalorder %s3308_s0, 0 }
  0x4f   : > { %2296 = vmatmul.mubr.msk.bf16.vlgmr.msra.gmra.mxu1 %vm605_vm1, %v581_v4 }
  0x50   : > { %2301 = vmatprep.mubr.msk.bf16.mxu1 %vm2749_vm0, %v2748_v0 }
 0x10f   : > { %v643_v6 = vpop.f32.mrf.mxu1 }
 0x110   : > { %v644_v7 = vadd.f32 %v2167_v5, %v643_v6 }
 0x111   : > { %v2297_v8 = vpop.f32.mrf.mxu1 }
 0x112   : > { %v2981_v9 = vpack.c.bf16 %v644_v7, %v644_v7 }
 0x113   : > { %v646_v10 = vpop.f32.mrf.mxu1 }
 0x114   : > { %717 = vrot.lane.b32.xlu1 %v2981_v9, %s2750_s18  ;;  %656 = vrot.lane.b32.xlu0 %v2981_v9, %s2751_s26  ;;  %s2760_s18 = smov 40  }
 0x115   : > { %v2298_v11 = vpop.f32.mrf.mxu1 }
 0x118   : > { %771 = vrot.lane.b32.xlu1 %v2981_v9, %s3298_s29  ;;  %s2764_s29 = smov [#allocation9]  }
 0x186   : > { %v657_v12 = vpop.permute.xlu0 %656  ;;  %v718_v14 = vpop.permute.xlu1 %717 }
 0x187   : > { %v663_v13 = vsel %vm658_vm2, %v657_v12, 0  ;;  %v724_v15 = vsel %vm722_vm3, %v718_v14, 0 }
 0x188   : > { %2300 = vmatpush3.bf16.xpose.msra.mxu1 %v663_v13 }
 0x189   : > { %2305 = vmatprep.subr.bf16.mxu1 %v2748_v0 }
 0x18a   : > { %v772_v26 = vpop.permute.xlu1 %771 }
 0x18b   : > { %v777_v32 = vsel %vm658_vm2, %v772_v26, 0 }
 0x18f   : > { %2302 = vmatmul.mubr.msk.bf16.vlgmr.msra.gmra.mxu1 %vm658_vm2, %v2981_v9 }
 0x190   : > { %2306 = vmatpush3.bf16.msra.mxu1 %v724_v15  ;;  %2307 = vmatprep.mubr.msk.bf16.mxu1 %vm2749_vm0, %v2748_v0 }
 0x191   : > { %2311 = vmatprep.subr.bf16.mxu1 %v2748_v0 }
 0x24f   : > { %v699_v16 = vpop.f32.mrf.mxu1 }
 0x250   : > { %v705_v17 = vsel %vm658_vm2, %v699_v16, -inf }
 0x251   : > { %706 = vmax.xlane.f32.xlu0 %v705_v17  ;;  %v2303_v18 = vpop.f32.mrf.mxu1 }
 0x253   : > { %v702_v19 = vpop.f32.mrf.mxu1 }
 0x255   : > { %v2304_v20 = vpop.f32.mrf.mxu1 }
 0x267   : > { %1009 = vrot.lane.b32.xlu0 %v2981_v9, %s3299_s19 }
 0x2da   : > { %v707_v21 = vpop.xlane.xlu0 %706 }
 0x2db   : > { %v708_v22 = vsub.f32 %v699_v16, %v707_v21 }
 0x2dd   : > { %v709_v23 = vmul.f32 1.442695, %v708_v22 }
 0x2de   : > { %v1010_v35 = vpop.permute.xlu0 %1009 }
 0x2df   : > { %2563 = vpow2.f32 %v709_v23  ;;  %v1015_v37 = vsel %vm658_vm2, %v1010_v35, 0  ;;  %v2545_v35 = vld [vmem:[%s3277_s4 + $0x8] sm:$0xff]  }
 0x2ec   : > { %v2564_v24 = vpop.eup %2563 }
 0x2ed   : > { %v711_v25 = vsel %vm658_vm2, %v2564_v24, 0.0 }
 0x2ee   : > { %712 = vadd.xlane.f32.xlu1 %v711_v25 }
 0x2ff   : > { %769 = vrot.lane.b32.xlu1 %v2981_v9, %s2754_s28 }
 0x303   : > { %890 = vrot.lane.b32.xlu1 %v2981_v9, %s3300_s30  ;;  %s2762_s30 = smov 16  }
 0x307   : > { %888 = vrot.lane.b32.xlu1 %v2981_v9, %s2756_s27 }
 0x30b   : > { %1007 = vrot.lane.b32.xlu1 %v2981_v9, %s2757_s17 }
 0x377   : > { %v713_v27 = vpop.xlane.xlu1 %712 }
 0x378   : > { %2565 = vrcp.f32 %v713_v27 }
 0x37b   : > { %v770_v31 = vpop.permute.xlu1 %769 }
 0x37f   : > { %v891_v33 = vpop.permute.xlu1 %890 }
 0x380   : > { %v896_v34 = vsel %vm658_vm2, %v891_v33, 0 }
 0x383   : > { %v889_v36 = vpop.permute.xlu1 %888 }
 0x385   : > { %v2566_v28 = vpop.eup %2565 }
 0x386   : > { %v715_v29 = vmul.f32 %v2566_v28, %v2564_v24 }
 0x387   : > { %v1008_v38 = vpop.permute.xlu1 %1007 }
 0x388   : > { %v716_v30 = vpack.c.bf16 %v715_v29, %v715_v29 }
 0x38a   : > { %2308 = vmatmul.mubr.msk.bf16.vlgmr.msra.gmra.mxu1 %vm658_vm2, %v716_v30 }
 0x38b   : > { %2312 = vmatpush3.bf16.xpose.msra.mxu1 %v777_v32  ;;  %2313 = vmatprep.mubr.msk.bf16.mxu1 %vm2749_vm0, %v2748_v0 }
 0x38c   : > { %2323 = vmatprep.subr.bf16.mxu1 %v2748_v0 }
 0x392   : > { %2314 = vmatmul.mubr.msk.bf16.vlgmr.msra.gmra.mxu1 %vm658_vm2, %v770_v31 }
 0x393   : > { %2324 = vmatpush3.bf16.xpose.msra.mxu1 %v896_v34  ;;  %2325 = vmatprep.mubr.msk.bf16.mxu1 %vm2749_vm0, %v2748_v0 }
 0x394   : > { %2335 = vmatprep.subr.bf16.mxu1 %v2748_v0 }
 0x39a   : > { %2326 = vmatmul.mubr.msk.bf16.vlgmr.msra.gmra.mxu1 %vm658_vm2, %v889_v36 }
 0x39b   : > { %2336 = vmatpush3.bf16.xpose.msra.mxu1 %v1015_v37  ;;  %2337 = vmatprep.mubr.msk.bf16.mxu1 %vm2749_vm0, %v2748_v0  ;;  %v2546_v37 = vld [vmem:[%s3277_s4] sm:$0xff]  }
 0x39c   : > { %2347 = vmatprep.subr.bf16.mxu1 %v2748_v0 }
 0x3a2   : > { %2338 = vmatmul.mubr.msk.bf16.vlgmr.msra.gmra.mxu1 %vm658_vm2, %v1008_v38 }
 0x3a3   : > { %2351 = vmatprep.mubr.msk.bf16.mxu1 %vm2749_vm0, %v2748_v0  ;;  %2348 = vmatpush3.bf16.msra.mxu1 %v2545_v35 }
 0x3a4   : > { %2349 = vmatprep.subr.bf16.mxu1 %v2748_v0 }
 0x3a7   : > { %2350 = vmatpush3.bf16.msra.mxu1 %v2546_v37 }
 0x3a8   : > { %2363 = vmatprep.subr.bf16.mxu1 %v2748_v0 }
 0x44a   : > { %v760_v39 = vpop.f32.mrf.mxu1 }
 0x44b   : > { %v766_v40 = vpack.c.bf16 %v760_v39, %v760_v39 }
 0x44c   : > { %v2309_v41 = vpop.f32.mrf.mxu1 }
 0x44d   : > { %768 = vst.msk [vmem:[#allocation2] sm:$0xf] %vm767_vm4, %v766_v40 }
 0x44e   : > { %v763_v42 = vpop.f32.mrf.mxu1 }
 0x450   : > { %v2310_v43 = vpop.f32.mrf.mxu1 }
 0x452   : > { %v813_v44 = vpop.f32.mrf.mxu1 }
 0x453   : > { %v819_v45 = vsel %vm658_vm2, %v813_v44, -inf }
 0x454   : > { %820 = vmax.xlane.f32.xlu1 %v819_v45  ;;  %v2315_v46 = vpop.f32.mrf.mxu1 }
 0x456   : > { %v816_v47 = vpop.f32.mrf.mxu1 }
 0x458   : > { %v2316_v48 = vpop.f32.mrf.mxu1 }
 0x45a   : > { %v932_v49 = vpop.f32.mrf.mxu1 }
 0x45b   : > { %v938_v50 = vsel %vm658_vm2, %v932_v49, -inf }
 0x45c   : > { %939 = vmax.xlane.f32.xlu0 %v938_v50  ;;  %v2327_v51 = vpop.f32.mrf.mxu1  ;;  %v2547_v50 = vld [vmem:[#allocation3 + $0x8] sm:$0xff]  }
 0x45e   : > { %v935_v52 = vpop.f32.mrf.mxu1 }
 0x45f   : > { %v2548_v52 = vld [vmem:[#allocation3] sm:$0xff]  }
 0x460   : > { %v2328_v53 = vpop.f32.mrf.mxu1 }
 0x462   : > { %v1051_v54 = vpop.f32.mrf.mxu1 }
 0x463   : > { %v1057_v55 = vsel %vm658_vm2, %v1051_v54, -inf }
 0x464   : > { %1058 = vmax.xlane.f32.xlu1 %v1057_v55  ;;  %v2339_v56 = vpop.f32.mrf.mxu1  ;;  %v2549_v55 = vld [vmem:[%s3279_s6 + $0x8] sm:$0xff]  }
 0x465   : > { %v2550_v56 = vld [vmem:[%s3279_s6] sm:$0xff]  }
 0x466   : > { %v1054_v57 = vpop.f32.mrf.mxu1 }
 0x467   : > { %v2182_v57 = vld [vmem:[%s3278_s5] ss:$0 sm:$0xff] }
 0x468   : > { %v2340_v58 = vpop.f32.mrf.mxu1 }
 0x4dd   : > { %v821_v59 = vpop.xlane.xlu1 %820 }
 0x4de   : > { %v822_v60 = vsub.f32 %v813_v44, %v821_v59 }
 0x4e0   : > { %v823_v61 = vmul.f32 1.442695, %v822_v60 }
 0x4e2   : > { %2567 = vpow2.f32 %v823_v61 }
 0x4e5   : > { %v940_v7 = vpop.xlane.xlu0 %939 }
 0x4e6   : > { %v941_v8 = vsub.f32 %v932_v49, %v940_v7 }
 0x4e8   : > { %v942_v10 = vmul.f32 1.442695, %v941_v8 }
 0x4ed   : > { %v1059_v62 = vpop.xlane.xlu1 %1058 }
 0x4ee   : > { %v1060_v63 = vsub.f32 %v1051_v54, %v1059_v62 }
 0x4ef   : > { %v2568_v1 = vpop.eup %2567 }
 0x4f0   : > { %v1061_v2 = vmul.f32 1.442695, %v1060_v63  ;;  %v825_v4 = vsel %vm658_vm2, %v2568_v1, 0.0 }
 0x4f1   : > { %826 = vadd.xlane.f32.xlu1 %v825_v4 }
 0x4f2   : > { %2569 = vpow2.f32 %v1061_v2  ;;  %v2190_v2 = vld [vmem:[%s3282_s9] ss:$0 sm:$0xff] }
 0x4f3   : > { %2571 = vpow2.f32 %v942_v10 }
 0x4ff   : > { %v2570_v5 = vpop.eup %2569 }
 0x500   : > { %v1063_v6 = vsel %vm658_vm2, %v2570_v5, 0.0  ;;  %v2572_v11 = vpop.eup %2571 }
 0x501   : > { %1064 = vadd.xlane.f32.xlu0 %v1063_v6  ;;  %v944_v12 = vsel %vm658_vm2, %v2572_v11, 0.0 }
 0x502   : > { %831 = vrot.lane.b32.xlu1 %v2981_v9, %s2758_s21  ;;  %s2761_s21 = smov 8  }
 0x517   : > { %950 = vrot.lane.b32.xlu0 %v2981_v9, %s2759_s20  ;;  %s3301_s20 = smov 24  }
 0x526   : > { %945 = vadd.xlane.f32.xlu1 %v944_v12 }
 0x537   : > { %1069 = vrot.lane.b32.xlu1 %v2981_v9, %s2760_s18  ;;  %s577_s18 = scalar_lea.vmem %s3274_s1, %s2165_s24 }
 0x538   : > { %v580_v53 = vld [vmem:[%s577_s18] sm:$0xff] }
 0x539   : > { %v1256_v54 = vpack.c.bf16 %v580_v53, %v580_v53 }
 0x57a   : > { %v827_v13 = vpop.xlane.xlu1 %826 }
 0x57b   : > { %2573 = vrcp.f32 %v827_v13 }
 0x57e   : > { %v832_v14 = vpop.permute.xlu1 %831 }
 0x57f   : > { %v837_v15 = vsel %vm722_vm3, %v832_v14, 0 }
 0x580   : > { %2318 = vmatpush3.bf16.msra.mxu0 %v837_v15 }
 0x581   : > { %2329 = vmatprep.subr.bf16.mxu0 %v2748_v0 }
 0x588   : > { %v2574_v16 = vpop.eup %2573 }
 0x589   : > { %v829_v17 = vmul.f32 %v2574_v16, %v2568_v1 }
 0x58a   : > { %v1065_v18 = vpop.xlane.xlu0 %1064 }
 0x58b   : > { %v830_v19 = vpack.c.bf16 %v829_v17, %v829_v17 }
 0x58d   : > { %2320 = vmatmul.mubr.msk.bf16.vlgmr.msra.gmra.mxu0 %vm658_vm2, %v830_v19 }
 0x58e   : > { %v951_v20 = vpop.permute.xlu0 %950  ;;  %2331 = vmatprep.mubr.msk.bf16.mxu0 %vm2749_vm0, %v2748_v0 }
 0x58f   : > { %v956_v9 = vsel %vm722_vm3, %v951_v20, 0 }
 0x590   : > { %2330 = vmatpush3.bf16.msra.mxu0 %v956_v9 }
 0x591   : > { %2341 = vmatprep.subr.bf16.mxu0 %v2748_v0 }
 0x5af   : > { %v946_v21 = vpop.xlane.xlu1 %945 }
 0x5b0   : > { %2575 = vrcp.f32 %v946_v21 }
 0x5b1   : > { %2577 = vrcp.f32 %v1065_v18 }
 0x5b3   : > { %v1070_v24 = vpop.permute.xlu1 %1069 }
 0x5b4   : > { %v1075_v27 = vsel %vm722_vm3, %v1070_v24, 0 }
 0x5bd   : > { %v2576_v22 = vpop.eup %2575 }
 0x5be   : > { %v948_v23 = vmul.f32 %v2576_v22, %v2572_v11  ;;  %v2578_v26 = vpop.eup %2577  ;;  %v2186_v11 = vld [vmem:[%s3280_s7] ss:$0 sm:$0xff] }
 0x5bf   : > { %v1067_v28 = vmul.f32 %v2578_v26, %v2570_v5 }
 0x5c0   : > { %v949_v25 = vpack.c.bf16 %v948_v23, %v948_v23 }
 0x5c1   : > { %v1068_v29 = vpack.c.bf16 %v1067_v28, %v1067_v28 }
 0x5c2   : > { %2332 = vmatmul.mubr.msk.bf16.vlgmr.msra.gmra.mxu0 %vm658_vm2, %v949_v25 }
 0x5c3   : > { %2342 = vmatpush3.bf16.msra.mxu0 %v1075_v27  ;;  %2343 = vmatprep.mubr.msk.bf16.mxu0 %vm2749_vm0, %v2748_v0 }
 0x5c4   : > { %2355 = vmatprep.subr.bf16.mxu0 %v2748_v0 }
 0x5ca   : > { %2344 = vmatmul.mubr.msk.bf16.vlgmr.msra.gmra.mxu0 %vm658_vm2, %v1068_v29 }
 0x5cb   : > { %2359 = vmatprep.mubr.msk.bf16.mxu0 %vm2749_vm0, %v2748_v0  ;;  %2356 = vmatpush3.bf16.msra.mxu0 %v2549_v55 }
 0x5cc   : > { %2357 = vmatprep.subr.bf16.mxu0 %v2748_v0 }
 0x5cf   : > { %2358 = vmatpush3.bf16.msra.mxu0 %v2550_v56 }
 0x5d0   : > { %2371 = vmatprep.subr.bf16.mxu0 %v2748_v0 }
 0x64d   : > { %v873_v30 = vpop.f32.mrf.mxu0 }
 0x64e   : > { %v2226_v31 = vpack.c.bf16 %v873_v30, %v873_v30 }
 0x64f   : > { %v2321_v32 = vpop.f32.mrf.mxu0 }
 0x650   : > { %883 = vrot.lane.b32.xlu1 %v2226_v31, %s2761_s21 }
 0x651   : > { %v876_v33 = vpop.f32.mrf.mxu0 }
 0x653   : > { %v2322_v34 = vpop.f32.mrf.mxu0 }
 0x682   : > { %v992_v36 = vpop.f32.mrf.mxu0 }
 0x683   : > { %v2227_v38 = vpack.c.bf16 %v992_v36, %v992_v36 }
 0x684   : > { %v2333_v39 = vpop.f32.mrf.mxu0 }
 0x685   : > { %1002 = vrot.lane.b32.xlu0 %v2227_v38, %s2762_s30 }
 0x686   : > { %v995_v40 = vpop.f32.mrf.mxu0 }
 0x688   : > { %v2334_v41 = vpop.f32.mrf.mxu0 }
 0x68a   : > { %v1111_v42 = vpop.f32.mrf.mxu0 }
 0x68b   : > { %v2228_v43 = vpack.c.bf16 %v1111_v42, %v1111_v42 }
 0x68c   : > { %v2345_v44 = vpop.f32.mrf.mxu0 }
 0x68d   : > { %1121 = vrot.lane.b32.xlu1 %v2228_v43, %s3301_s20 }
 0x68e   : > { %v1114_v45 = vpop.f32.mrf.mxu0 }
 0x690   : > { %v2346_v46 = vpop.f32.mrf.mxu0 }
 0x6c2   : > { %v884_v47 = vpop.permute.xlu1 %883 }
 0x6c3   : > { %887 = vst.msk [vmem:[#allocation2] sm:$0xf] %vm886_vm5, %v884_v47 }
 0x6f7   : > { %v1003_v48 = vpop.permute.xlu0 %1002 }
 0x6f8   : > { %1006 = vst.msk [vmem:[#allocation2] sm:$0xf] %vm1005_vm6, %v1003_v48 }
 0x6ff   : > { %v1122_v49 = vpop.permute.xlu1 %1121 }
 0x700   : > { %1125 = vst.msk [vmem:[#allocation2] sm:$0xf] %vm1124_vm7, %v1122_v49 }
 0x707   : > { %v1126_v51 = vld [vmem:[#allocation2] sm:$0xf] }
 0x708   : > { %2352 = vmatmul.mubr.msk.bf16.vlgmr.msra.gmra.mxu1 %vm605_vm1, %v1126_v51 }
 0x709   : > { %2364 = vmatpush3.bf16.msra.mxu1 %v2547_v50  ;;  %2367 = vmatprep.mubr.msk.bf16.mxu1 %vm2749_vm0, %v2748_v0 }
 0x70a   : > { %2365 = vmatprep.subr.bf16.mxu1 %v2748_v0 }
 0x70d   : > { %2366 = vmatpush3.bf16.msra.mxu1 %v2548_v52 }
 0x70e   : > { %2377 = vmatprep.subr.bf16.mxu1 %v2748_v0 }
 0x710   : > { %2368 = vmatmul.mubr.msk.bf16.vlgmr.msra.gmra.mxu1 %vm605_vm1, %v1256_v54 }
 0x711   : > { %2379 = vmatprep.mubr.msk.bf16.mxu1 %vm2749_vm0, %v2748_v0 }
 0x7c8   : > { %v1182_v58 = vpop.f32.mrf.mxu1 }
 0x7c9   : > { %v1183_v59 = vadd.f32 %v2182_v57, %v1182_v58 }
 0x7ca   : > { %v2353_v60 = vpop.f32.mrf.mxu1 }
 0x7cb   : > { %v3090_v61 = vadd.f32 %v1183_v59, %v2969_v3 }
 0x7cc   : > { %v1185_v62 = vpop.f32.mrf.mxu1 }
 0x7cd   : > { %v1189_v63 = vpack.c.bf16 %v3090_v61, %v3090_v61 }
 0x7ce   : > { %v2354_v1 = vpop.f32.mrf.mxu1 }
 0x7cf   : > { %2360 = vmatmul.mubr.msk.bf16.vlgmr.msra.gmra.mxu0 %vm605_vm1, %v1189_v63 }
 0x7d0   : > { %v1317_v4 = vpop.f32.mrf.mxu1  ;;  %2373 = vmatprep.mubr.msk.bf16.mxu0 %vm2749_vm0, %v2748_v0 }
 0x7d1   : > { %v1318_v5 = vadd.f32 %v2190_v2, %v1317_v4 }
 0x7d2   : > { %v2369_v6 = vpop.f32.mrf.mxu1 }
 0x7d3   : > { %v3100_v7 = vpack.c.bf16 %v1318_v5, %v1318_v5 }
 0x7d4   : > { %v1320_v3 = vpop.f32.mrf.mxu1 }
 0x7d5   : > { %1442 = vrot.lane.b32.xlu0 %v3100_v7, %s2754_s28  ;;  %v1334_v8 = vsel %vm658_vm2, %v3100_v7, 0 }
 0x7d6   : > { %v2370_v10 = vpop.f32.mrf.mxu1  ;;  %2372 = vmatpush3.bf16.xpose.msra.mxu0 %v1334_v8 }
 0x7d7   : > { %2383 = vmatprep.subr.bf16.mxu0 %v2748_v0 }
 0x7d9   : > { %1560 = vrot.lane.b32.xlu0 %v3100_v7, %s2756_s27 }
 0x7dd   : > { %1678 = vrot.lane.b32.xlu0 %v3100_v7, %s2757_s17 }
 0x847   : > { %v1443_v15 = vpop.permute.xlu0 %1442 }
 0x848   : > { %v1448_v17 = vsel %vm658_vm2, %v1443_v15, 0 }
 0x84b   : > { %v1561_v20 = vpop.permute.xlu0 %1560 }
 0x84c   : > { %v1566_v21 = vsel %vm658_vm2, %v1561_v20, 0 }
 0x84f   : > { %v1679_v22 = vpop.permute.xlu0 %1678 }
 0x850   : > { %v1684_v24 = vsel %vm658_vm2, %v1679_v22, 0 }
 0x88f   : > { %v1250_v12 = vpop.f32.mrf.mxu0 }
 0x890   : > { %v1251_v13 = vadd.f32 %v2186_v11, %v1250_v12 }
 0x891   : > { %v2361_v14 = vpop.f32.mrf.mxu0 }
 0x892   : > { %v1328_v16 = vpack.c.bf16 %v1251_v13, %v1251_v13 }
 0x893   : > { %v1253_v18 = vpop.f32.mrf.mxu0 }
 0x894   : > { %1440 = vrot.lane.b32.xlu1 %v1328_v16, %s2754_s28  ;;  %2374 = vmatmul.mubr.msk.bf16.vlgmr.msra.gmra.mxu0 %vm658_vm2, %v1328_v16  ;;  %s3319_s28 = smov 72  }
 0x895   : > { %v2362_v19 = vpop.f32.mrf.mxu0  ;;  %2384 = vmatpush3.bf16.xpose.msra.mxu0 %v1448_v17  ;;  %2385 = vmatprep.mubr.msk.bf16.mxu0 %vm2749_vm0, %v2748_v0 }
 0x896   : > { %2395 = vmatprep.subr.bf16.mxu0 %v2748_v0 }
 0x898   : > { %1558 = vrot.lane.b32.xlu1 %v1328_v16, %s2756_s27  ;;  %s3320_s27 = smov 88  }
 0x89c   : > { %1676 = vrot.lane.b32.xlu1 %v1328_v16, %s2757_s17  ;;  %s3321_s17 = smov 24  }
 0x906   : > { %v1441_v9 = vpop.permute.xlu1 %1440 }
 0x907   : > { %2386 = vmatmul.mubr.msk.bf16.vlgmr.msra.gmra.mxu0 %vm658_vm2, %v1441_v9 }
 0x908   : > { %2396 = vmatpush3.bf16.xpose.msra.mxu0 %v1566_v21  ;;  %2397 = vmatprep.mubr.msk.bf16.mxu0 %vm2749_vm0, %v2748_v0 }
 0x909   : > { %2407 = vmatprep.subr.bf16.mxu0 %v2748_v0 }
 0x90a   : > { %v1559_v23 = vpop.permute.xlu1 %1558 }
 0x90e   : > { %v1677_v25 = vpop.permute.xlu1 %1676 }
 0x90f   : > { %2398 = vmatmul.mubr.msk.bf16.vlgmr.msra.gmra.mxu0 %vm658_vm2, %v1559_v23 }
 0x910   : > { %2408 = vmatpush3.bf16.xpose.msra.mxu0 %v1684_v24  ;;  %2409 = vmatprep.mubr.msk.bf16.mxu0 %vm2749_vm0, %v2748_v0 }
 0x911   : > { %2419 = vmatprep.subr.bf16.mxu0 %v2748_v0 }
 0x917   : > { %2410 = vmatmul.mubr.msk.bf16.vlgmr.msra.gmra.mxu0 %vm658_vm2, %v1677_v25 }
 0x918   : > { %2423 = vmatprep.mubr.msk.bf16.mxu0 %vm2749_vm0, %v2748_v0 }
 0x954   : > { %v1370_v26 = vpop.f32.mrf.mxu0 }
 0x955   : > { %v1376_v27 = vsel %vm658_vm2, %v1370_v26, -inf }
 0x956   : > { %1377 = vmax.xlane.f32.xlu0 %v1376_v27  ;;  %v2375_v28 = vpop.f32.mrf.mxu0 }
 0x958   : > { %v1373_v29 = vpop.f32.mrf.mxu0 }
 0x95a   : > { %v2376_v30 = vpop.f32.mrf.mxu0 }
 0x9c7   : > { %v1484_v31 = vpop.f32.mrf.mxu0 }
 0x9c8   : > { %v1490_v32 = vsel %vm658_vm2, %v1484_v31, -inf }
 0x9c9   : > { %1491 = vmax.xlane.f32.xlu1 %v1490_v32  ;;  %v2387_v33 = vpop.f32.mrf.mxu0 }
 0x9cb   : > { %v1487_v34 = vpop.f32.mrf.mxu0 }
 0x9cd   : > { %v2388_v35 = vpop.f32.mrf.mxu0 }
 0x9cf   : > { %v1602_v36 = vpop.f32.mrf.mxu0 }
 0x9d0   : > { %v1608_v37 = vsel %vm658_vm2, %v1602_v36, -inf }
 0x9d1   : > { %1609 = vmax.xlane.f32.xlu0 %v1608_v37  ;;  %v2399_v38 = vpop.f32.mrf.mxu0 }
 0x9d2   : > { %v2551_v38 = vld [vmem:[#allocation6 + $0x8] sm:$0xff]  }
 0x9d3   : > { %v1605_v39 = vpop.f32.mrf.mxu0  ;;  %2420 = vmatpush3.bf16.msra.mxu0 %v2551_v38 }
 0x9d4   : > { %2421 = vmatprep.subr.bf16.mxu0 %v2748_v0 }
 0x9d5   : > { %v2400_v40 = vpop.f32.mrf.mxu0 }
 0x9d6   : > { %v2552_v40 = vld [vmem:[#allocation6] sm:$0xff]  }
 0x9d7   : > { %v1720_v41 = vpop.f32.mrf.mxu0  ;;  %2422 = vmatpush3.bf16.msra.mxu0 %v2552_v40 }
 0x9d8   : > { %v1726_v42 = vsel %vm658_vm2, %v1720_v41, -inf  ;;  %2435 = vmatprep.subr.bf16.mxu0 %v2748_v0 }
 0x9d9   : > { %1727 = vmax.xlane.f32.xlu0 %v1726_v42  ;;  %v2411_v43 = vpop.f32.mrf.mxu0 }
 0x9db   : > { %v1723_v44 = vpop.f32.mrf.mxu0 }
 0x9dd   : > { %v2412_v45 = vpop.f32.mrf.mxu0 }
 0x9df   : > { %v1378_v46 = vpop.xlane.xlu0 %1377 }
 0x9e0   : > { %v1379_v47 = vsub.f32 %v1370_v26, %v1378_v46 }
 0x9e2   : > { %v1380_v48 = vmul.f32 1.442695, %v1379_v47 }
 0x9e4   : > { %2579 = vpow2.f32 %v1380_v48 }
 0x9f1   : > { %v2580_v49 = vpop.eup %2579 }
 0x9f2   : > { %v1382_v50 = vsel %vm658_vm2, %v2580_v49, 0.0 }
 0x9f3   : > { %1383 = vadd.xlane.f32.xlu1 %v1382_v50 }
 0xa04   : > { %1389 = vrot.lane.b32.xlu1 %v3100_v7, %s2751_s26  ;;  %s3318_s26 = smov 80  }
 0xa52   : > { %v1492_v51 = vpop.xlane.xlu1 %1491 }
 0xa53   : > { %v1493_v52 = vsub.f32 %v1484_v31, %v1492_v51 }
 0xa55   : > { %v1494_v53 = vmul.f32 1.442695, %v1493_v52 }
 0xa57   : > { %2581 = vpow2.f32 %v1494_v53 }
 0xa5a   : > { %v1610_v54 = vpop.xlane.xlu0 %1609 }
 0xa5b   : > { %v1611_v55 = vsub.f32 %v1602_v36, %v1610_v54  ;;  %v2553_v54 = vld [vmem:[#allocation8 + $0x8] sm:$0xff]  }
 0xa5d   : > { %v1612_v56 = vmul.f32 1.442695, %v1611_v55  ;;  %v2554_v55 = vld [vmem:[#allocation8] sm:$0xff]  }
 0xa5f   : > { %2583 = vpow2.f32 %v1612_v56  ;;  %v2555_v56 = vld [vmem:[%s3287_s14 + $0x38] sm:$0xff]  }
 0xa62   : > { %v1728_v57 = vpop.xlane.xlu0 %1727 }
 0xa63   : > { %v1729_v58 = vsub.f32 %v1720_v41, %v1728_v57  ;;  %v2556_v57 = vld [vmem:[%s3287_s14 + $0x30] sm:$0xff]  }
 0xa64   : > { %v2582_v59 = vpop.eup %2581 }
 0xa65   : > { %v1730_v60 = vmul.f32 1.442695, %v1729_v58  ;;  %v1496_v62 = vsel %vm658_vm2, %v2582_v59, 0.0  ;;  %v2557_v58 = vld [vmem:[%s3287_s14 + $0x28] sm:$0xff]  }
 0xa66   : > { %1497 = vadd.xlane.f32.xlu0 %v1496_v62  ;;  %v2560_v62 = vld [vmem:[%s3287_s14 + $0x10] sm:$0xff]  }
 0xa67   : > { %2585 = vpow2.f32 %v1730_v60  ;;  %v2559_v60 = vld [vmem:[%s3287_s14 + $0x18] sm:$0xff]  }
 0xa6c   : > { %v2584_v63 = vpop.eup %2583 }
 0xa6d   : > { %v1614_v1 = vsel %vm658_vm2, %v2584_v63, 0.0 }
 0xa6e   : > { %1615 = vadd.xlane.f32.xlu1 %v1614_v1  ;;  %v2205_v1 = vld [vmem:[%s3284_s11] ss:$0 sm:$0xff] }
 0xa74   : > { %v2586_v2 = vpop.eup %2585 }
 0xa75   : > { %v1732_v4 = vsel %vm658_vm2, %v2586_v2, 0.0 }
 0xa76   : > { %1733 = vadd.xlane.f32.xlu0 %v1732_v4 }
 0xa7c   : > { %v1384_v5 = vpop.xlane.xlu1 %1383 }
 0xa7d   : > { %2587 = vrcp.f32 %v1384_v5 }
 0xa7f   : > { %1620 = vrot.lane.b32.xlu1 %v3100_v7, %s3318_s26  ;;  %s567_s26 = sand.u32 1, %s2733_s22  }
 0xa80   : > { %v1390_v6 = vpop.permute.xlu1 %1389 }
 0xa81   : > { %v1395_v3 = vsel %vm722_vm3, %v1390_v6, 0 }
 0xa82   : > { %2378 = vmatpush3.bf16.msra.mxu1 %v1395_v3 }
 0xa83   : > { %1738 = vrot.lane.b32.xlu1 %v3100_v7, %s3319_s28  ;;  %2389 = vmatprep.subr.bf16.mxu1 %v2748_v0  ;;  %s2164_s28 = sshll.u32 %s567_s26, 3 }
 0xa8a   : > { %v2588_v8 = vpop.eup %2587 }
 0xa8b   : > { %v1386_v10 = vmul.f32 %v2588_v8, %v2580_v49 }
 0xa8c   : > { %1502 = vrot.lane.b32.xlu0 %v3100_v7, %s3320_s27 }
 0xa8d   : > { %v1387_v11 = vpack.c.bf16 %v1386_v10, %v1386_v10 }
 0xa8f   : > { %2380 = vmatmul.mubr.msk.bf16.vlgmr.msra.gmra.mxu1 %vm658_vm2, %v1387_v11  ;;  %v2209_v11 = vld [vmem:[%s3286_s13] ss:$0 sm:$0xff] }
 0xa90   : > { %2391 = vmatprep.mubr.msk.bf16.mxu1 %vm2749_vm0, %v2748_v0 }
 0xaef   : > { %v1498_v12 = vpop.xlane.xlu0 %1497 }
 0xaf0   : > { %2589 = vrcp.f32 %v1498_v12 }
 0xaf7   : > { %v1616_v13 = vpop.xlane.xlu1 %1615 }
 0xaf8   : > { %2591 = vrcp.f32 %v1616_v13 }
 0xafb   : > { %v1621_v19 = vpop.permute.xlu1 %1620 }
 0xafc   : > { %v1626_v9 = vsel %vm722_vm3, %v1621_v19, 0 }
 0xafd   : > { %v2590_v14 = vpop.eup %2589 }
 0xafe   : > { %v1500_v16 = vmul.f32 %v2590_v14, %v2582_v59  ;;  %v2558_v59 = vld [vmem:[%s3287_s14 + $0x20] sm:$0xff]  }
 0xaff   : > { %v1734_v15 = vpop.xlane.xlu0 %1733  ;;  %v1739_v22 = vpop.permute.xlu1 %1738 }
 0xb00   : > { %2593 = vrcp.f32 %v1734_v15  ;;  %v1501_v7 = vpack.c.bf16 %v1500_v16, %v1500_v16  ;;  %v1744_v25 = vsel %vm722_vm3, %v1739_v22, 0 }
 0xb03   : > { %v1503_v17 = vpop.permute.xlu0 %1502 }
 0xb04   : > { %v1508_v18 = vsel %vm722_vm3, %v1503_v17, 0  ;;  %v2213_v17 = vld [vmem:[%s3288_s15] ss:$0 sm:$0xff] }
 0xb05   : > { %2390 = vmatpush3.bf16.msra.mxu1 %v1508_v18  ;;  %v2592_v20 = vpop.eup %2591 }
 0xb06   : > { %2401 = vmatprep.subr.bf16.mxu1 %v2748_v0  ;;  %v1618_v21 = vmul.f32 %v2592_v20, %v2584_v63  ;;  %v2561_v63 = vld [vmem:[%s3287_s14 + $0x8] sm:$0xff]  }
 0xb08   : > { %2392 = vmatmul.mubr.msk.bf16.vlgmr.msra.gmra.mxu1 %vm658_vm2, %v1501_v7  ;;  %v1619_v23 = vpack.c.bf16 %v1618_v21, %v1618_v21 }
 0xb09   : > { %2402 = vmatpush3.bf16.msra.mxu1 %v1626_v9  ;;  %2403 = vmatprep.mubr.msk.bf16.mxu1 %vm2749_vm0, %v2748_v0 }
 0xb0a   : > { %2413 = vmatprep.subr.bf16.mxu1 %v2748_v0 }
 0xb0d   : > { %v2594_v24 = vpop.eup %2593 }
 0xb0e   : > { %v1736_v26 = vmul.f32 %v2594_v24, %v2586_v2 }
 0xb10   : > { %2404 = vmatmul.mubr.msk.bf16.vlgmr.msra.gmra.mxu1 %vm658_vm2, %v1619_v23  ;;  %v1737_v27 = vpack.c.bf16 %v1736_v26, %v1736_v26 }
 0xb11   : > { %2414 = vmatpush3.bf16.msra.mxu1 %v1744_v25  ;;  %2415 = vmatprep.mubr.msk.bf16.mxu1 %vm2749_vm0, %v2748_v0 }
 0xb12   : > { %2427 = vmatprep.subr.bf16.mxu1 %v2748_v0 }
 0xb18   : > { %2416 = vmatmul.mubr.msk.bf16.vlgmr.msra.gmra.mxu1 %vm658_vm2, %v1737_v27 }
 0xb19   : > { %2431 = vmatprep.mubr.msk.bf16.mxu1 %vm2749_vm0, %v2748_v0  ;;  %2428 = vmatpush3.bf16.msra.mxu1 %v2553_v54 }
 0xb1a   : > { %2429 = vmatprep.subr.bf16.mxu1 %v2748_v0 }
 0xb1d   : > { %2430 = vmatpush3.bf16.msra.mxu1 %v2554_v55 }
 0xb4f   : > { %v1431_v28 = vpop.f32.mrf.mxu1 }
 0xb50   : > { %v1437_v29 = vpack.c.bf16 %v1431_v28, %v1431_v28 }
 0xb51   : > { %v2381_v30 = vpop.f32.mrf.mxu1 }
 0xb52   : > { %1438 = vst.msk [vmem:[#allocation2] sm:$0xf] %vm767_vm4, %v1437_v29 }
 0xb53   : > { %v1434_v31 = vpop.f32.mrf.mxu1 }
 0xb55   : > { %v2382_v32 = vpop.f32.mrf.mxu1 }
 0xbc8   : > { %v1544_v33 = vpop.f32.mrf.mxu1 }
 0xbc9   : > { %v2229_v34 = vpack.c.bf16 %v1544_v33, %v1544_v33 }
 0xbca   : > { %v2393_v35 = vpop.f32.mrf.mxu1 }
 0xbcb   : > { %1554 = vrot.lane.b32.xlu0 %v2229_v34, %s2761_s21  ;;  %s569_s21 = scalar_lea.vmem [#allocation9], %s2164_s28  ;;  %s2677_s28 = sshll.u32 %s2764_s29, 4  ;;  %s2678_s28 = int_to_ptr.vmem [resolvable:$false] %s2677_s28 }
 0xbcc   : > { %v1547_v36 = vpop.f32.mrf.mxu1  ;;  %s2052_s19 = sshll.u32 %s569_s21, 4  ;;  %s2679_s27 = scalar_lea.vmem %s2678_s28, 256  ;;  %s3233_s19 = int_to_ptr.vmem [resolvable:$true] %s2052_s19 }
 0xbcd   : > { %s2673_s20 = scalar_lea.vmem %s3233_s19, 128  ;;  %p2680_p7 = scmp.lt.s32.totalorder %s3233_s19, %s2678_s28 }
 0xbce   : > { %v2394_v37 = vpop.f32.mrf.mxu1  ;;  %p2674_p10 = scmp.ne.s32.totalorder %s3233_s19, %s2673_s20  ;;  %p2681_p8 = scmp.lt.s32.totalorder %s2679_s27, %s2673_s20 }
 0xbd0   : > { %v1662_v39 = vpop.f32.mrf.mxu1  ;;  %p2675_p2 = pnand %p2674_p10, %p3322_p12  ;;  %p2682_p11 = por %p2681_p8, %p2680_p7 }
 0xbd1   : > { %v2230_v41 = vpack.c.bf16 %v1662_v39, %v1662_v39 }
 0xbd2   : > { %v2405_v42 = vpop.f32.mrf.mxu1  ;;  %p2676_p4 = pneg %p2675_p2 }
 0xbd3   : > { %1672 = vrot.lane.b32.xlu1 %v2230_v41, %s2762_s30  ;;  %s2223_s30 = sshll.u32 %s2871_s25, 7  ;;  %s2039_s25 = scalar_lea.sflag [#allocation5], %s567_s26 }
 0xbd4   : > { %v1665_v43 = vpop.f32.mrf.mxu1  ;;  %s3231_s24 = scalar_lea.hbm %s3289_s16, %s2223_s30  ;;  %p2683_p0 = pnand %p2682_p11, %p2676_p4 }
 0xbd6   : > { %v2406_v44 = vpop.f32.mrf.mxu1 }
 0xbd8   : > { %v1780_v45 = vpop.f32.mrf.mxu1 }
 0xbd9   : > { %v2231_v46 = vpack.c.bf16 %v1780_v45, %v1780_v45 }
 0xbda   : > { %v2417_v47 = vpop.f32.mrf.mxu1 }
 0xbdb   : > { %1790 = vrot.lane.b32.xlu0 %v2231_v46, %s3321_s17 }
 0xbdc   : > { %v1783_v48 = vpop.f32.mrf.mxu1 }
 0xbde   : > { %v2418_v49 = vpop.f32.mrf.mxu1 }
 0xc3d   : > { %v1555_v50 = vpop.permute.xlu0 %1554 }
 0xc3e   : > { %1557 = vst.msk [vmem:[#allocation2] sm:$0xf] %vm886_vm5, %v1555_v50 }
 0xc45   : > { %v1673_v51 = vpop.permute.xlu1 %1672 }
 0xc46   : > { %1675 = vst.msk [vmem:[#allocation2] sm:$0xf] %vm1005_vm6, %v1673_v51 }
 0xc4d   : > { %v1791_v52 = vpop.permute.xlu0 %1790 }
 0xc4e   : > { %1793 = vst.msk [vmem:[#allocation2] sm:$0xf] %vm1124_vm7, %v1791_v52 }
 0xc55   : > { %v1794_v53 = vld [vmem:[#allocation2] sm:$0xf] }
 0xc56   : > { %2424 = vmatmul.mubr.msk.bf16.vlgmr.msra.gmra.mxu0 %vm605_vm1, %v1794_v53 }
 0xc57   : > { %2451 = vmatprep.mubr.msk.bf16.mxu0 %vm2749_vm0, %v2748_v0  ;;  %2436 = vmatpush3.bf16.msra.mxu0 %v2555_v56 }
 0xc58   : > { %2437 = vmatprep.subr.bf16.mxu0 %v2748_v0 }
 0xc5b   : > { %2438 = vmatpush3.bf16.msra.mxu0 %v2556_v57 }
 0xc5c   : > { %2439 = vmatprep.subr.bf16.mxu0 %v2748_v0 }
 0xc5f   : > { %2440 = vmatpush3.bf16.msra.mxu0 %v2557_v58 }
 0xc60   : > { %2441 = vmatprep.subr.bf16.mxu0 %v2748_v0 }
 0xc63   : > { %2442 = vmatpush3.bf16.msra.mxu0 %v2558_v59 }
 0xc64   : > { %2443 = vmatprep.subr.bf16.mxu0 %v2748_v0 }
 0xc67   : > { %2444 = vmatpush3.bf16.msra.mxu0 %v2559_v60 }
 0xc68   : > { %2445 = vmatprep.subr.bf16.mxu0 %v2748_v0 }
 0xc6b   : > { %2446 = vmatpush3.bf16.msra.mxu0 %v2560_v62 }
 0xc6c   : > { %2447 = vmatprep.subr.bf16.mxu0 %v2748_v0 }
 0xc6f   : > { %2448 = vmatpush3.bf16.msra.mxu0 %v2561_v63 }
 0xc70   : > { %2449 = vmatprep.subr.bf16.mxu0 %v2748_v0  ;;  %v2562_v0 = vld [vmem:[%s3287_s14] sm:$0xff]  }
 0xc73   : > { %2450 = vmatpush3.bf16.msra.mxu0 %v2562_v0 }
 0xd16   : > { %v1850_v2 = vpop.f32.mrf.mxu0 }
 0xd17   : > { %v1851_v4 = vadd.f32 %v2205_v1, %v1850_v2 }
 0xd18   : > { %v2425_v5 = vpop.f32.mrf.mxu0 }
 0xd19   : > { %v1856_v6 = vadd.f32 %v1851_v4, %v3090_v61 }
 0xd1a   : > { %v1853_v3 = vpop.f32.mrf.mxu0 }
 0xd1b   : > { %v1857_v8 = vpack.c.bf16 %v1856_v6, %v1856_v6 }
 0xd1c   : > { %v2426_v10 = vpop.f32.mrf.mxu0 }
 0xd1d   : > { %2432 = vmatmul.mubr.msk.bf16.vlgmr.msra.gmra.mxu1 %vm605_vm1, %v1857_v8 }
 0xddd   : > { %v1918_v12 = vpop.f32.mrf.mxu1 }
 0xdde   : > { %v1919_v13 = vadd.f32 %v2209_v11, %v1918_v12 }
 0xddf   : > { %v2433_v14 = vpop.f32.mrf.mxu1 }
 0xde0   : > { %v1924_v15 = vpack.c.bf16 %v1919_v13, %v1919_v13 }
 0xde1   : > { %v1921_v61 = vpop.f32.mrf.mxu1 }
 0xde2   : > { %2452 = vmatmul.mubr.bf16.vlgmr.msra.gmra.mxu0 %v1924_v15 }
 0xde3   : > { %v2434_v16 = vpop.f32.mrf.mxu1 }
 0xea2   : > { %v2030_v18 = vpop.f32.mrf.mxu0 }
 0xea3   : > { %v2031_v19 = vadd.f32 %v2213_v17, %v2030_v18 }
 0xea4   : > { %v2453_v7 = vpop.f32.mrf.mxu0 }
 0xea5   : > { %v2036_v20 = vadd.f32 %v2031_v19, %v1856_v6 }
 0xea6   : > { %v2033_v9 = vpop.f32.mrf.mxu0 }
 0xea7   : > { %2037 = vst.msk [vmem:[%s569_s21] sm:$0xff] %vm605_vm1, %v2036_v20 }
 0xea8   : > { %v2454_v21 = vpop.f32.mrf.mxu0 }
 0xea9   : > { %2686 = shalt.err (!%p2683_p0)
}
 0xeaa   : > { %s2687_s17 = scalar_lea.hbm %s3231_s24, 128  ;;  %s2691_s21 = scalar_lea.hbm %s3289_s16, 256 }
 0xeab   : > { %p2688_p6 = scmp.ne.s32.totalorder %s3231_s24, %s2687_s17  ;;  %p2692_p1 = scmp.lt.s32.totalorder %s3231_s24, %s3289_s16 }
 0xeac   : > { %p2693_p5 = scmp.lt.s32.totalorder %s2691_s21, %s2687_s17 }
 0xead   : > { %p2689_p9 = pnand %p2688_p6, %p3322_p12 }
 0xeae   : > { %p2694_p3 = por %p2693_p5, %p2692_p1 }
 0xeaf   : > { %p2690_p13 = pneg %p2689_p9 }
 0xeb1   : > { %p2695_p10 = pnand %p2694_p3, %p2690_p13 }
 0xeb3   : > { %2698 = shalt.err (!%p2695_p10)
}
 0xeb4   : > { %2467 = dma.vmem_to_hbm [thread:$0]  (%p3322_p12), %s3233_s19, 128, %s3231_s24, %s2039_s25  }
 0xeb5 PF: > { %s3323_s20 = sld [smem:[#allocation15_spill]] }
 0xeb6   : > { %s3324_s29 = sld [smem:[#allocation13_spill]] }
 0xeb7   : > { %s3325_s28 = sld [smem:[#allocation18_spill]] }
 0xebb   : > { %p2489_p2 = scmp.ge.s32.totalorder %s3323_s20, 2 }
 0xebc   : > { %s2064_s27 = sand.u32 1, %s3324_s29  }
 0xebd   : > { %p3326_p4 = scmp.ne.s32.totalorder %s3325_s28, 0  ;;  %s2065_s26 = scalar_lea.sflag [#allocation5], %s2064_s27 }
 0xebf   : > { %p2480_p7 = pnand %p2489_p2, %p3326_p4 }
 0xec1   : > { %p2481_p8 = pneg %p2480_p7 }
 0xec3   : > { %2724 = dma.done.wait (%p2481_p8), %s2065_s26, 128  }
 0xec4   : > { %2726 = vsyncadd (%p2481_p8), %s2065_s26, 4294967168  ;;  %s3327_s24 = sld [smem:[#allocation16_spill]]  ;;  %s3330_s21 = smov %s2733_s22 }
 0xec5   : > { %s3328_s17 = sld [smem:[#allocation14_spill]] }
 0xec6   : > { %s3329_s23 = sld [smem:[#allocation17_spill]] }
 0xeca   : > { %p28_p11 = scmp.ge.s32.totalorder %s3327_s24, 4  }
 0xecb   : > { %s3331_s22 = smov %s3328_s17 }
 0xecc   :  { %30 = sbr.rel (!%p28_p11) target bundleno = 7 (0x7), region = 135 }
 0xed1   :  { %2070 = vsyncpa [#allocation4], 1 }
 0xed2   :  { %2072 = vsyncpa [#allocation4 + $0x1], 1 }
 0xed3   :  { %2073 = vsyncpa [#allocation7], 1 }
 0xed4   :  { %2074 = vsyncpa [#allocation5], 1 }
 0xed5   :  { %2076 = vsyncpa [#allocation5 + $0x1], 1 }

// kernel: tpu_custom_call.1
= control target key start
LH: loop header
LB: loop body
LE: loop exit
PB: predicated region body
PF: predicated region fallthrough
CT: control target
= control target key end

     0   :  { %s3273_s0 = inlined_call_operand.vmem [shape: f32[2,8,32], index: 0, kind: input, shape index: {}]   ;;  %s3274_s1 = inlined_call_operand.vmem [shape: f32[2,8,32], index: 1, kind: input, shape index: {}]   ;;  %s3275_s2 = inlined_call_operand.vmem [shape: bf16[32,96], index: 2, kind: input, shape index: {}]   ;;  %s3276_s3 = inlined_call_operand.vmem [shape: f32[1,96], index: 3, kind: input, shape index: {}]   ;;  %s3277_s4 = inlined_call_operand.vmem [shape: bf16[32,32], index: 4, kind: input, shape index: {}]   ;;  %s3278_s5 = inlined_call_operand.vmem [shape: f32[1,32], index: 5, kind: input, shape index: {}]   ;;  %s3279_s6 = inlined_call_operand.vmem [shape: bf16[32,32], index: 6, kind: input, shape index: {}]   ;;  %s3280_s7 = inlined_call_operand.vmem [shape: f32[1,32], index: 7, kind: input, shape index: {}]   ;;  %s3281_s8 = inlined_call_operand.hbm [shape: bf16[32,64], index: 8, kind: input, shape index: {}]   ;;  %s3282_s9 = inlined_call_operand.vmem [shape: f32[1,64], index: 9, kind: input, shape index: {}]   ;;  %s3283_s10 = inlined_call_operand.hbm [shape: bf16[32,32], index: 10, kind: input, shape index: {}]   ;;  %s3284_s11 = inlined_call_operand.vmem [shape: f32[1,32], index: 11, kind: input, shape index: {}]   ;;  %s3285_s12 = inlined_call_operand.hbm [shape: bf16[32,128], index: 12, kind: input, shape index: {}]   ;;  %s3286_s13 = inlined_call_operand.vmem [shape: f32[1,128], index: 13, kind: input, shape index: {}]   ;;  %s3287_s14 = inlined_call_operand.vmem [shape: bf16[128,32], index: 14, kind: input, shape index: {}]   ;;  %s3288_s15 = inlined_call_operand.vmem [shape: f32[1,32], index: 15, kind: input, shape index: {}]   ;;  %s3289_s16 = inlined_call_operand.hbm [shape: f32[2,8,32], index: 16, kind: output, shape index: {}]  }
   0x1   :  { %3302 = sst [smem:[#allocation19_spill]] %s3273_s0 }
   0x2   :  { %21 = vsyncpa [#allocation4], 0 }
   0x3   :  { %22 = vsyncpa [#allocation7], 0 }
   0x4   :  { %23 = vsyncpa [#allocation5], 0 }
   0x5   :  { %25 = vsyncpa [#allocation5 + $0x1], 0  ;;  %s2850_s21 = smov 0   ;;  %s2852_s22 = smov 0  }
   0x6   :  { %s2854_s23 = smov 0   ;;  %s2856_s24 = smov 0  }
   0x7 LB: > { %3303 = sst [smem:[#allocation13_spill]] %s2729_s21  ;;  %s2871_s25 = sadd.s32 4294967295, %s2741_s24   ;;  %s2741_s24 = sphi %s2856_s24, %s3327_s24   ;;  %s2737_s23 = sphi %s2854_s23, %s3329_s23   ;;  %s2733_s22 = sphi %s2852_s22, %s3331_s22   ;;  %s2729_s21 = sphi %s2850_s21, %s3330_s21  }
   0x8   : > { %3304 = sst [smem:[#allocation14_spill]] %s2737_s23  ;;  %s2154_s26 = sadd.s32 4294967294, %s2741_s24  }
   0x9   : > { %3305 = sst [smem:[#allocation15_spill]] %s2741_s24  ;;  %s2875_s27 = sadd.s32 1, %s2741_s24  }
   0xa   : > { %3306 = sst [smem:[#allocation16_spill]] %s2875_s27  ;;  %s384_s28 = sadd.s32 1, %s2737_s23 }
   0xb   : > { %s381_s29 = ssub.s32 %s2741_s24, %s2875_s27  ;;  %p394_p0 = scmp.ne.s32.totalorder %s2737_s23, %s2733_s22 }
   0xc   : > { %p382_p1 = scmp.eq.s32.totalorder %s381_s29, 0  ;;  %p395_p2 = scmp.eq.s32.totalorder %s2871_s25, 1 }
   0xd   : > { %p400_p3 = scmp.ne.s32.totalorder %s2733_s22, %s2729_s21  ;;  %p401_p4 = scmp.eq.s32.totalorder %s2154_s26, 1 }
   0xe   : > { %s2886_s30 = scalar_select %p382_p1, %s2737_s23, %s384_s28  }
   0xf   : > { %p2888_p5 = por %p395_p2, %p394_p0  ;;  %p2892_p6 = por %p401_p4, %p400_p3 }
  0x10   : > { %3307 = sst [smem:[#allocation17_spill]] %s2886_s30  ;;  %p2155_p7 = scmp.ge.s32.totalorder %s2741_s24, 1 }
  0x11   : > { %s3308_s0 = scalar_select %p2888_p5, 1, 0 }
  0x12   : > { %s3309_s17 = scalar_select %p2892_p6, 1, 0 }
  0x13   : > { %p408_p8 = scmp.lt.s32.totalorder %s2741_s24, 3  ;;  %p3295_p9 = scmp.eq.s32.totalorder %s2871_s25, 0 }
  0x14   : > { %3310 = sst [smem:[#allocation18_spill]] %s3309_s17  ;;  %s2743_s19 = smov [#allocation6]  }
  0x15   : > { %p2899_p10 = pnand %p2155_p7, %p408_p8  ;;  %s454_s20 = sshll.u32 %s2743_s19, 4  ;;  %s455_s20 = int_to_ptr.vmem [resolvable:$true] %s454_s20 }
  0x16   : > { %s2744_s28 = smov [#allocation3]   ;;  %s2745_s30 = smov [#allocation8]  }
  0x17   : > { %p2469_p11 = pneg %p2899_p10  ;;  %s438_s29 = sshll.u32 %s2744_s28, 4  ;;  %s439_s29 = int_to_ptr.vmem [resolvable:$true] %s438_s29 }
  0x18   : > { %s470_s23 = sshll.u32 %s2745_s30, 4  ;;  %s2606_s27 = scalar_lea.vmem %s455_s20, 256  ;;  %s471_s23 = int_to_ptr.vmem [resolvable:$true] %s470_s23 }
  0x19   : > { %p2907_p12 = pnand %p3295_p9, %p2469_p11  ;;  %p2607_p0 = scmp.ne.s32.totalorder %s455_s20, %s2606_s27 }
  0x1a   : > { %p2614_p3 = scmp.lt.s32.totalorder %s455_s20, %s455_s20  ;;  %p2615_p4 = scmp.lt.s32.totalorder %s2606_s27, %s2606_s27 }
  0x1b   : > { %p2597_p13 = pneg %p2907_p12 }
  0x1c   : > { %p2616_p7 = por %p2615_p4, %p2614_p3 }
  0x1d   : > { %p2609_p1 = pnand %p2607_p0, %p2597_p13 }
  0x1f   : > { %p2610_p2 = pneg %p2609_p1 }
  0x21   : > { %p2617_p8 = pnand %p2616_p7, %p2610_p2 }
  0x23   : > { %2620 = shalt.err (!%p2617_p8)
}
  0x24   : > { %s2746_s19 = smov 64   ;;  %s2747_s28 = smov 4  }
  0x25   : > { %2475 = dma.hbm_to_vmem [thread:$0]  (!%p2907_p12), %s3283_s10, 256, %s455_s20, [#allocation7], %s2746_s19, %s2746_s19, %s2747_s28  }
  0x26   : > { %s2632_s21 = scalar_lea.vmem %s439_s29, 256  ;;  %p2640_p9 = scmp.lt.s32.totalorder %s439_s29, %s439_s29 }
  0x27   : > { %p2633_p11 = scmp.ne.s32.totalorder %s439_s29, %s2632_s21  ;;  %p2641_p6 = scmp.lt.s32.totalorder %s2632_s21, %s2632_s21 }
  0x29   : > { %p2635_p0 = pnand %p2633_p11, %p2597_p13  ;;  %p2642_p3 = por %p2641_p6, %p2640_p9 }
  0x2b   : > { %p2636_p1 = pneg %p2635_p0 }
  0x2d   : > { %p2643_p2 = pnand %p2642_p3, %p2636_p1 }
  0x2f   : > { %2646 = shalt.err (!%p2643_p2)
}
  0x30   : > { %2472 = dma.hbm_to_vmem [thread:$0]  (!%p2907_p12), %s3281_s8, 256, %s439_s29, [#allocation4], %s2746_s19, %s2746_s19, %s2747_s28  }
  0x31   : > { %s2658_s17 = scalar_lea.vmem %s471_s23, 256  ;;  %p2666_p11 = scmp.lt.s32.totalorder %s471_s23, %s471_s23 }
  0x32   : > { %p2659_p4 = scmp.ne.s32.totalorder %s471_s23, %s2658_s17  ;;  %p2667_p0 = scmp.lt.s32.totalorder %s2658_s17, %s2658_s17 }
  0x34   : > { %p2661_p7 = pnand %p2659_p4, %p2597_p13  ;;  %p2668_p5 = por %p2667_p0, %p2666_p11 }
  0x36   : > { %p2662_p8 = pneg %p2661_p7 }
  0x38   : > { %p2669_p6 = pnand %p2668_p5, %p2662_p8 }
  0x3a   : > { %2672 = shalt.err (!%p2669_p6)
}
  0x3b   : > { %2478 = dma.hbm_to_vmem [thread:$0]  (!%p2907_p12), %s3285_s12, 256, %s471_s23, [#allocation7], %s2746_s19, %s2746_s19, %s2747_s28  }
  0x3c   : > { %509 = sbr.rel (%p2899_p10) target bundleno = 3765 (0xeb5), region = 84  ;;  %p3313_p9 = scmp.eq.s32.totalorder (!%p2899_p10), %s2871_s25, 0 }
  0x41   : > { %2716 = dma.done.wait (%p3313_p9), [#allocation4], 256   ;;  %p3314_p13 = pmov %p3313_p9 }
  0x42   : > { %p3315_p1 = pmov %p3313_p9 }
  0x43   : > { %2718 = vsyncadd (%p3314_p13), [#allocation4], 4294967040 }
  0x44   : > { %2720 = dma.done.wait (%p3315_p1), [#allocation7], 512   ;;  %p3316_p5 = pmov %p3315_p1 }
  0x45   : > { %p570_p3 = scmp.lt.s32.totalorder %s2871_s25, 1  ;;  %v2748_v0 = vmov 0.0   ;;  %vm2749_vm0 = vmmov 0   ;;  %s3317_s29 = sld [smem:[#allocation19_spill]]  ;;  %v2543_v1 = vld [vmem:[%s3275_s2 + $0x8] sm:$0xff]   ;;  %v2544_v2 = vld [vmem:[%s3275_s2] sm:$0xff]  }
  0x46   : > { %2722 = vsyncadd (%p3316_p5), [#allocation7], 4294966784  ;;  %2291 = vmatprep.subr.bf16.mxu1 %v2748_v0  ;;  %2295 = vmatprep.mubr.msk.bf16.mxu1 %vm2749_vm0, %v2748_v0  ;;  %vm605_vm1 = vcmask 261120   ;;  %v2167_v5 = vld [vmem:[%s3276_s3] ss:$0 sm:$0xff]  ;;  %s2750_s18 = smov 64  }
  0x47   : > { %s2952_s23 = scalar_select %p570_p3, %s2871_s25, 1  ;;  %2317 = vmatprep.subr.bf16.mxu0 %v2748_v0  ;;  %2319 = vmatprep.mubr.msk.bf16.mxu0 %vm2749_vm0, %v2748_v0  ;;  %vm658_vm2 = vcmask 64512   ;;  %vm722_vm3 = vcmask 1043456   ;;  %vm767_vm4 = vcmask 60416   ;;  %vm886_vm5 = vcmask 126016  }
  0x48   : > { %2292 = vmatpush3.bf16.msra.mxu1 %v2543_v1  ;;  %s2751_s26 = smov 96   ;;  %s2754_s28 = smov 120   ;;  %vm1005_vm6 = vcmask 191616   ;;  %vm1124_vm7 = vcmask 257216  }
  0x49   : > { %s2165_s24 = sshll.u32 %s2952_s23, 3  ;;  %2293 = vmatprep.subr.bf16.mxu1 %v2748_v0  ;;  %s3300_s30 = smov 80  }
  0x4a   : > { %s2756_s27 = smov 112   ;;  %s2757_s17 = smov 104  }
  0x4b   : > { %s573_s19 = scalar_lea.vmem %s3317_s29, %s2165_s24  ;;  %s3298_s29 = smov 88  }
  0x4c   : > { %v2969_v3 = vld [vmem:[%s573_s19] sm:$0xff]  ;;  %2294 = vmatpush3.bf16.msra.mxu1 %v2544_v2  ;;  %s3299_s19 = smov 72   ;;  %s2758_s21 = smov 56  }
  0x4d   : > { %v581_v4 = vpack.c.bf16 %v2969_v3, %v2969_v3  ;;  %2299 = vmatprep.subr.bf16.mxu1 %v2748_v0  ;;  %s2759_s20 = smov 48   ;;  %p3322_p12 = scmp.ne.s32.totalorder %s3308_s0, 0 }
  0x4f   : > { %2296 = vmatmul.mubr.msk.bf16.vlgmr.msra.gmra.mxu1 %vm605_vm1, %v581_v4 }
  0x50   : > { %2301 = vmatprep.mubr.msk.bf16.mxu1 %vm2749_vm0, %v2748_v0 }
 0x10f   : > { %v643_v6 = vpop.f32.mrf.mxu1 }
 0x110   : > { %v644_v7 = vadd.f32 %v2167_v5, %v643_v6 }
 0x111   : > { %v2297_v8 = vpop.f32.mrf.mxu1 }
 0x112   : > { %v2981_v9 = vpack.c.bf16 %v644_v7, %v644_v7 }
 0x113   : > { %v646_v10 = vpop.f32.mrf.mxu1 }
 0x114   : > { %717 = vrot.lane.b32.xlu1 %v2981_v9, %s2750_s18  ;;  %656 = vrot.lane.b32.xlu0 %v2981_v9, %s2751_s26  ;;  %s2760_s18 = smov 40  }
 0x115   : > { %v2298_v11 = vpop.f32.mrf.mxu1 }
 0x118   : > { %771 = vrot.lane.b32.xlu1 %v2981_v9, %s3298_s29  ;;  %s2764_s29 = smov [#allocation9]  }
 0x186   : > { %v657_v12 = vpop.permute.xlu0 %656  ;;  %v718_v14 = vpop.permute.xlu1 %717 }
 0x187   : > { %v663_v13 = vsel %vm658_vm2, %v657_v12, 0  ;;  %v724_v15 = vsel %vm722_vm3, %v718_v14, 0 }
 0x188   : > { %2300 = vmatpush3.bf16.xpose.msra.mxu1 %v663_v13 }
 0x189   : > { %2305 = vmatprep.subr.bf16.mxu1 %v2748_v0 }
 0x18a   : > { %v772_v26 = vpop.permute.xlu1 %771 }
 0x18b   : > { %v777_v32 = vsel %vm658_vm2, %v772_v26, 0 }
 0x18f   : > { %2302 = vmatmul.mubr.msk.bf16.vlgmr.msra.gmra.mxu1 %vm658_vm2, %v2981_v9 }
 0x190   : > { %2306 = vmatpush3.bf16.msra.mxu1 %v724_v15  ;;  %2307 = vmatprep.mubr.msk.bf16.mxu1 %vm2749_vm0, %v2748_v0 }
 0x191   : > { %2311 = vmatprep.subr.bf16.mxu1 %v2748_v0 }
 0x24f   : > { %v699_v16 = vpop.f32.mrf.mxu1 }
 0x250   : > { %v705_v17 = vsel %vm658_vm2, %v699_v16, -inf }
 0x251   : > { %706 = vmax.xlane.f32.xlu0 %v705_v17  ;;  %v2303_v18 = vpop.f32.mrf.mxu1 }
 0x253   : > { %v702_v19 = vpop.f32.mrf.mxu1 }
 0x255   : > { %v2304_v20 = vpop.f32.mrf.mxu1 }
 0x267   : > { %1009 = vrot.lane.b32.xlu0 %v2981_v9, %s3299_s19 }
 0x2da   : > { %v707_v21 = vpop.xlane.xlu0 %706 }
 0x2db   : > { %v708_v22 = vsub.f32 %v699_v16, %v707_v21 }
 0x2dd   : > { %v709_v23 = vmul.f32 1.442695, %v708_v22 }
 0x2de   : > { %v1010_v35 = vpop.permute.xlu0 %1009 }
 0x2df   : > { %2563 = vpow2.f32 %v709_v23  ;;  %v1015_v37 = vsel %vm658_vm2, %v1010_v35, 0  ;;  %v2545_v35 = vld [vmem:[%s3277_s4 + $0x8] sm:$0xff]  }
 0x2ec   : > { %v2564_v24 = vpop.eup %2563 }
 0x2ed   : > { %v711_v25 = vsel %vm658_vm2, %v2564_v24, 0.0 }
 0x2ee   : > { %712 = vadd.xlane.f32.xlu1 %v711_v25 }
 0x2ff   : > { %769 = vrot.lane.b32.xlu1 %v2981_v9, %s2754_s28 }
 0x303   : > { %890 = vrot.lane.b32.xlu1 %v2981_v9, %s3300_s30  ;;  %s2762_s30 = smov 16  }
 0x307   : > { %888 = vrot.lane.b32.xlu1 %v2981_v9, %s2756_s27 }
 0x30b   : > { %1007 = vrot.lane.b32.xlu1 %v2981_v9, %s2757_s17 }
 0x377   : > { %v713_v27 = vpop.xlane.xlu1 %712 }
 0x378   : > { %2565 = vrcp.f32 %v713_v27 }
 0x37b   : > { %v770_v31 = vpop.permute.xlu1 %769 }
 0x37f   : > { %v891_v33 = vpop.permute.xlu1 %890 }
 0x380   : > { %v896_v34 = vsel %vm658_vm2, %v891_v33, 0 }
 0x383   : > { %v889_v36 = vpop.permute.xlu1 %888 }
 0x385   : > { %v2566_v28 = vpop.eup %2565 }
 0x386   : > { %v715_v29 = vmul.f32 %v2566_v28, %v2564_v24 }
 0x387   : > { %v1008_v38 = vpop.permute.xlu1 %1007 }
 0x388   : > { %v716_v30 = vpack.c.bf16 %v715_v29, %v715_v29 }
 0x38a   : > { %2308 = vmatmul.mubr.msk.bf16.vlgmr.msra.gmra.mxu1 %vm658_vm2, %v716_v30 }
 0x38b   : > { %2312 = vmatpush3.bf16.xpose.msra.mxu1 %v777_v32  ;;  %2313 = vmatprep.mubr.msk.bf16.mxu1 %vm2749_vm0, %v2748_v0 }
 0x38c   : > { %2323 = vmatprep.subr.bf16.mxu1 %v2748_v0 }
 0x392   : > { %2314 = vmatmul.mubr.msk.bf16.vlgmr.msra.gmra.mxu1 %vm658_vm2, %v770_v31 }
 0x393   : > { %2324 = vmatpush3.bf16.xpose.msra.mxu1 %v896_v34  ;;  %2325 = vmatprep.mubr.msk.bf16.mxu1 %vm2749_vm0, %v2748_v0 }
 0x394   : > { %2335 = vmatprep.subr.bf16.mxu1 %v2748_v0 }
 0x39a   : > { %2326 = vmatmul.mubr.msk.bf16.vlgmr.msra.gmra.mxu1 %vm658_vm2, %v889_v36 }
 0x39b   : > { %2336 = vmatpush3.bf16.xpose.msra.mxu1 %v1015_v37  ;;  %2337 = vmatprep.mubr.msk.bf16.mxu1 %vm2749_vm0, %v2748_v0  ;;  %v2546_v37 = vld [vmem:[%s3277_s4] sm:$0xff]  }
 0x39c   : > { %2347 = vmatprep.subr.bf16.mxu1 %v2748_v0 }
 0x3a2   : > { %2338 = vmatmul.mubr.msk.bf16.vlgmr.msra.gmra.mxu1 %vm658_vm2, %v1008_v38 }
 0x3a3   : > { %2351 = vmatprep.mubr.msk.bf16.mxu1 %vm2749_vm0, %v2748_v0  ;;  %2348 = vmatpush3.bf16.msra.mxu1 %v2545_v35 }
 0x3a4   : > { %2349 = vmatprep.subr.bf16.mxu1 %v2748_v0 }
 0x3a7   : > { %2350 = vmatpush3.bf16.msra.mxu1 %v2546_v37 }
 0x3a8   : > { %2363 = vmatprep.subr.bf16.mxu1 %v2748_v0 }
 0x44a   : > { %v760_v39 = vpop.f32.mrf.mxu1 }
 0x44b   : > { %v766_v40 = vpack.c.bf16 %v760_v39, %v760_v39 }
 0x44c   : > { %v2309_v41 = vpop.f32.mrf.mxu1 }
 0x44d   : > { %768 = vst.msk [vmem:[#allocation2] sm:$0xf] %vm767_vm4, %v766_v40 }
 0x44e   : > { %v763_v42 = vpop.f32.mrf.mxu1 }
 0x450   : > { %v2310_v43 = vpop.f32.mrf.mxu1 }
 0x452   : > { %v813_v44 = vpop.f32.mrf.mxu1 }
 0x453   : > { %v819_v45 = vsel %vm658_vm2, %v813_v44, -inf }
 0x454   : > { %820 = vmax.xlane.f32.xlu1 %v819_v45  ;;  %v2315_v46 = vpop.f32.mrf.mxu1 }
 0x456   : > { %v816_v47 = vpop.f32.mrf.mxu1 }
 0x458   : > { %v2316_v48 = vpop.f32.mrf.mxu1 }
 0x45a   : > { %v932_v49 = vpop.f32.mrf.mxu1 }
 0x45b   : > { %v938_v50 = vsel %vm658_vm2, %v932_v49, -inf }
 0x45c   : > { %939 = vmax.xlane.f32.xlu0 %v938_v50  ;;  %v2327_v51 = vpop.f32.mrf.mxu1  ;;  %v2547_v50 = vld [vmem:[#allocation3 + $0x8] sm:$0xff]  }
 0x45e   : > { %v935_v52 = vpop.f32.mrf.mxu1 }
 0x45f   : > { %v2548_v52 = vld [vmem:[#allocation3] sm:$0xff]  }
 0x460   : > { %v2328_v53 = vpop.f32.mrf.mxu1 }
 0x462   : > { %v1051_v54 = vpop.f32.mrf.mxu1 }
 0x463   : > { %v1057_v55 = vsel %vm658_vm2, %v1051_v54, -inf }
 0x464   : > { %1058 = vmax.xlane.f32.xlu1 %v1057_v55  ;;  %v2339_v56 = vpop.f32.mrf.mxu1  ;;  %v2549_v55 = vld [vmem:[%s3279_s6 + $0x8] sm:$0xff]  }
 0x465   : > { %v2550_v56 = vld [vmem:[%s3279_s6] sm:$0xff]  }
 0x466   : > { %v1054_v57 = vpop.f32.mrf.mxu1 }
 0x467   : > { %v2182_v57 = vld [vmem:[%s3278_s5] ss:$0 sm:$0xff] }
 0x468   : > { %v2340_v58 = vpop.f32.mrf.mxu1 }
 0x4dd   : > { %v821_v59 = vpop.xlane.xlu1 %820 }
 0x4de   : > { %v822_v60 = vsub.f32 %v813_v44, %v821_v59 }
 0x4e0   : > { %v823_v61 = vmul.f32 1.442695, %v822_v60 }
 0x4e2   : > { %2567 = vpow2.f32 %v823_v61 }
 0x4e5   : > { %v940_v7 = vpop.xlane.xlu0 %939 }
 0x4e6   : > { %v941_v8 = vsub.f32 %v932_v49, %v940_v7 }
 0x4e8   : > { %v942_v10 = vmul.f32 1.442695, %v941_v8 }
 0x4ed   : > { %v1059_v62 = vpop.xlane.xlu1 %1058 }
 0x4ee   : > { %v1060_v63 = vsub.f32 %v1051_v54, %v1059_v62 }
 0x4ef   : > { %v2568_v1 = vpop.eup %2567 }
 0x4f0   : > { %v1061_v2 = vmul.f32 1.442695, %v1060_v63  ;;  %v825_v4 = vsel %vm658_vm2, %v2568_v1, 0.0 }
 0x4f1   : > { %826 = vadd.xlane.f32.xlu1 %v825_v4 }
 0x4f2   : > { %2569 = vpow2.f32 %v1061_v2  ;;  %v2190_v2 = vld [vmem:[%s3282_s9] ss:$0 sm:$0xff] }
 0x4f3   : > { %2571 = vpow2.f32 %v942_v10 }
 0x4ff   : > { %v2570_v5 = vpop.eup %2569 }
 0x500   : > { %v1063_v6 = vsel %vm658_vm2, %v2570_v5, 0.0  ;;  %v2572_v11 = vpop.eup %2571 }
 0x501   : > { %1064 = vadd.xlane.f32.xlu0 %v1063_v6  ;;  %v944_v12 = vsel %vm658_vm2, %v2572_v11, 0.0 }
 0x502   : > { %831 = vrot.lane.b32.xlu1 %v2981_v9, %s2758_s21  ;;  %s2761_s21 = smov 8  }
 0x517   : > { %950 = vrot.lane.b32.xlu0 %v2981_v9, %s2759_s20  ;;  %s3301_s20 = smov 24  }
 0x526   : > { %945 = vadd.xlane.f32.xlu1 %v944_v12 }
 0x537   : > { %1069 = vrot.lane.b32.xlu1 %v2981_v9, %s2760_s18  ;;  %s577_s18 = scalar_lea.vmem %s3274_s1, %s2165_s24 }
 0x538   : > { %v580_v53 = vld [vmem:[%s577_s18] sm:$0xff] }
 0x539   : > { %v1256_v54 = vpack.c.bf16 %v580_v53, %v580_v53 }
 0x57a   : > { %v827_v13 = vpop.xlane.xlu1 %826 }
 0x57b   : > { %2573 = vrcp.f32 %v827_v13 }
 0x57e   : > { %v832_v14 = vpop.permute.xlu1 %831 }
 0x57f   : > { %v837_v15 = vsel %vm722_vm3, %v832_v14, 0 }
 0x580   : > { %2318 = vmatpush3.bf16.msra.mxu0 %v837_v15 }
 0x581   : > { %2329 = vmatprep.subr.bf16.mxu0 %v2748_v0 }
 0x588   : > { %v2574_v16 = vpop.eup %2573 }
 0x589   : > { %v829_v17 = vmul.f32 %v2574_v16, %v2568_v1 }
 0x58a   : > { %v1065_v18 = vpop.xlane.xlu0 %1064 }
 0x58b   : > { %v830_v19 = vpack.c.bf16 %v829_v17, %v829_v17 }
 0x58d   : > { %2320 = vmatmul.mubr.msk.bf16.vlgmr.msra.gmra.mxu0 %vm658_vm2, %v830_v19 }
 0x58e   : > { %v951_v20 = vpop.permute.xlu0 %950  ;;  %2331 = vmatprep.mubr.msk.bf16.mxu0 %vm2749_vm0, %v2748_v0 }
 0x58f   : > { %v956_v9 = vsel %vm722_vm3, %v951_v20, 0 }
 0x590   : > { %2330 = vmatpush3.bf16.msra.mxu0 %v956_v9 }
 0x591   : > { %2341 = vmatprep.subr.bf16.mxu0 %v2748_v0 }
 0x5af   : > { %v946_v21 = vpop.xlane.xlu1 %945 }
 0x5b0   : > { %2575 = vrcp.f32 %v946_v21 }
 0x5b1   : > { %2577 = vrcp.f32 %v1065_v18 }
 0x5b3   : > { %v1070_v24 = vpop.permute.xlu1 %1069 }
 0x5b4   : > { %v1075_v27 = vsel %vm722_vm3, %v1070_v24, 0 }
 0x5bd   : > { %v2576_v22 = vpop.eup %2575 }
 0x5be   : > { %v948_v23 = vmul.f32 %v2576_v22, %v2572_v11  ;;  %v2578_v26 = vpop.eup %2577  ;;  %v2186_v11 = vld [vmem:[%s3280_s7] ss:$0 sm:$0xff] }
 0x5bf   : > { %v1067_v28 = vmul.f32 %v2578_v26, %v2570_v5 }
 0x5c0   : > { %v949_v25 = vpack.c.bf16 %v948_v23, %v948_v23 }
 0x5c1   : > { %v1068_v29 = vpack.c.bf16 %v1067_v28, %v1067_v28 }
 0x5c2   : > { %2332 = vmatmul.mubr.msk.bf16.vlgmr.msra.gmra.mxu0 %vm658_vm2, %v949_v25 }
 0x5c3   : > { %2342 = vmatpush3.bf16.msra.mxu0 %v1075_v27  ;;  %2343 = vmatprep.mubr.msk.bf16.mxu0 %vm2749_vm0, %v2748_v0 }
 0x5c4   : > { %2355 = vmatprep.subr.bf16.mxu0 %v2748_v0 }
 0x5ca   : > { %2344 = vmatmul.mubr.msk.bf16.vlgmr.msra.gmra.mxu0 %vm658_vm2, %v1068_v29 }
 0x5cb   : > { %2359 = vmatprep.mubr.msk.bf16.mxu0 %vm2749_vm0, %v2748_v0  ;;  %2356 = vmatpush3.bf16.msra.mxu0 %v2549_v55 }
 0x5cc   : > { %2357 = vmatprep.subr.bf16.mxu0 %v2748_v0 }
 0x5cf   : > { %2358 = vmatpush3.bf16.msra.mxu0 %v2550_v56 }
 0x5d0   : > { %2371 = vmatprep.subr.bf16.mxu0 %v2748_v0 }
 0x64d   : > { %v873_v30 = vpop.f32.mrf.mxu0 }
 0x64e   : > { %v2226_v31 = vpack.c.bf16 %v873_v30, %v873_v30 }
 0x64f   : > { %v2321_v32 = vpop.f32.mrf.mxu0 }
 0x650   : > { %883 = vrot.lane.b32.xlu1 %v2226_v31, %s2761_s21 }
 0x651   : > { %v876_v33 = vpop.f32.mrf.mxu0 }
 0x653   : > { %v2322_v34 = vpop.f32.mrf.mxu0 }
 0x682   : > { %v992_v36 = vpop.f32.mrf.mxu0 }
 0x683   : > { %v2227_v38 = vpack.c.bf16 %v992_v36, %v992_v36 }
 0x684   : > { %v2333_v39 = vpop.f32.mrf.mxu0 }
 0x685   : > { %1002 = vrot.lane.b32.xlu0 %v2227_v38, %s2762_s30 }
 0x686   : > { %v995_v40 = vpop.f32.mrf.mxu0 }
 0x688   : > { %v2334_v41 = vpop.f32.mrf.mxu0 }
 0x68a   : > { %v1111_v42 = vpop.f32.mrf.mxu0 }
 0x68b   : > { %v2228_v43 = vpack.c.bf16 %v1111_v42, %v1111_v42 }
 0x68c   : > { %v2345_v44 = vpop.f32.mrf.mxu0 }
 0x68d   : > { %1121 = vrot.lane.b32.xlu1 %v2228_v43, %s3301_s20 }
 0x68e   : > { %v1114_v45 = vpop.f32.mrf.mxu0 }
 0x690   : > { %v2346_v46 = vpop.f32.mrf.mxu0 }
 0x6c2   : > { %v884_v47 = vpop.permute.xlu1 %883 }
 0x6c3   : > { %887 = vst.msk [vmem:[#allocation2] sm:$0xf] %vm886_vm5, %v884_v47 }
 0x6f7   : > { %v1003_v48 = vpop.permute.xlu0 %1002 }
 0x6f8   : > { %1006 = vst.msk [vmem:[#allocation2] sm:$0xf] %vm1005_vm6, %v1003_v48 }
 0x6ff   : > { %v1122_v49 = vpop.permute.xlu1 %1121 }
 0x700   : > { %1125 = vst.msk [vmem:[#allocation2] sm:$0xf] %vm1124_vm7, %v1122_v49 }
 0x707   : > { %v1126_v51 = vld [vmem:[#allocation2] sm:$0xf] }
 0x708   : > { %2352 = vmatmul.mubr.msk.bf16.vlgmr.msra.gmra.mxu1 %vm605_vm1, %v1126_v51 }
 0x709   : > { %2364 = vmatpush3.bf16.msra.mxu1 %v2547_v50  ;;  %2367 = vmatprep.mubr.msk.bf16.mxu1 %vm2749_vm0, %v2748_v0 }
 0x70a   : > { %2365 = vmatprep.subr.bf16.mxu1 %v2748_v0 }
 0x70d   : > { %2366 = vmatpush3.bf16.msra.mxu1 %v2548_v52 }
 0x70e   : > { %2377 = vmatprep.subr.bf16.mxu1 %v2748_v0 }
 0x710   : > { %2368 = vmatmul.mubr.msk.bf16.vlgmr.msra.gmra.mxu1 %vm605_vm1, %v1256_v54 }
 0x711   : > { %2379 = vmatprep.mubr.msk.bf16.mxu1 %vm2749_vm0, %v2748_v0 }
 0x7c8   : > { %v1182_v58 = vpop.f32.mrf.mxu1 }
 0x7c9   : > { %v1183_v59 = vadd.f32 %v2182_v57, %v1182_v58 }
 0x7ca   : > { %v2353_v60 = vpop.f32.mrf.mxu1 }
 0x7cb   : > { %v3090_v61 = vadd.f32 %v1183_v59, %v2969_v3 }
 0x7cc   : > { %v1185_v62 = vpop.f32.mrf.mxu1 }
 0x7cd   : > { %v1189_v63 = vpack.c.bf16 %v3090_v61, %v3090_v61 }
 0x7ce   : > { %v2354_v1 = vpop.f32.mrf.mxu1 }
 0x7cf   : > { %2360 = vmatmul.mubr.msk.bf16.vlgmr.msra.gmra.mxu0 %vm605_vm1, %v1189_v63 }
 0x7d0   : > { %v1317_v4 = vpop.f32.mrf.mxu1  ;;  %2373 = vmatprep.mubr.msk.bf16.mxu0 %vm2749_vm0, %v2748_v0 }
 0x7d1   : > { %v1318_v5 = vadd.f32 %v2190_v2, %v1317_v4 }
 0x7d2   : > { %v2369_v6 = vpop.f32.mrf.mxu1 }
 0x7d3   : > { %v3100_v7 = vpack.c.bf16 %v1318_v5, %v1318_v5 }
 0x7d4   : > { %v1320_v3 = vpop.f32.mrf.mxu1 }
 0x7d5   : > { %1442 = vrot.lane.b32.xlu0 %v3100_v7, %s2754_s28  ;;  %v1334_v8 = vsel %vm658_vm2, %v3100_v7, 0 }
 0x7d6   : > { %v2370_v10 = vpop.f32.mrf.mxu1  ;;  %2372 = vmatpush3.bf16.xpose.msra.mxu0 %v1334_v8 }
 0x7d7   : > { %2383 = vmatprep.subr.bf16.mxu0 %v2748_v0 }
 0x7d9   : > { %1560 = vrot.lane.b32.xlu0 %v3100_v7, %s2756_s27 }
 0x7dd   : > { %1678 = vrot.lane.b32.xlu0 %v3100_v7, %s2757_s17 }
 0x847   : > { %v1443_v15 = vpop.permute.xlu0 %1442 }
 0x848   : > { %v1448_v17 = vsel %vm658_vm2, %v1443_v15, 0 }
 0x84b   : > { %v1561_v20 = vpop.permute.xlu0 %1560 }
 0x84c   : > { %v1566_v21 = vsel %vm658_vm2, %v1561_v20, 0 }
 0x84f   : > { %v1679_v22 = vpop.permute.xlu0 %1678 }
 0x850   : > { %v1684_v24 = vsel %vm658_vm2, %v1679_v22, 0 }
 0x88f   : > { %v1250_v12 = vpop.f32.mrf.mxu0 }
 0x890   : > { %v1251_v13 = vadd.f32 %v2186_v11, %v1250_v12 }
 0x891   : > { %v2361_v14 = vpop.f32.mrf.mxu0 }
 0x892   : > { %v1328_v16 = vpack.c.bf16 %v1251_v13, %v1251_v13 }
 0x893   : > { %v1253_v18 = vpop.f32.mrf.mxu0 }
 0x894   : > { %1440 = vrot.lane.b32.xlu1 %v1328_v16, %s2754_s28  ;;  %2374 = vmatmul.mubr.msk.bf16.vlgmr.msra.gmra.mxu0 %vm658_vm2, %v1328_v16  ;;  %s3319_s28 = smov 72  }
 0x895   : > { %v2362_v19 = vpop.f32.mrf.mxu0  ;;  %2384 = vmatpush3.bf16.xpose.msra.mxu0 %v1448_v17  ;;  %2385 = vmatprep.mubr.msk.bf16.mxu0 %vm2749_vm0, %v2748_v0 }
 0x896   : > { %2395 = vmatprep.subr.bf16.mxu0 %v2748_v0 }
 0x898   : > { %1558 = vrot.lane.b32.xlu1 %v1328_v16, %s2756_s27  ;;  %s3320_s27 = smov 88  }
 0x89c   : > { %1676 = vrot.lane.b32.xlu1 %v1328_v16, %s2757_s17  ;;  %s3321_s17 = smov 24  }
 0x906   : > { %v1441_v9 = vpop.permute.xlu1 %1440 }
 0x907   : > { %2386 = vmatmul.mubr.msk.bf16.vlgmr.msra.gmra.mxu0 %vm658_vm2, %v1441_v9 }
 0x908   : > { %2396 = vmatpush3.bf16.xpose.msra.mxu0 %v1566_v21  ;;  %2397 = vmatprep.mubr.msk.bf16.mxu0 %vm2749_vm0, %v2748_v0 }
 0x909   : > { %2407 = vmatprep.subr.bf16.mxu0 %v2748_v0 }
 0x90a   : > { %v1559_v23 = vpop.permute.xlu1 %1558 }
 0x90e   : > { %v1677_v25 = vpop.permute.xlu1 %1676 }
 0x90f   : > { %2398 = vmatmul.mubr.msk.bf16.vlgmr.msra.gmra.mxu0 %vm658_vm2, %v1559_v23 }
 0x910   : > { %2408 = vmatpush3.bf16.xpose.msra.mxu0 %v1684_v24  ;;  %2409 = vmatprep.mubr.msk.bf16.mxu0 %vm2749_vm0, %v2748_v0 }
 0x911   : > { %2419 = vmatprep.subr.bf16.mxu0 %v2748_v0 }
 0x917   : > { %2410 = vmatmul.mubr.msk.bf16.vlgmr.msra.gmra.mxu0 %vm658_vm2, %v1677_v25 }
 0x918   : > { %2423 = vmatprep.mubr.msk.bf16.mxu0 %vm2749_vm0, %v2748_v0 }
 0x954   : > { %v1370_v26 = vpop.f32.mrf.mxu0 }
 0x955   : > { %v1376_v27 = vsel %vm658_vm2, %v1370_v26, -inf }
 0x956   : > { %1377 = vmax.xlane.f32.xlu0 %v1376_v27  ;;  %v2375_v28 = vpop.f32.mrf.mxu0 }
 0x958   : > { %v1373_v29 = vpop.f32.mrf.mxu0 }
 0x95a   : > { %v2376_v30 = vpop.f32.mrf.mxu0 }
 0x9c7   : > { %v1484_v31 = vpop.f32.mrf.mxu0 }
 0x9c8   : > { %v1490_v32 = vsel %vm658_vm2, %v1484_v31, -inf }
 0x9c9   : > { %1491 = vmax.xlane.f32.xlu1 %v1490_v32  ;;  %v2387_v33 = vpop.f32.mrf.mxu0 }
 0x9cb   : > { %v1487_v34 = vpop.f32.mrf.mxu0 }
 0x9cd   : > { %v2388_v35 = vpop.f32.mrf.mxu0 }
 0x9cf   : > { %v1602_v36 = vpop.f32.mrf.mxu0 }
 0x9d0   : > { %v1608_v37 = vsel %vm658_vm2, %v1602_v36, -inf }
 0x9d1   : > { %1609 = vmax.xlane.f32.xlu0 %v1608_v37  ;;  %v2399_v38 = vpop.f32.mrf.mxu0 }
 0x9d2   : > { %v2551_v38 = vld [vmem:[#allocation6 + $0x8] sm:$0xff]  }
 0x9d3   : > { %v1605_v39 = vpop.f32.mrf.mxu0  ;;  %2420 = vmatpush3.bf16.msra.mxu0 %v2551_v38 }
 0x9d4   : > { %2421 = vmatprep.subr.bf16.mxu0 %v2748_v0 }
 0x9d5   : > { %v2400_v40 = vpop.f32.mrf.mxu0 }
 0x9d6   : > { %v2552_v40 = vld [vmem:[#allocation6] sm:$0xff]  }
 0x9d7   : > { %v1720_v41 = vpop.f32.mrf.mxu0  ;;  %2422 = vmatpush3.bf16.msra.mxu0 %v2552_v40 }
 0x9d8   : > { %v1726_v42 = vsel %vm658_vm2, %v1720_v41, -inf  ;;  %2435 = vmatprep.subr.bf16.mxu0 %v2748_v0 }
 0x9d9   : > { %1727 = vmax.xlane.f32.xlu0 %v1726_v42  ;;  %v2411_v43 = vpop.f32.mrf.mxu0 }
 0x9db   : > { %v1723_v44 = vpop.f32.mrf.mxu0 }
 0x9dd   : > { %v2412_v45 = vpop.f32.mrf.mxu0 }
 0x9df   : > { %v1378_v46 = vpop.xlane.xlu0 %1377 }
 0x9e0   : > { %v1379_v47 = vsub.f32 %v1370_v26, %v1378_v46 }
 0x9e2   : > { %v1380_v48 = vmul.f32 1.442695, %v1379_v47 }
 0x9e4   : > { %2579 = vpow2.f32 %v1380_v48 }
 0x9f1   : > { %v2580_v49 = vpop.eup %2579 }
 0x9f2   : > { %v1382_v50 = vsel %vm658_vm2, %v2580_v49, 0.0 }
 0x9f3   : > { %1383 = vadd.xlane.f32.xlu1 %v1382_v50 }
 0xa04   : > { %1389 = vrot.lane.b32.xlu1 %v3100_v7, %s2751_s26  ;;  %s3318_s26 = smov 80  }
 0xa52   : > { %v1492_v51 = vpop.xlane.xlu1 %1491 }
 0xa53   : > { %v1493_v52 = vsub.f32 %v1484_v31, %v1492_v51 }
 0xa55   : > { %v1494_v53 = vmul.f32 1.442695, %v1493_v52 }
 0xa57   : > { %2581 = vpow2.f32 %v1494_v53 }
 0xa5a   : > { %v1610_v54 = vpop.xlane.xlu0 %1609 }
 0xa5b   : > { %v1611_v55 = vsub.f32 %v1602_v36, %v1610_v54  ;;  %v2553_v54 = vld [vmem:[#allocation8 + $0x8] sm:$0xff]  }
 0xa5d   : > { %v1612_v56 = vmul.f32 1.442695, %v1611_v55  ;;  %v2554_v55 = vld [vmem:[#allocation8] sm:$0xff]  }
 0xa5f   : > { %2583 = vpow2.f32 %v1612_v56  ;;  %v2555_v56 = vld [vmem:[%s3287_s14 + $0x38] sm:$0xff]  }
 0xa62   : > { %v1728_v57 = vpop.xlane.xlu0 %1727 }
 0xa63   : > { %v1729_v58 = vsub.f32 %v1720_v41, %v1728_v57  ;;  %v2556_v57 = vld [vmem:[%s3287_s14 + $0x30] sm:$0xff]  }
 0xa64   : > { %v2582_v59 = vpop.eup %2581 }
 0xa65   : > { %v1730_v60 = vmul.f32 1.442695, %v1729_v58  ;;  %v1496_v62 = vsel %vm658_vm2, %v2582_v59, 0.0  ;;  %v2557_v58 = vld [vmem:[%s3287_s14 + $0x28] sm:$0xff]  }
 0xa66   : > { %1497 = vadd.xlane.f32.xlu0 %v1496_v62  ;;  %v2560_v62 = vld [vmem:[%s3287_s14 + $0x10] sm:$0xff]  }
 0xa67   : > { %2585 = vpow2.f32 %v1730_v60  ;;  %v2559_v60 = vld [vmem:[%s3287_s14 + $0x18] sm:$0xff]  }
 0xa6c   : > { %v2584_v63 = vpop.eup %2583 }
 0xa6d   : > { %v1614_v1 = vsel %vm658_vm2, %v2584_v63, 0.0 }
 0xa6e   : > { %1615 = vadd.xlane.f32.xlu1 %v1614_v1  ;;  %v2205_v1 = vld [vmem:[%s3284_s11] ss:$0 sm:$0xff] }
 0xa74   : > { %v2586_v2 = vpop.eup %2585 }
 0xa75   : > { %v1732_v4 = vsel %vm658_vm2, %v2586_v2, 0.0 }
 0xa76   : > { %1733 = vadd.xlane.f32.xlu0 %v1732_v4 }
 0xa7c   : > { %v1384_v5 = vpop.xlane.xlu1 %1383 }
 0xa7d   : > { %2587 = vrcp.f32 %v1384_v5 }
 0xa7f   : > { %1620 = vrot.lane.b32.xlu1 %v3100_v7, %s3318_s26  ;;  %s567_s26 = sand.u32 1, %s2733_s22  }
 0xa80   : > { %v1390_v6 = vpop.permute.xlu1 %1389 }
 0xa81   : > { %v1395_v3 = vsel %vm722_vm3, %v1390_v6, 0 }
 0xa82   : > { %2378 = vmatpush3.bf16.msra.mxu1 %v1395_v3 }
 0xa83   : > { %1738 = vrot.lane.b32.xlu1 %v3100_v7, %s3319_s28  ;;  %2389 = vmatprep.subr.bf16.mxu1 %v2748_v0  ;;  %s2164_s28 = sshll.u32 %s567_s26, 3 }
 0xa8a   : > { %v2588_v8 = vpop.eup %2587 }
 0xa8b   : > { %v1386_v10 = vmul.f32 %v2588_v8, %v2580_v49 }
 0xa8c   : > { %1502 = vrot.lane.b32.xlu0 %v3100_v7, %s3320_s27 }
 0xa8d   : > { %v1387_v11 = vpack.c.bf16 %v1386_v10, %v1386_v10 }
 0xa8f   : > { %2380 = vmatmul.mubr.msk.bf16.vlgmr.msra.gmra.mxu1 %vm658_vm2, %v1387_v11  ;;  %v2209_v11 = vld [vmem:[%s3286_s13] ss:$0 sm:$0xff] }
 0xa90   : > { %2391 = vmatprep.mubr.msk.bf16.mxu1 %vm2749_vm0, %v2748_v0 }
 0xaef   : > { %v1498_v12 = vpop.xlane.xlu0 %1497 }
 0xaf0   : > { %2589 = vrcp.f32 %v1498_v12 }
 0xaf7   : > { %v1616_v13 = vpop.xlane.xlu1 %1615 }
 0xaf8   : > { %2591 = vrcp.f32 %v1616_v13 }
 0xafb   : > { %v1621_v19 = vpop.permute.xlu1 %1620 }
 0xafc   : > { %v1626_v9 = vsel %vm722_vm3, %v1621_v19, 0 }
 0xafd   : > { %v2590_v14 = vpop.eup %2589 }
 0xafe   : > { %v1500_v16 = vmul.f32 %v2590_v14, %v2582_v59  ;;  %v2558_v59 = vld [vmem:[%s3287_s14 + $0x20] sm:$0xff]  }
 0xaff   : > { %v1734_v15 = vpop.xlane.xlu0 %1733  ;;  %v1739_v22 = vpop.permute.xlu1 %1738 }
 0xb00   : > { %2593 = vrcp.f32 %v1734_v15  ;;  %v1501_v7 = vpack.c.bf16 %v1500_v16, %v1500_v16  ;;  %v1744_v25 = vsel %vm722_vm3, %v1739_v22, 0 }
 0xb03   : > { %v1503_v17 = vpop.permute.xlu0 %1502 }
 0xb04   : > { %v1508_v18 = vsel %vm722_vm3, %v1503_v17, 0  ;;  %v2213_v17 = vld [vmem:[%s3288_s15] ss:$0 sm:$0xff] }
 0xb05   : > { %2390 = vmatpush3.bf16.msra.mxu1 %v1508_v18  ;;  %v2592_v20 = vpop.eup %2591 }
 0xb06   : > { %2401 = vmatprep.subr.bf16.mxu1 %v2748_v0  ;;  %v1618_v21 = vmul.f32 %v2592_v20, %v2584_v63  ;;  %v2561_v63 = vld [vmem:[%s3287_s14 + $0x8] sm:$0xff]  }
 0xb08   : > { %2392 = vmatmul.mubr.msk.bf16.vlgmr.msra.gmra.mxu1 %vm658_vm2, %v1501_v7  ;;  %v1619_v23 = vpack.c.bf16 %v1618_v21, %v1618_v21 }
 0xb09   : > { %2402 = vmatpush3.bf16.msra.mxu1 %v1626_v9  ;;  %2403 = vmatprep.mubr.msk.bf16.mxu1 %vm2749_vm0, %v2748_v0 }
 0xb0a   : > { %2413 = vmatprep.subr.bf16.mxu1 %v2748_v0 }
 0xb0d   : > { %v2594_v24 = vpop.eup %2593 }
 0xb0e   : > { %v1736_v26 = vmul.f32 %v2594_v24, %v2586_v2 }
 0xb10   : > { %2404 = vmatmul.mubr.msk.bf16.vlgmr.msra.gmra.mxu1 %vm658_vm2, %v1619_v23  ;;  %v1737_v27 = vpack.c.bf16 %v1736_v26, %v1736_v26 }
 0xb11   : > { %2414 = vmatpush3.bf16.msra.mxu1 %v1744_v25  ;;  %2415 = vmatprep.mubr.msk.bf16.mxu1 %vm2749_vm0, %v2748_v0 }
 0xb12   : > { %2427 = vmatprep.subr.bf16.mxu1 %v2748_v0 }
 0xb18   : > { %2416 = vmatmul.mubr.msk.bf16.vlgmr.msra.gmra.mxu1 %vm658_vm2, %v1737_v27 }
 0xb19   : > { %2431 = vmatprep.mubr.msk.bf16.mxu1 %vm2749_vm0, %v2748_v0  ;;  %2428 = vmatpush3.bf16.msra.mxu1 %v2553_v54 }
 0xb1a   : > { %2429 = vmatprep.subr.bf16.mxu1 %v2748_v0 }
 0xb1d   : > { %2430 = vmatpush3.bf16.msra.mxu1 %v2554_v55 }
 0xb4f   : > { %v1431_v28 = vpop.f32.mrf.mxu1 }
 0xb50   : > { %v1437_v29 = vpack.c.bf16 %v1431_v28, %v1431_v28 }
 0xb51   : > { %v2381_v30 = vpop.f32.mrf.mxu1 }
 0xb52   : > { %1438 = vst.msk [vmem:[#allocation2] sm:$0xf] %vm767_vm4, %v1437_v29 }
 0xb53   : > { %v1434_v31 = vpop.f32.mrf.mxu1 }
 0xb55   : > { %v2382_v32 = vpop.f32.mrf.mxu1 }
 0xbc8   : > { %v1544_v33 = vpop.f32.mrf.mxu1 }
 0xbc9   : > { %v2229_v34 = vpack.c.bf16 %v1544_v33, %v1544_v33 }
 0xbca   : > { %v2393_v35 = vpop.f32.mrf.mxu1 }
 0xbcb   : > { %1554 = vrot.lane.b32.xlu0 %v2229_v34, %s2761_s21  ;;  %s569_s21 = scalar_lea.vmem [#allocation9], %s2164_s28  ;;  %s2677_s28 = sshll.u32 %s2764_s29, 4  ;;  %s2678_s28 = int_to_ptr.vmem [resolvable:$false] %s2677_s28 }
 0xbcc   : > { %v1547_v36 = vpop.f32.mrf.mxu1  ;;  %s2052_s19 = sshll.u32 %s569_s21, 4  ;;  %s2679_s27 = scalar_lea.vmem %s2678_s28, 256  ;;  %s3233_s19 = int_to_ptr.vmem [resolvable:$true] %s2052_s19 }
 0xbcd   : > { %s2673_s20 = scalar_lea.vmem %s3233_s19, 128  ;;  %p2680_p7 = scmp.lt.s32.totalorder %s3233_s19, %s2678_s28 }
 0xbce   : > { %v2394_v37 = vpop.f32.mrf.mxu1  ;;  %p2674_p10 = scmp.ne.s32.totalorder %s3233_s19, %s2673_s20  ;;  %p2681_p8 = scmp.lt.s32.totalorder %s2679_s27, %s2673_s20 }
 0xbd0   : > { %v1662_v39 = vpop.f32.mrf.mxu1  ;;  %p2675_p2 = pnand %p2674_p10, %p3322_p12  ;;  %p2682_p11 = por %p2681_p8, %p2680_p7 }
 0xbd1   : > { %v2230_v41 = vpack.c.bf16 %v1662_v39, %v1662_v39 }
 0xbd2   : > { %v2405_v42 = vpop.f32.mrf.mxu1  ;;  %p2676_p4 = pneg %p2675_p2 }
 0xbd3   : > { %1672 = vrot.lane.b32.xlu1 %v2230_v41, %s2762_s30  ;;  %s2223_s30 = sshll.u32 %s2871_s25, 7  ;;  %s2039_s25 = scalar_lea.sflag [#allocation5], %s567_s26 }
 0xbd4   : > { %v1665_v43 = vpop.f32.mrf.mxu1  ;;  %s3231_s24 = scalar_lea.hbm %s3289_s16, %s2223_s30  ;;  %p2683_p0 = pnand %p2682_p11, %p2676_p4 }
 0xbd6   : > { %v2406_v44 = vpop.f32.mrf.mxu1 }
 0xbd8   : > { %v1780_v45 = vpop.f32.mrf.mxu1 }
 0xbd9   : > { %v2231_v46 = vpack.c.bf16 %v1780_v45, %v1780_v45 }
 0xbda   : > { %v2417_v47 = vpop.f32.mrf.mxu1 }
 0xbdb   : > { %1790 = vrot.lane.b32.xlu0 %v2231_v46, %s3321_s17 }
 0xbdc   : > { %v1783_v48 = vpop.f32.mrf.mxu1 }
 0xbde   : > { %v2418_v49 = vpop.f32.mrf.mxu1 }
 0xc3d   : > { %v1555_v50 = vpop.permute.xlu0 %1554 }
 0xc3e   : > { %1557 = vst.msk [vmem:[#allocation2] sm:$0xf] %vm886_vm5, %v1555_v50 }
 0xc45   : > { %v1673_v51 = vpop.permute.xlu1 %1672 }
 0xc46   : > { %1675 = vst.msk [vmem:[#allocation2] sm:$0xf] %vm1005_vm6, %v1673_v51 }
 0xc4d   : > { %v1791_v52 = vpop.permute.xlu0 %1790 }
 0xc4e   : > { %1793 = vst.msk [vmem:[#allocation2] sm:$0xf] %vm1124_vm7, %v1791_v52 }
 0xc55   : > { %v1794_v53 = vld [vmem:[#allocation2] sm:$0xf] }
 0xc56   : > { %2424 = vmatmul.mubr.msk.bf16.vlgmr.msra.gmra.mxu0 %vm605_vm1, %v1794_v53 }
 0xc57   : > { %2451 = vmatprep.mubr.msk.bf16.mxu0 %vm2749_vm0, %v2748_v0  ;;  %2436 = vmatpush3.bf16.msra.mxu0 %v2555_v56 }
 0xc58   : > { %2437 = vmatprep.subr.bf16.mxu0 %v2748_v0 }
 0xc5b   : > { %2438 = vmatpush3.bf16.msra.mxu0 %v2556_v57 }
 0xc5c   : > { %2439 = vmatprep.subr.bf16.mxu0 %v2748_v0 }
 0xc5f   : > { %2440 = vmatpush3.bf16.msra.mxu0 %v2557_v58 }
 0xc60   : > { %2441 = vmatprep.subr.bf16.mxu0 %v2748_v0 }
 0xc63   : > { %2442 = vmatpush3.bf16.msra.mxu0 %v2558_v59 }
 0xc64   : > { %2443 = vmatprep.subr.bf16.mxu0 %v2748_v0 }
 0xc67   : > { %2444 = vmatpush3.bf16.msra.mxu0 %v2559_v60 }
 0xc68   : > { %2445 = vmatprep.subr.bf16.mxu0 %v2748_v0 }
 0xc6b   : > { %2446 = vmatpush3.bf16.msra.mxu0 %v2560_v62 }
 0xc6c   : > { %2447 = vmatprep.subr.bf16.mxu0 %v2748_v0 }
 0xc6f   : > { %2448 = vmatpush3.bf16.msra.mxu0 %v2561_v63 }
 0xc70   : > { %2449 = vmatprep.subr.bf16.mxu0 %v2748_v0  ;;  %v2562_v0 = vld [vmem:[%s3287_s14] sm:$0xff]  }
 0xc73   : > { %2450 = vmatpush3.bf16.msra.mxu0 %v2562_v0 }
 0xd16   : > { %v1850_v2 = vpop.f32.mrf.mxu0 }
 0xd17   : > { %v1851_v4 = vadd.f32 %v2205_v1, %v1850_v2 }
 0xd18   : > { %v2425_v5 = vpop.f32.mrf.mxu0 }
 0xd19   : > { %v1856_v6 = vadd.f32 %v1851_v4, %v3090_v61 }
 0xd1a   : > { %v1853_v3 = vpop.f32.mrf.mxu0 }
 0xd1b   : > { %v1857_v8 = vpack.c.bf16 %v1856_v6, %v1856_v6 }
 0xd1c   : > { %v2426_v10 = vpop.f32.mrf.mxu0 }
 0xd1d   : > { %2432 = vmatmul.mubr.msk.bf16.vlgmr.msra.gmra.mxu1 %vm605_vm1, %v1857_v8 }
 0xddd   : > { %v1918_v12 = vpop.f32.mrf.mxu1 }
 0xdde   : > { %v1919_v13 = vadd.f32 %v2209_v11, %v1918_v12 }
 0xddf   : > { %v2433_v14 = vpop.f32.mrf.mxu1 }
 0xde0   : > { %v1924_v15 = vpack.c.bf16 %v1919_v13, %v1919_v13 }
 0xde1   : > { %v1921_v61 = vpop.f32.mrf.mxu1 }
 0xde2   : > { %2452 = vmatmul.mubr.bf16.vlgmr.msra.gmra.mxu0 %v1924_v15 }
 0xde3   : > { %v2434_v16 = vpop.f32.mrf.mxu1 }
 0xea2   : > { %v2030_v18 = vpop.f32.mrf.mxu0 }
 0xea3   : > { %v2031_v19 = vadd.f32 %v2213_v17, %v2030_v18 }
 0xea4   : > { %v2453_v7 = vpop.f32.mrf.mxu0 }
 0xea5   : > { %v2036_v20 = vadd.f32 %v2031_v19, %v1856_v6 }
 0xea6   : > { %v2033_v9 = vpop.f32.mrf.mxu0 }
 0xea7   : > { %2037 = vst.msk [vmem:[%s569_s21] sm:$0xff] %vm605_vm1, %v2036_v20 }
 0xea8   : > { %v2454_v21 = vpop.f32.mrf.mxu0 }
 0xea9   : > { %2686 = shalt.err (!%p2683_p0)
}
 0xeaa   : > { %s2687_s17 = scalar_lea.hbm %s3231_s24, 128  ;;  %s2691_s21 = scalar_lea.hbm %s3289_s16, 256 }
 0xeab   : > { %p2688_p6 = scmp.ne.s32.totalorder %s3231_s24, %s2687_s17  ;;  %p2692_p1 = scmp.lt.s32.totalorder %s3231_s24, %s3289_s16 }
 0xeac   : > { %p2693_p5 = scmp.lt.s32.totalorder %s2691_s21, %s2687_s17 }
 0xead   : > { %p2689_p9 = pnand %p2688_p6, %p3322_p12 }
 0xeae   : > { %p2694_p3 = por %p2693_p5, %p2692_p1 }
 0xeaf   : > { %p2690_p13 = pneg %p2689_p9 }
 0xeb1   : > { %p2695_p10 = pnand %p2694_p3, %p2690_p13 }
 0xeb3   : > { %2698 = shalt.err (!%p2695_p10)
}
 0xeb4   : > { %2467 = dma.vmem_to_hbm [thread:$0]  (%p3322_p12), %s3233_s19, 128, %s3231_s24, %s2039_s25  }
 0xeb5 PF: > { %s3323_s20 = sld [smem:[#allocation15_spill]] }
 0xeb6   : > { %s3324_s29 = sld [smem:[#allocation13_spill]] }
 0xeb7   : > { %s3325_s28 = sld [smem:[#allocation18_spill]] }
 0xebb   : > { %p2489_p2 = scmp.ge.s32.totalorder %s3323_s20, 2 }
 0xebc   : > { %s2064_s27 = sand.u32 1, %s3324_s29  }
 0xebd   : > { %p3326_p4 = scmp.ne.s32.totalorder %s3325_s28, 0  ;;  %s2065_s26 = scalar_lea.sflag [#allocation5], %s2064_s27 }
 0xebf   : > { %p2480_p7 = pnand %p2489_p2, %p3326_p4 }
 0xec1   : > { %p2481_p8 = pneg %p2480_p7 }
 0xec3   : > { %2724 = dma.done.wait (%p2481_p8), %s2065_s26, 128  }
 0xec4   : > { %2726 = vsyncadd (%p2481_p8), %s2065_s26, 4294967168  ;;  %s3327_s24 = sld [smem:[#allocation16_spill]]  ;;  %s3330_s21 = smov %s2733_s22 }
 0xec5   : > { %s3328_s17 = sld [smem:[#allocation14_spill]] }
 0xec6   : > { %s3329_s23 = sld [smem:[#allocation17_spill]] }
 0xeca   : > { %p28_p11 = scmp.ge.s32.totalorder %s3327_s24, 4  }
 0xecb   : > { %s3331_s22 = smov %s3328_s17 }
 0xecc   :  { %30 = sbr.rel (!%p28_p11) target bundleno = 7 (0x7), region = 135 }
 0xed1   :  { %2070 = vsyncpa [#allocation4], 1 }
 0xed2   :  { %2072 = vsyncpa [#allocation4 + $0x1], 1 }
 0xed3   :  { %2073 = vsyncpa [#allocation7], 1 }
 0xed4   :  { %2074 = vsyncpa [#allocation5], 1 }
 0xed5   :  { %2076 = vsyncpa [#allocation5 + $0x1], 1 }

</bundles_post_ra>
